<compile_context>
chip_gen: v7x
topology: tpu7x:2x2x1
jax: 0.10.0
libtpu: 0.0.40
codegen_flags: <defaults>
</compile_context>

<pallas_src>
import functools

import jax
import jax.numpy as jnp
from jax.experimental import pallas as pl
from jax.experimental.pallas import tpu as pltpu

F32 = jnp.float32
BF16 = jnp.bfloat16
NUM_GAT_LAYERS = 6  # 3 internal + 3 global
NEG_INF = -1e30


# ----------------------------------------------------------------------------
# Fused forward kernel
# ----------------------------------------------------------------------------

def make_fused_kernel(num_head, num_node, negative_slope=0.2, bn_eps=1e-5):
    """Builds the single fused kernel.

    Ref order: x, bias_int, bias_all, it_w, it_b,
               6 x (w_aug, gat_b, bn_gamma, bn_beta),
               merge_w_x, merge_w_i, merge_b, gp_w, gp_b, out_ref
    """

    def kernel(*refs):
        out_ref = refs[-1]
        x_ref, bint_ref, ball_ref, it_w_ref, it_b_ref = refs[0:5]
        layer_refs = refs[5:5 + 4 * NUM_GAT_LAYERS]
        (merge_wx_ref, merge_wi_ref, merge_b_ref,
         gp_w_ref, gp_b_ref) = refs[5 + 4 * NUM_GAT_LAYERS:5 + 4 * NUM_GAT_LAYERS + 5]

        x = x_ref[...]                               # (N, Din)
        n = x.shape[0]
        inv_n = jnp.float32(1.0 / n)
        ones_row = jnp.ones((1, n), F32)             # hoisted; MXU reduction operand

        # Hoisted per-head lane-selection masks (built once per distinct dout).
        sel_cache = {}

        def get_sels(dout):
            if dout not in sel_cache:
                k = dout // num_head
                col_ids = jax.lax.broadcasted_iota(jnp.int32, (1, dout), 1)
                sel_cache[dout] = [
                    jnp.where((col_ids >= hd * k) & (col_ids < (hd + 1) * k),
                              jnp.float32(1.0), jnp.float32(0.0))
                    for hd in range(num_head)]
            return sel_cache[dout]

        def gat_layer(h_in, bias_ref, waug_ref, gb_ref):
            bias = bias_ref[...].astype(F32)         # 0 / -1e30 additive mask, 1 convert/layer
            w_aug = waug_ref[...]                    # (Din, dout + 2H) = [W | W@Adst | W@Asrc]
            dout = w_aug.shape[1] - 2 * num_head
            h_aug = jnp.dot(h_in, w_aug, preferred_element_type=F32)   # [h | e_dst | e_src]
            h = h_aug[:, :dout]                                        # (N, dout)
            # tiny (N,H)->(H,N) transpose of the source attention terms
            e_src_t = jnp.transpose(h_aug[:, dout + num_head:dout + 2 * num_head])
            sels = get_sels(dout)
            out = jnp.zeros((n, dout), F32)
            for hd in range(num_head):
                # s[i, j] = score of edge j -> i
                s = h_aug[:, dout + hd:dout + hd + 1] + e_src_t[hd:hd + 1, :]   # (N, N)
                s = jnp.where(s > 0, s, negative_slope * s)          # leaky_relu(0.2)
                s = s + bias                                         # additive edge mask
                # softmax grouped by SOURCE node j (column-wise), as in softmax(alpha, ei[0])
                col_max = jnp.max(s, axis=0, keepdims=True)          # (1, N)
                e = jnp.exp(s - col_max)          # masked entries underflow to exactly 0
                denom = jnp.dot(ones_row, e, preferred_element_type=F32) + 1e-16   # MXU sum
                r_col = jnp.transpose(1.0 / denom)                   # (N, 1) exact per-source scale
                # fold 1/denom + head selection into the (N,dout) value operand, not the (N,N) e
                out = out + jnp.dot(e, h * (sels[hd] * r_col),
                                    preferred_element_type=F32)
            return jnp.maximum(out + gb_ref[...], 0.0)               # +bias, ReLU

        def bn_act(y, gamma_ref, beta_ref, leaky):
            # BatchNorm1d, training-mode batch statistics (biased variance); MXU reductions.
            mean = jnp.dot(ones_row, y, preferred_element_type=F32) * inv_n
            d = y - mean
            var = jnp.dot(ones_row, d * d, preferred_element_type=F32) * inv_n
            z = d * jax.lax.rsqrt(var + bn_eps) * gamma_ref[...] + beta_ref[...]
            if leaky:
                return jnp.where(z > 0, z, 0.1 * z)                  # LeakyReLU(0.1)
            return jnp.maximum(z, 0.0)                               # ReLU

        # ---- internal branch ----
        xi = jnp.dot(x, it_w_ref[...], preferred_element_type=F32) + it_b_ref[...]
        for layer in range(3):
            waug, gb, gam, bet = layer_refs[4 * layer:4 * layer + 4]
            xi = gat_layer(xi, bint_ref, waug, gb)
            xi = bn_act(xi, gam, bet, leaky=False)

        # ---- merge modalities: cat([x, xi]) @ Wm + b == x @ Wm_x + xi @ Wm_i + b ----
        xg = (jnp.dot(x, merge_wx_ref[...], preferred_element_type=F32)
              + jnp.dot(xi, merge_wi_ref[...], preferred_element_type=F32)
              + merge_b_ref[...])

        # ---- global branch ----
        for layer in range(3, 6):
            waug, gb, gam, bet = layer_refs[4 * layer:4 * layer + 4]
            xg = gat_layer(xg, ball_ref, waug, gb)
            xg = bn_act(xg, gam, bet, leaky=True)

        # ---- PowerMeanAggregation(learn=True, p=1): per-graph mean of clamp(x, 0, 100) ----
        xc = jnp.clip(xg, 0.0, 100.0)
        batch = n // num_node
        i_ids = jax.lax.broadcasted_iota(jnp.int32, (batch, n), 1)
        lower = jax.lax.broadcasted_iota(jnp.int32, (batch, n), 0) * num_node
        pool = jnp.where((i_ids >= lower) & (i_ids < lower + num_node),
                         jnp.float32(1.0 / num_node), jnp.float32(0.0))   # (B, N)
        pooled = jnp.dot(pool, xc, preferred_element_type=F32)            # (B, E)

        # ---- graph prediction ----
        out_ref[...] = (jnp.dot(pooled, gp_w_ref[...], preferred_element_type=F32)
                        + gp_b_ref[...])

    return kernel


# ----------------------------------------------------------------------------
# JAX glue
# ----------------------------------------------------------------------------

def edges_to_bias(edge_index, n):
    """Additive attention bias: 0 for edges + self-loops, -1e30 otherwise (bf16)."""
    src = edge_index[0]
    dst = edge_index[1]
    m = jnp.zeros((n, n), F32).at[dst, src].set(1.0)
    m = jnp.maximum(m, jnp.eye(n, dtype=F32))
    return jnp.where(m > 0, 0.0, NEG_INF).astype(BF16)


def _augment_gat_weight(w, att_dst, att_src, num_head):
    """W_aug = [W | W @ A_dst | W @ A_src]; one matmul yields [h | e_dst | e_src]."""
    k = att_dst.shape[1]
    dout = num_head * k
    adst_cols = jnp.zeros((dout, num_head), F32)
    asrc_cols = jnp.zeros((dout, num_head), F32)
    for hd in range(num_head):
        adst_cols = adst_cols.at[hd * k:(hd + 1) * k, hd].set(att_dst[hd])
        asrc_cols = asrc_cols.at[hd * k:(hd + 1) * k, hd].set(att_src[hd])
    return jnp.concatenate([w, w @ adst_cols, w @ asrc_cols], axis=1)


@functools.partial(jax.jit, static_argnames=("num_node", "num_head"))
def gat_decoder_forward(params, x, internal_edge_index, all_edge_index,
                        num_node, num_head):
    n, input_dim = x.shape
    batch = n // num_node
    bias_int = edges_to_bias(internal_edge_index, n)
    bias_all = edges_to_bias(all_edge_index, n)

    layer_names = ("internal_first", "internal_block", "internal_last",
                   "conv_first", "conv_block", "conv_last")

    args = [x, bias_int, bias_all,
            params["internal_transform"]["w"], params["internal_transform"]["b"]]
    for name in layer_names:
        p = params[name]
        bn = params[name + "_bn"]
        w_aug = _augment_gat_weight(p["w"], p["att_dst"], p["att_src"], num_head)
        args += [w_aug, p["b"], bn["gamma"], bn["beta"]]

    merge_w = params["merge"]["w"]
    args += [merge_w[:input_dim, :], merge_w[input_dim:, :], params["merge"]["b"],
             params["graph_prediction"]["w"], params["graph_prediction"]["b"]]

    hidden_dim = params["internal_transform"]["w"].shape[1]
    embedding_dim = params["graph_prediction"]["w"].shape[0]
    num_class = params["graph_prediction"]["w"].shape[1]

    # ---- cost estimate & VMEM budget (static shapes -> Python ints) ----
    H = num_head
    douts = [hidden_dim] * 5 + [embedding_dim]
    flops = 2 * n * input_dim * hidden_dim                       # internal_transform
    flops += 2 * n * (input_dim + hidden_dim) * hidden_dim       # merge
    din = hidden_dim
    for dout in douts:
        flops += 2 * n * din * (dout + 2 * H)                    # fused projection
        flops += H * (2 * n * n * dout + 12 * n * n)             # value matmul + scores + denom
        flops += 10 * n * dout                                   # bias/ReLU/BN
        din = dout
    flops += 2 * batch * n * embedding_dim + 2 * batch * embedding_dim * num_class
    transcendentals = NUM_GAT_LAYERS * H * n * n + NUM_GAT_LAYERS * max(hidden_dim, embedding_dim)
    in_bytes = sum(int(a.size) * a.dtype.itemsize for a in args)
    bytes_accessed = in_bytes + batch * num_class * 4
    cost = pl.CostEstimate(flops=int(flops), transcendentals=int(transcendentals),
                           bytes_accessed=int(bytes_accessed))
    scratch_bytes = 6 * n * n * 4 + 8 * n * max(hidden_dim, embedding_dim) * 4
    vmem_limit = int(min(64 * 1024 * 1024,
                         max(32 * 1024 * 1024, 2 * (in_bytes + scratch_bytes))))

    kernel = make_fused_kernel(num_head, num_node)
    output = pl.pallas_call(
        kernel,
        out_shape=jax.ShapeDtypeStruct((batch, num_class), F32),
        in_specs=[pl.BlockSpec(memory_space=pltpu.MemorySpace.VMEM)] * len(args),
        out_specs=pl.BlockSpec(memory_space=pltpu.MemorySpace.VMEM),
        compiler_params=pltpu.CompilerParams(vmem_limit_bytes=vmem_limit),
        cost_estimate=cost,
    )(*args)

    ypred = jnp.argmax(output, axis=1)
    return output, ypred


# ----------------------------------------------------------------------------
# Deterministic parameter initialization (shapes follow the PyTorch __init__)
# ----------------------------------------------------------------------------

def init_params(key, input_dim, hidden_dim, embedding_dim, num_head, num_class):
    keys = jax.random.split(key, 16)

    def lin(k, din, dout):
        lim = (6.0 / (din + dout)) ** 0.5
        return {"w": jax.random.uniform(k, (din, dout), F32, -lim, lim),
                "b": jnp.zeros((1, dout), F32)}

    def gat(k, din, dout):
        k1, k2 = jax.random.split(k)
        lim = (6.0 / (din + dout)) ** 0.5
        w = jax.random.uniform(k1, (din, dout), F32, -lim, lim)
        kh = dout // num_head
        lim_a = (6.0 / (num_head + 2 * kh)) ** 0.5
        att = jax.random.uniform(k2, (num_head, 2 * kh), F32, -lim_a, lim_a)
        return {"w": w,
                "att_dst": att[:, :kh],   # pairs with x_i (target)
                "att_src": att[:, kh:],   # pairs with x_j (source)
                "b": jnp.zeros((1, dout), F32)}

    def bn(dim):
        return {"gamma": jnp.ones((1, dim), F32), "beta": jnp.zeros((1, dim), F32)}

    return {
        "internal_transform": lin(keys[0], input_dim, hidden_dim),
        "internal_first": gat(keys[1], hidden_dim, hidden_dim),
        "internal_first_bn": bn(hidden_dim),
        "internal_block": gat(keys[2], hidden_dim, hidden_dim),
        "internal_block_bn": bn(hidden_dim),
        "internal_last": gat(keys[3], hidden_dim, hidden_dim),
        "internal_last_bn": bn(hidden_dim),
        "merge": lin(keys[4], input_dim + hidden_dim, hidden_dim),
        "conv_first": gat(keys[5], hidden_dim, hidden_dim),
        "conv_first_bn": bn(hidden_dim),
        "conv_block": gat(keys[6], hidden_dim, hidden_dim),
        "conv_block_bn": bn(hidden_dim),
        "conv_last": gat(keys[7], hidden_dim, embedding_dim),
        "conv_last_bn": bn(embedding_dim),
        "graph_prediction": lin(keys[8], embedding_dim, num_class),
    }


# ----------------------------------------------------------------------------
# Example run
# ----------------------------------------------------------------------------

if __name__ == "__main__":
    B, num_node = 2, 8
    input_dim, hidden_dim, embedding_dim = 16, 32, 32
    num_head, num_class = 2, 4
    N = B * num_node

    key = jax.random.PRNGKey(0)
    kp, kx = jax.random.split(key)
    params = init_params(kp, input_dim, hidden_dim, embedding_dim, num_head, num_class)
    x = jax.random.normal(kx, (N, input_dim), F32)

    # internal edges: bidirectional ring inside each graph
    src_i, dst_i = [], []
    for b in range(B):
        base = b * num_node
        for i in range(num_node):
            j = (i + 1) % num_node
            src_i += [base + i, base + j]
            dst_i += [base + j, base + i]
    internal_edge_index = jnp.array([src_i, dst_i], dtype=jnp.int32)

    # all edges: internal edges + a bidirectional chain over all nodes
    src_a, dst_a = list(src_i), list(dst_i)
    for i in range(N - 1):
        src_a += [i, i + 1]
        dst_a += [i + 1, i]
    all_edge_index = jnp.array([src_a, dst_a], dtype=jnp.int32)

    output, ypred = gat_decoder_forward(
        params, x, internal_edge_index, all_edge_index,
        num_node=num_node, num_head=num_head)
    jax.block_until_ready((output, ypred))
    assert output.shape == (B, num_class) and ypred.shape == (B,)
    print("KERNEL_OK")
</pallas_src>

<mosaic_0001>
module attributes {stable_mosaic.version = 11 : i64} {
  func.func @kernel(%arg0: memref<16x16xf32, #tpu.memory_space<vmem>>, %arg1: memref<16x16xbf16, #tpu.memory_space<vmem>>, %arg2: memref<16x16xbf16, #tpu.memory_space<vmem>>, %arg3: memref<16x32xf32, #tpu.memory_space<vmem>>, %arg4: memref<1x32xf32, #tpu.memory_space<vmem>>, %arg5: memref<32x36xf32, #tpu.memory_space<vmem>>, %arg6: memref<1x32xf32, #tpu.memory_space<vmem>>, %arg7: memref<1x32xf32, #tpu.memory_space<vmem>>, %arg8: memref<1x32xf32, #tpu.memory_space<vmem>>, %arg9: memref<32x36xf32, #tpu.memory_space<vmem>>, %arg10: memref<1x32xf32, #tpu.memory_space<vmem>>, %arg11: memref<1x32xf32, #tpu.memory_space<vmem>>, %arg12: memref<1x32xf32, #tpu.memory_space<vmem>>, %arg13: memref<32x36xf32, #tpu.memory_space<vmem>>, %arg14: memref<1x32xf32, #tpu.memory_space<vmem>>, %arg15: memref<1x32xf32, #tpu.memory_space<vmem>>, %arg16: memref<1x32xf32, #tpu.memory_space<vmem>>, %arg17: memref<32x36xf32, #tpu.memory_space<vmem>>, %arg18: memref<1x32xf32, #tpu.memory_space<vmem>>, %arg19: memref<1x32xf32, #tpu.memory_space<vmem>>, %arg20: memref<1x32xf32, #tpu.memory_space<vmem>>, %arg21: memref<32x36xf32, #tpu.memory_space<vmem>>, %arg22: memref<1x32xf32, #tpu.memory_space<vmem>>, %arg23: memref<1x32xf32, #tpu.memory_space<vmem>>, %arg24: memref<1x32xf32, #tpu.memory_space<vmem>>, %arg25: memref<32x36xf32, #tpu.memory_space<vmem>>, %arg26: memref<1x32xf32, #tpu.memory_space<vmem>>, %arg27: memref<1x32xf32, #tpu.memory_space<vmem>>, %arg28: memref<1x32xf32, #tpu.memory_space<vmem>>, %arg29: memref<16x32xf32, #tpu.memory_space<vmem>>, %arg30: memref<32x32xf32, #tpu.memory_space<vmem>>, %arg31: memref<1x32xf32, #tpu.memory_space<vmem>>, %arg32: memref<32x4xf32, #tpu.memory_space<vmem>>, %arg33: memref<1x4xf32, #tpu.memory_space<vmem>>, %arg34: memref<2x4xf32, #tpu.memory_space<vmem>>) attributes {dimension_semantics = [], scalar_prefetch = 0 : i64, scratch_operands = 0 : i64, tpu.core_type = #tpu.core_type<tc>} {
    %c0 = arith.constant 0 : index
    %c0_0 = arith.constant 0 : index
    %0 = vector.load %arg0[%c0, %c0_0] : memref<16x16xf32, #tpu.memory_space<vmem>>, vector<16x16xf32>
    %cst = arith.constant 1.000000e+00 : f32
    %1 = vector.broadcast %cst : f32 to vector<1x16xf32>
    %c0_1 = arith.constant 0 : index
    %c0_2 = arith.constant 0 : index
    %2 = vector.load %arg3[%c0_1, %c0_2] : memref<16x32xf32, #tpu.memory_space<vmem>>, vector<16x32xf32>
    %cst_3 = arith.constant dense<0.000000e+00> : vector<16x32xf32>
    %3 = tpu.matmul %0, %2, %cst_3 {dimension_numbers = #tpu.dot_dimension_numbers<[1], [0], [0], [1], [0, 0, 1, 1], [], []>} : vector<16x16xf32>, vector<16x32xf32>, vector<16x32xf32> -> vector<16x32xf32>
    %c0_4 = arith.constant 0 : index
    %c0_5 = arith.constant 0 : index
    %4 = vector.load %arg4[%c0_4, %c0_5] : memref<1x32xf32, #tpu.memory_space<vmem>>, vector<1x32xf32>
    %5 = vector.broadcast %4 : vector<1x32xf32> to vector<16x32xf32>
    %6 = arith.addf %3, %5 : vector<16x32xf32>
    %c0_6 = arith.constant 0 : index
    %c0_7 = arith.constant 0 : index
    %7 = vector.load %arg1[%c0_6, %c0_7] : memref<16x16xbf16, #tpu.memory_space<vmem>>, vector<16x16xbf16>
    %8 = arith.extf %7 : vector<16x16xbf16> to vector<16x16xf32>
    %c0_8 = arith.constant 0 : index
    %c0_9 = arith.constant 0 : index
    %9 = vector.load %arg5[%c0_8, %c0_9] : memref<32x36xf32, #tpu.memory_space<vmem>>, vector<32x36xf32>
    %cst_10 = arith.constant dense<0.000000e+00> : vector<16x36xf32>
    %10 = tpu.matmul %6, %9, %cst_10 {dimension_numbers = #tpu.dot_dimension_numbers<[1], [0], [0], [1], [0, 0, 1, 1], [], []>} : vector<16x32xf32>, vector<32x36xf32>, vector<16x36xf32> -> vector<16x36xf32>
    %11 = vector.extract_strided_slice %10 {offsets = [0, 0], sizes = [16, 32], strides = [1, 1]} : vector<16x36xf32> to vector<16x32xf32>
    %12 = vector.extract_strided_slice %10 {offsets = [0, 34], sizes = [16, 2], strides = [1, 1]} : vector<16x36xf32> to vector<16x2xf32>
    %13 = tpu.transpose %12, [1, 0] : vector<16x2xf32> -> vector<2x16xf32>
    %14 = tpu.iota {dimensions = array<i32: 1>} : vector<1x32xi32>
    %c0_i32 = arith.constant 0 : i32
    %15 = vector.broadcast %c0_i32 : i32 to vector<1x32xi32>
    %16 = arith.cmpi sge, %14, %15 : vector<1x32xi32>
    %c16_i32 = arith.constant 16 : i32
    %17 = vector.broadcast %c16_i32 : i32 to vector<1x32xi32>
    %18 = arith.cmpi slt, %14, %17 : vector<1x32xi32>
    %19 = arith.andi %16, %18 : vector<1x32xi1>
    %cst_11 = arith.constant 1.000000e+00 : f32
    %cst_12 = arith.constant 0.000000e+00 : f32
    %20 = vector.broadcast %cst_11 : f32 to vector<1x32xf32>
    %21 = vector.broadcast %cst_12 : f32 to vector<1x32xf32>
    %22 = arith.select %19, %20, %21 : vector<1x32xi1>, vector<1x32xf32>
    %c16_i32_13 = arith.constant 16 : i32
    %23 = vector.broadcast %c16_i32_13 : i32 to vector<1x32xi32>
    %24 = arith.cmpi sge, %14, %23 : vector<1x32xi32>
    %c32_i32 = arith.constant 32 : i32
    %25 = vector.broadcast %c32_i32 : i32 to vector<1x32xi32>
    %26 = arith.cmpi slt, %14, %25 : vector<1x32xi32>
    %27 = arith.andi %24, %26 : vector<1x32xi1>
    %cst_14 = arith.constant 1.000000e+00 : f32
    %cst_15 = arith.constant 0.000000e+00 : f32
    %28 = vector.broadcast %cst_14 : f32 to vector<1x32xf32>
    %29 = vector.broadcast %cst_15 : f32 to vector<1x32xf32>
    %30 = arith.select %27, %28, %29 : vector<1x32xi1>, vector<1x32xf32>
    %cst_16 = arith.constant 0.000000e+00 : f32
    %31 = vector.broadcast %cst_16 : f32 to vector<16x32xf32>
    %32 = vector.extract_strided_slice %10 {offsets = [0, 32], sizes = [16, 1], strides = [1, 1]} : vector<16x36xf32> to vector<16x1xf32>
    %33 = vector.extract_strided_slice %13 {offsets = [0, 0], sizes = [1, 16], strides = [1, 1]} : vector<2x16xf32> to vector<1x16xf32>
    %34 = vector.broadcast %32 : vector<16x1xf32> to vector<16x16xf32>
    %35 = vector.broadcast %33 : vector<1x16xf32> to vector<16x16xf32>
    %36 = arith.addf %34, %35 : vector<16x16xf32>
    %cst_17 = arith.constant 0.000000e+00 : f32
    %37 = vector.broadcast %cst_17 : f32 to vector<16x16xf32>
    %38 = arith.cmpf ogt, %36, %37 : vector<16x16xf32>
    %cst_18 = arith.constant 2.000000e-01 : f32
    %39 = vector.broadcast %cst_18 : f32 to vector<16x16xf32>
    %40 = arith.mulf %39, %36 : vector<16x16xf32>
    %41 = arith.select %38, %36, %40 : vector<16x16xi1>, vector<16x16xf32>
    %42 = arith.addf %41, %8 : vector<16x16xf32>
    %cst_19 = arith.constant dense<0xFF800000> : vector<16xf32>
    %43 = vector.multi_reduction <maximumf>, %42, %cst_19 [0] : vector<16x16xf32> to vector<16xf32>
    %44 = vector.shape_cast %43 : vector<16xf32> to vector<1x16xf32>
    %45 = vector.broadcast %44 : vector<1x16xf32> to vector<16x16xf32>
    %46 = arith.subf %42, %45 : vector<16x16xf32>
    %47 = math.exp %46 : vector<16x16xf32>
    %cst_20 = arith.constant dense<0.000000e+00> : vector<1x16xf32>
    %48 = tpu.matmul %1, %47, %cst_20 {dimension_numbers = #tpu.dot_dimension_numbers<[1], [0], [0], [1], [0, 0, 1, 1], [], []>} : vector<1x16xf32>, vector<16x16xf32>, vector<1x16xf32> -> vector<1x16xf32>
    %cst_21 = arith.constant 1.000000e-16 : f32
    %49 = vector.broadcast %cst_21 : f32 to vector<1x16xf32>
    %50 = arith.addf %48, %49 : vector<1x16xf32>
    %cst_22 = arith.constant 1.000000e+00 : f32
    %51 = vector.broadcast %cst_22 : f32 to vector<1x16xf32>
    %52 = arith.divf %51, %50 : vector<1x16xf32>
    %53 = tpu.transpose %52, [1, 0] : vector<1x16xf32> -> vector<16x1xf32>
    %54 = vector.broadcast %22 : vector<1x32xf32> to vector<16x32xf32>
    %55 = vector.broadcast %53 : vector<16x1xf32> to vector<16x32xf32>
    %56 = arith.mulf %54, %55 : vector<16x32xf32>
    %57 = arith.mulf %11, %56 : vector<16x32xf32>
    %cst_23 = arith.constant dense<0.000000e+00> : vector<16x32xf32>
    %58 = tpu.matmul %47, %57, %cst_23 {dimension_numbers = #tpu.dot_dimension_numbers<[1], [0], [0], [1], [0, 0, 1, 1], [], []>} : vector<16x16xf32>, vector<16x32xf32>, vector<16x32xf32> -> vector<16x32xf32>
    %59 = arith.addf %31, %58 : vector<16x32xf32>
    %60 = vector.extract_strided_slice %10 {offsets = [0, 33], sizes = [16, 1], strides = [1, 1]} : vector<16x36xf32> to vector<16x1xf32>
    %61 = vector.extract_strided_slice %13 {offsets = [1, 0], sizes = [1, 16], strides = [1, 1]} : vector<2x16xf32> to vector<1x16xf32>
    %62 = vector.broadcast %60 : vector<16x1xf32> to vector<16x16xf32>
    %63 = vector.broadcast %61 : vector<1x16xf32> to vector<16x16xf32>
    %64 = arith.addf %62, %63 : vector<16x16xf32>
    %cst_24 = arith.constant 0.000000e+00 : f32
    %65 = vector.broadcast %cst_24 : f32 to vector<16x16xf32>
    %66 = arith.cmpf ogt, %64, %65 : vector<16x16xf32>
    %cst_25 = arith.constant 2.000000e-01 : f32
    %67 = vector.broadcast %cst_25 : f32 to vector<16x16xf32>
    %68 = arith.mulf %67, %64 : vector<16x16xf32>
    %69 = arith.select %66, %64, %68 : vector<16x16xi1>, vector<16x16xf32>
    %70 = arith.addf %69, %8 : vector<16x16xf32>
    %cst_26 = arith.constant dense<0xFF800000> : vector<16xf32>
    %71 = vector.multi_reduction <maximumf>, %70, %cst_26 [0] : vector<16x16xf32> to vector<16xf32>
    %72 = vector.shape_cast %71 : vector<16xf32> to vector<1x16xf32>
    %73 = vector.broadcast %72 : vector<1x16xf32> to vector<16x16xf32>
    %74 = arith.subf %70, %73 : vector<16x16xf32>
    %75 = math.exp %74 : vector<16x16xf32>
    %cst_27 = arith.constant dense<0.000000e+00> : vector<1x16xf32>
    %76 = tpu.matmul %1, %75, %cst_27 {dimension_numbers = #tpu.dot_dimension_numbers<[1], [0], [0], [1], [0, 0, 1, 1], [], []>} : vector<1x16xf32>, vector<16x16xf32>, vector<1x16xf32> -> vector<1x16xf32>
    %cst_28 = arith.constant 1.000000e-16 : f32
    %77 = vector.broadcast %cst_28 : f32 to vector<1x16xf32>
    %78 = arith.addf %76, %77 : vector<1x16xf32>
    %cst_29 = arith.constant 1.000000e+00 : f32
    %79 = vector.broadcast %cst_29 : f32 to vector<1x16xf32>
    %80 = arith.divf %79, %78 : vector<1x16xf32>
    %81 = tpu.transpose %80, [1, 0] : vector<1x16xf32> -> vector<16x1xf32>
    %82 = vector.broadcast %30 : vector<1x32xf32> to vector<16x32xf32>
    %83 = vector.broadcast %81 : vector<16x1xf32> to vector<16x32xf32>
    %84 = arith.mulf %82, %83 : vector<16x32xf32>
    %85 = arith.mulf %11, %84 : vector<16x32xf32>
    %cst_30 = arith.constant dense<0.000000e+00> : vector<16x32xf32>
    %86 = tpu.matmul %75, %85, %cst_30 {dimension_numbers = #tpu.dot_dimension_numbers<[1], [0], [0], [1], [0, 0, 1, 1], [], []>} : vector<16x16xf32>, vector<16x32xf32>, vector<16x32xf32> -> vector<16x32xf32>
    %87 = arith.addf %59, %86 : vector<16x32xf32>
    %c0_31 = arith.constant 0 : index
    %c0_32 = arith.constant 0 : index
    %88 = vector.load %arg6[%c0_31, %c0_32] : memref<1x32xf32, #tpu.memory_space<vmem>>, vector<1x32xf32>
    %89 = vector.broadcast %88 : vector<1x32xf32> to vector<16x32xf32>
    %90 = arith.addf %87, %89 : vector<16x32xf32>
    %cst_33 = arith.constant 0.000000e+00 : f32
    %91 = vector.broadcast %cst_33 : f32 to vector<16x32xf32>
    %92 = arith.maximumf %90, %91 : vector<16x32xf32>
    %cst_34 = arith.constant dense<0.000000e+00> : vector<1x32xf32>
    %93 = tpu.matmul %1, %92, %cst_34 {dimension_numbers = #tpu.dot_dimension_numbers<[1], [0], [0], [1], [0, 0, 1, 1], [], []>} : vector<1x16xf32>, vector<16x32xf32>, vector<1x32xf32> -> vector<1x32xf32>
    %cst_35 = arith.constant 6.250000e-02 : f32
    %94 = vector.broadcast %cst_35 : f32 to vector<1x32xf32>
    %95 = arith.mulf %93, %94 : vector<1x32xf32>
    %96 = vector.broadcast %95 : vector<1x32xf32> to vector<16x32xf32>
    %97 = arith.subf %92, %96 : vector<16x32xf32>
    %98 = arith.mulf %97, %97 : vector<16x32xf32>
    %cst_36 = arith.constant dense<0.000000e+00> : vector<1x32xf32>
    %99 = tpu.matmul %1, %98, %cst_36 {dimension_numbers = #tpu.dot_dimension_numbers<[1], [0], [0], [1], [0, 0, 1, 1], [], []>} : vector<1x16xf32>, vector<16x32xf32>, vector<1x32xf32> -> vector<1x32xf32>
    %cst_37 = arith.constant 6.250000e-02 : f32
    %100 = vector.broadcast %cst_37 : f32 to vector<1x32xf32>
    %101 = arith.mulf %99, %100 : vector<1x32xf32>
    %cst_38 = arith.constant 9.99999974E-6 : f32
    %102 = vector.broadcast %cst_38 : f32 to vector<1x32xf32>
    %103 = arith.addf %101, %102 : vector<1x32xf32>
    %104 = math.rsqrt %103 : vector<1x32xf32>
    %105 = vector.broadcast %104 : vector<1x32xf32> to vector<16x32xf32>
    %106 = arith.mulf %97, %105 : vector<16x32xf32>
    %c0_39 = arith.constant 0 : index
    %c0_40 = arith.constant 0 : index
    %107 = vector.load %arg7[%c0_39, %c0_40] : memref<1x32xf32, #tpu.memory_space<vmem>>, vector<1x32xf32>
    %108 = vector.broadcast %107 : vector<1x32xf32> to vector<16x32xf32>
    %109 = arith.mulf %106, %108 : vector<16x32xf32>
    %c0_41 = arith.constant 0 : index
    %c0_42 = arith.constant 0 : index
    %110 = vector.load %arg8[%c0_41, %c0_42] : memref<1x32xf32, #tpu.memory_space<vmem>>, vector<1x32xf32>
    %111 = vector.broadcast %110 : vector<1x32xf32> to vector<16x32xf32>
    %112 = arith.addf %109, %111 : vector<16x32xf32>
    %cst_43 = arith.constant 0.000000e+00 : f32
    %113 = vector.broadcast %cst_43 : f32 to vector<16x32xf32>
    %114 = arith.maximumf %112, %113 : vector<16x32xf32>
    %c0_44 = arith.constant 0 : index
    %c0_45 = arith.constant 0 : index
    %115 = vector.load %arg1[%c0_44, %c0_45] : memref<16x16xbf16, #tpu.memory_space<vmem>>, vector<16x16xbf16>
    %116 = arith.extf %115 : vector<16x16xbf16> to vector<16x16xf32>
    %c0_46 = arith.constant 0 : index
    %c0_47 = arith.constant 0 : index
    %117 = vector.load %arg9[%c0_46, %c0_47] : memref<32x36xf32, #tpu.memory_space<vmem>>, vector<32x36xf32>
    %cst_48 = arith.constant dense<0.000000e+00> : vector<16x36xf32>
    %118 = tpu.matmul %114, %117, %cst_48 {dimension_numbers = #tpu.dot_dimension_numbers<[1], [0], [0], [1], [0, 0, 1, 1], [], []>} : vector<16x32xf32>, vector<32x36xf32>, vector<16x36xf32> -> vector<16x36xf32>
    %119 = vector.extract_strided_slice %118 {offsets = [0, 0], sizes = [16, 32], strides = [1, 1]} : vector<16x36xf32> to vector<16x32xf32>
    %120 = vector.extract_strided_slice %118 {offsets = [0, 34], sizes = [16, 2], strides = [1, 1]} : vector<16x36xf32> to vector<16x2xf32>
    %121 = tpu.transpose %120, [1, 0] : vector<16x2xf32> -> vector<2x16xf32>
    %cst_49 = arith.constant 0.000000e+00 : f32
    %122 = vector.broadcast %cst_49 : f32 to vector<16x32xf32>
    %123 = vector.extract_strided_slice %118 {offsets = [0, 32], sizes = [16, 1], strides = [1, 1]} : vector<16x36xf32> to vector<16x1xf32>
    %124 = vector.extract_strided_slice %121 {offsets = [0, 0], sizes = [1, 16], strides = [1, 1]} : vector<2x16xf32> to vector<1x16xf32>
    %125 = vector.broadcast %123 : vector<16x1xf32> to vector<16x16xf32>
    %126 = vector.broadcast %124 : vector<1x16xf32> to vector<16x16xf32>
    %127 = arith.addf %125, %126 : vector<16x16xf32>
    %cst_50 = arith.constant 0.000000e+00 : f32
    %128 = vector.broadcast %cst_50 : f32 to vector<16x16xf32>
    %129 = arith.cmpf ogt, %127, %128 : vector<16x16xf32>
    %cst_51 = arith.constant 2.000000e-01 : f32
    %130 = vector.broadcast %cst_51 : f32 to vector<16x16xf32>
    %131 = arith.mulf %130, %127 : vector<16x16xf32>
    %132 = arith.select %129, %127, %131 : vector<16x16xi1>, vector<16x16xf32>
    %133 = arith.addf %132, %116 : vector<16x16xf32>
    %cst_52 = arith.constant dense<0xFF800000> : vector<16xf32>
    %134 = vector.multi_reduction <maximumf>, %133, %cst_52 [0] : vector<16x16xf32> to vector<16xf32>
    %135 = vector.shape_cast %134 : vector<16xf32> to vector<1x16xf32>
    %136 = vector.broadcast %135 : vector<1x16xf32> to vector<16x16xf32>
    %137 = arith.subf %133, %136 : vector<16x16xf32>
    %138 = math.exp %137 : vector<16x16xf32>
    %cst_53 = arith.constant dense<0.000000e+00> : vector<1x16xf32>
    %139 = tpu.matmul %1, %138, %cst_53 {dimension_numbers = #tpu.dot_dimension_numbers<[1], [0], [0], [1], [0, 0, 1, 1], [], []>} : vector<1x16xf32>, vector<16x16xf32>, vector<1x16xf32> -> vector<1x16xf32>
    %cst_54 = arith.constant 1.000000e-16 : f32
    %140 = vector.broadcast %cst_54 : f32 to vector<1x16xf32>
    %141 = arith.addf %139, %140 : vector<1x16xf32>
    %cst_55 = arith.constant 1.000000e+00 : f32
    %142 = vector.broadcast %cst_55 : f32 to vector<1x16xf32>
    %143 = arith.divf %142, %141 : vector<1x16xf32>
    %144 = tpu.transpose %143, [1, 0] : vector<1x16xf32> -> vector<16x1xf32>
    %145 = vector.broadcast %22 : vector<1x32xf32> to vector<16x32xf32>
    %146 = vector.broadcast %144 : vector<16x1xf32> to vector<16x32xf32>
    %147 = arith.mulf %145, %146 : vector<16x32xf32>
    %148 = arith.mulf %119, %147 : vector<16x32xf32>
    %cst_56 = arith.constant dense<0.000000e+00> : vector<16x32xf32>
    %149 = tpu.matmul %138, %148, %cst_56 {dimension_numbers = #tpu.dot_dimension_numbers<[1], [0], [0], [1], [0, 0, 1, 1], [], []>} : vector<16x16xf32>, vector<16x32xf32>, vector<16x32xf32> -> vector<16x32xf32>
    %150 = arith.addf %122, %149 : vector<16x32xf32>
    %151 = vector.extract_strided_slice %118 {offsets = [0, 33], sizes = [16, 1], strides = [1, 1]} : vector<16x36xf32> to vector<16x1xf32>
    %152 = vector.extract_strided_slice %121 {offsets = [1, 0], sizes = [1, 16], strides = [1, 1]} : vector<2x16xf32> to vector<1x16xf32>
    %153 = vector.broadcast %151 : vector<16x1xf32> to vector<16x16xf32>
    %154 = vector.broadcast %152 : vector<1x16xf32> to vector<16x16xf32>
    %155 = arith.addf %153, %154 : vector<16x16xf32>
    %cst_57 = arith.constant 0.000000e+00 : f32
    %156 = vector.broadcast %cst_57 : f32 to vector<16x16xf32>
    %157 = arith.cmpf ogt, %155, %156 : vector<16x16xf32>
    %cst_58 = arith.constant 2.000000e-01 : f32
    %158 = vector.broadcast %cst_58 : f32 to vector<16x16xf32>
    %159 = arith.mulf %158, %155 : vector<16x16xf32>
    %160 = arith.select %157, %155, %159 : vector<16x16xi1>, vector<16x16xf32>
    %161 = arith.addf %160, %116 : vector<16x16xf32>
    %cst_59 = arith.constant dense<0xFF800000> : vector<16xf32>
    %162 = vector.multi_reduction <maximumf>, %161, %cst_59 [0] : vector<16x16xf32> to vector<16xf32>
    %163 = vector.shape_cast %162 : vector<16xf32> to vector<1x16xf32>
    %164 = vector.broadcast %163 : vector<1x16xf32> to vector<16x16xf32>
    %165 = arith.subf %161, %164 : vector<16x16xf32>
    %166 = math.exp %165 : vector<16x16xf32>
    %cst_60 = arith.constant dense<0.000000e+00> : vector<1x16xf32>
    %167 = tpu.matmul %1, %166, %cst_60 {dimension_numbers = #tpu.dot_dimension_numbers<[1], [0], [0], [1], [0, 0, 1, 1], [], []>} : vector<1x16xf32>, vector<16x16xf32>, vector<1x16xf32> -> vector<1x16xf32>
    %cst_61 = arith.constant 1.000000e-16 : f32
    %168 = vector.broadcast %cst_61 : f32 to vector<1x16xf32>
    %169 = arith.addf %167, %168 : vector<1x16xf32>
    %cst_62 = arith.constant 1.000000e+00 : f32
    %170 = vector.broadcast %cst_62 : f32 to vector<1x16xf32>
    %171 = arith.divf %170, %169 : vector<1x16xf32>
    %172 = tpu.transpose %171, [1, 0] : vector<1x16xf32> -> vector<16x1xf32>
    %173 = vector.broadcast %30 : vector<1x32xf32> to vector<16x32xf32>
    %174 = vector.broadcast %172 : vector<16x1xf32> to vector<16x32xf32>
    %175 = arith.mulf %173, %174 : vector<16x32xf32>
    %176 = arith.mulf %119, %175 : vector<16x32xf32>
    %cst_63 = arith.constant dense<0.000000e+00> : vector<16x32xf32>
    %177 = tpu.matmul %166, %176, %cst_63 {dimension_numbers = #tpu.dot_dimension_numbers<[1], [0], [0], [1], [0, 0, 1, 1], [], []>} : vector<16x16xf32>, vector<16x32xf32>, vector<16x32xf32> -> vector<16x32xf32>
    %178 = arith.addf %150, %177 : vector<16x32xf32>
    %c0_64 = arith.constant 0 : index
    %c0_65 = arith.constant 0 : index
    %179 = vector.load %arg10[%c0_64, %c0_65] : memref<1x32xf32, #tpu.memory_space<vmem>>, vector<1x32xf32>
    %180 = vector.broadcast %179 : vector<1x32xf32> to vector<16x32xf32>
    %181 = arith.addf %178, %180 : vector<16x32xf32>
    %cst_66 = arith.constant 0.000000e+00 : f32
    %182 = vector.broadcast %cst_66 : f32 to vector<16x32xf32>
    %183 = arith.maximumf %181, %182 : vector<16x32xf32>
    %cst_67 = arith.constant dense<0.000000e+00> : vector<1x32xf32>
    %184 = tpu.matmul %1, %183, %cst_67 {dimension_numbers = #tpu.dot_dimension_numbers<[1], [0], [0], [1], [0, 0, 1, 1], [], []>} : vector<1x16xf32>, vector<16x32xf32>, vector<1x32xf32> -> vector<1x32xf32>
    %cst_68 = arith.constant 6.250000e-02 : f32
    %185 = vector.broadcast %cst_68 : f32 to vector<1x32xf32>
    %186 = arith.mulf %184, %185 : vector<1x32xf32>
    %187 = vector.broadcast %186 : vector<1x32xf32> to vector<16x32xf32>
    %188 = arith.subf %183, %187 : vector<16x32xf32>
    %189 = arith.mulf %188, %188 : vector<16x32xf32>
    %cst_69 = arith.constant dense<0.000000e+00> : vector<1x32xf32>
    %190 = tpu.matmul %1, %189, %cst_69 {dimension_numbers = #tpu.dot_dimension_numbers<[1], [0], [0], [1], [0, 0, 1, 1], [], []>} : vector<1x16xf32>, vector<16x32xf32>, vector<1x32xf32> -> vector<1x32xf32>
    %cst_70 = arith.constant 6.250000e-02 : f32
    %191 = vector.broadcast %cst_70 : f32 to vector<1x32xf32>
    %192 = arith.mulf %190, %191 : vector<1x32xf32>
    %cst_71 = arith.constant 9.99999974E-6 : f32
    %193 = vector.broadcast %cst_71 : f32 to vector<1x32xf32>
    %194 = arith.addf %192, %193 : vector<1x32xf32>
    %195 = math.rsqrt %194 : vector<1x32xf32>
    %196 = vector.broadcast %195 : vector<1x32xf32> to vector<16x32xf32>
    %197 = arith.mulf %188, %196 : vector<16x32xf32>
    %c0_72 = arith.constant 0 : index
    %c0_73 = arith.constant 0 : index
    %198 = vector.load %arg11[%c0_72, %c0_73] : memref<1x32xf32, #tpu.memory_space<vmem>>, vector<1x32xf32>
    %199 = vector.broadcast %198 : vector<1x32xf32> to vector<16x32xf32>
    %200 = arith.mulf %197, %199 : vector<16x32xf32>
    %c0_74 = arith.constant 0 : index
    %c0_75 = arith.constant 0 : index
    %201 = vector.load %arg12[%c0_74, %c0_75] : memref<1x32xf32, #tpu.memory_space<vmem>>, vector<1x32xf32>
    %202 = vector.broadcast %201 : vector<1x32xf32> to vector<16x32xf32>
    %203 = arith.addf %200, %202 : vector<16x32xf32>
    %cst_76 = arith.constant 0.000000e+00 : f32
    %204 = vector.broadcast %cst_76 : f32 to vector<16x32xf32>
    %205 = arith.maximumf %203, %204 : vector<16x32xf32>
    %c0_77 = arith.constant 0 : index
    %c0_78 = arith.constant 0 : index
    %206 = vector.load %arg1[%c0_77, %c0_78] : memref<16x16xbf16, #tpu.memory_space<vmem>>, vector<16x16xbf16>
    %207 = arith.extf %206 : vector<16x16xbf16> to vector<16x16xf32>
    %c0_79 = arith.constant 0 : index
    %c0_80 = arith.constant 0 : index
    %208 = vector.load %arg13[%c0_79, %c0_80] : memref<32x36xf32, #tpu.memory_space<vmem>>, vector<32x36xf32>
    %cst_81 = arith.constant dense<0.000000e+00> : vector<16x36xf32>
    %209 = tpu.matmul %205, %208, %cst_81 {dimension_numbers = #tpu.dot_dimension_numbers<[1], [0], [0], [1], [0, 0, 1, 1], [], []>} : vector<16x32xf32>, vector<32x36xf32>, vector<16x36xf32> -> vector<16x36xf32>
    %210 = vector.extract_strided_slice %209 {offsets = [0, 0], sizes = [16, 32], strides = [1, 1]} : vector<16x36xf32> to vector<16x32xf32>
    %211 = vector.extract_strided_slice %209 {offsets = [0, 34], sizes = [16, 2], strides = [1, 1]} : vector<16x36xf32> to vector<16x2xf32>
    %212 = tpu.transpose %211, [1, 0] : vector<16x2xf32> -> vector<2x16xf32>
    %cst_82 = arith.constant 0.000000e+00 : f32
    %213 = vector.broadcast %cst_82 : f32 to vector<16x32xf32>
    %214 = vector.extract_strided_slice %209 {offsets = [0, 32], sizes = [16, 1], strides = [1, 1]} : vector<16x36xf32> to vector<16x1xf32>
    %215 = vector.extract_strided_slice %212 {offsets = [0, 0], sizes = [1, 16], strides = [1, 1]} : vector<2x16xf32> to vector<1x16xf32>
    %216 = vector.broadcast %214 : vector<16x1xf32> to vector<16x16xf32>
    %217 = vector.broadcast %215 : vector<1x16xf32> to vector<16x16xf32>
    %218 = arith.addf %216, %217 : vector<16x16xf32>
    %cst_83 = arith.constant 0.000000e+00 : f32
    %219 = vector.broadcast %cst_83 : f32 to vector<16x16xf32>
    %220 = arith.cmpf ogt, %218, %219 : vector<16x16xf32>
    %cst_84 = arith.constant 2.000000e-01 : f32
    %221 = vector.broadcast %cst_84 : f32 to vector<16x16xf32>
    %222 = arith.mulf %221, %218 : vector<16x16xf32>
    %223 = arith.select %220, %218, %222 : vector<16x16xi1>, vector<16x16xf32>
    %224 = arith.addf %223, %207 : vector<16x16xf32>
    %cst_85 = arith.constant dense<0xFF800000> : vector<16xf32>
    %225 = vector.multi_reduction <maximumf>, %224, %cst_85 [0] : vector<16x16xf32> to vector<16xf32>
    %226 = vector.shape_cast %225 : vector<16xf32> to vector<1x16xf32>
    %227 = vector.broadcast %226 : vector<1x16xf32> to vector<16x16xf32>
    %228 = arith.subf %224, %227 : vector<16x16xf32>
    %229 = math.exp %228 : vector<16x16xf32>
    %cst_86 = arith.constant dense<0.000000e+00> : vector<1x16xf32>
    %230 = tpu.matmul %1, %229, %cst_86 {dimension_numbers = #tpu.dot_dimension_numbers<[1], [0], [0], [1], [0, 0, 1, 1], [], []>} : vector<1x16xf32>, vector<16x16xf32>, vector<1x16xf32> -> vector<1x16xf32>
    %cst_87 = arith.constant 1.000000e-16 : f32
    %231 = vector.broadcast %cst_87 : f32 to vector<1x16xf32>
    %232 = arith.addf %230, %231 : vector<1x16xf32>
    %cst_88 = arith.constant 1.000000e+00 : f32
    %233 = vector.broadcast %cst_88 : f32 to vector<1x16xf32>
    %234 = arith.divf %233, %232 : vector<1x16xf32>
    %235 = tpu.transpose %234, [1, 0] : vector<1x16xf32> -> vector<16x1xf32>
    %236 = vector.broadcast %22 : vector<1x32xf32> to vector<16x32xf32>
    %237 = vector.broadcast %235 : vector<16x1xf32> to vector<16x32xf32>
    %238 = arith.mulf %236, %237 : vector<16x32xf32>
    %239 = arith.mulf %210, %238 : vector<16x32xf32>
    %cst_89 = arith.constant dense<0.000000e+00> : vector<16x32xf32>
    %240 = tpu.matmul %229, %239, %cst_89 {dimension_numbers = #tpu.dot_dimension_numbers<[1], [0], [0], [1], [0, 0, 1, 1], [], []>} : vector<16x16xf32>, vector<16x32xf32>, vector<16x32xf32> -> vector<16x32xf32>
    %241 = arith.addf %213, %240 : vector<16x32xf32>
    %242 = vector.extract_strided_slice %209 {offsets = [0, 33], sizes = [16, 1], strides = [1, 1]} : vector<16x36xf32> to vector<16x1xf32>
    %243 = vector.extract_strided_slice %212 {offsets = [1, 0], sizes = [1, 16], strides = [1, 1]} : vector<2x16xf32> to vector<1x16xf32>
    %244 = vector.broadcast %242 : vector<16x1xf32> to vector<16x16xf32>
    %245 = vector.broadcast %243 : vector<1x16xf32> to vector<16x16xf32>
    %246 = arith.addf %244, %245 : vector<16x16xf32>
    %cst_90 = arith.constant 0.000000e+00 : f32
    %247 = vector.broadcast %cst_90 : f32 to vector<16x16xf32>
    %248 = arith.cmpf ogt, %246, %247 : vector<16x16xf32>
    %cst_91 = arith.constant 2.000000e-01 : f32
    %249 = vector.broadcast %cst_91 : f32 to vector<16x16xf32>
    %250 = arith.mulf %249, %246 : vector<16x16xf32>
    %251 = arith.select %248, %246, %250 : vector<16x16xi1>, vector<16x16xf32>
    %252 = arith.addf %251, %207 : vector<16x16xf32>
    %cst_92 = arith.constant dense<0xFF800000> : vector<16xf32>
    %253 = vector.multi_reduction <maximumf>, %252, %cst_92 [0] : vector<16x16xf32> to vector<16xf32>
    %254 = vector.shape_cast %253 : vector<16xf32> to vector<1x16xf32>
    %255 = vector.broadcast %254 : vector<1x16xf32> to vector<16x16xf32>
    %256 = arith.subf %252, %255 : vector<16x16xf32>
    %257 = math.exp %256 : vector<16x16xf32>
    %cst_93 = arith.constant dense<0.000000e+00> : vector<1x16xf32>
    %258 = tpu.matmul %1, %257, %cst_93 {dimension_numbers = #tpu.dot_dimension_numbers<[1], [0], [0], [1], [0, 0, 1, 1], [], []>} : vector<1x16xf32>, vector<16x16xf32>, vector<1x16xf32> -> vector<1x16xf32>
    %cst_94 = arith.constant 1.000000e-16 : f32
    %259 = vector.broadcast %cst_94 : f32 to vector<1x16xf32>
    %260 = arith.addf %258, %259 : vector<1x16xf32>
    %cst_95 = arith.constant 1.000000e+00 : f32
    %261 = vector.broadcast %cst_95 : f32 to vector<1x16xf32>
    %262 = arith.divf %261, %260 : vector<1x16xf32>
    %263 = tpu.transpose %262, [1, 0] : vector<1x16xf32> -> vector<16x1xf32>
    %264 = vector.broadcast %30 : vector<1x32xf32> to vector<16x32xf32>
    %265 = vector.broadcast %263 : vector<16x1xf32> to vector<16x32xf32>
    %266 = arith.mulf %264, %265 : vector<16x32xf32>
    %267 = arith.mulf %210, %266 : vector<16x32xf32>
    %cst_96 = arith.constant dense<0.000000e+00> : vector<16x32xf32>
    %268 = tpu.matmul %257, %267, %cst_96 {dimension_numbers = #tpu.dot_dimension_numbers<[1], [0], [0], [1], [0, 0, 1, 1], [], []>} : vector<16x16xf32>, vector<16x32xf32>, vector<16x32xf32> -> vector<16x32xf32>
    %269 = arith.addf %241, %268 : vector<16x32xf32>
    %c0_97 = arith.constant 0 : index
    %c0_98 = arith.constant 0 : index
    %270 = vector.load %arg14[%c0_97, %c0_98] : memref<1x32xf32, #tpu.memory_space<vmem>>, vector<1x32xf32>
    %271 = vector.broadcast %270 : vector<1x32xf32> to vector<16x32xf32>
    %272 = arith.addf %269, %271 : vector<16x32xf32>
    %cst_99 = arith.constant 0.000000e+00 : f32
    %273 = vector.broadcast %cst_99 : f32 to vector<16x32xf32>
    %274 = arith.maximumf %272, %273 : vector<16x32xf32>
    %cst_100 = arith.constant dense<0.000000e+00> : vector<1x32xf32>
    %275 = tpu.matmul %1, %274, %cst_100 {dimension_numbers = #tpu.dot_dimension_numbers<[1], [0], [0], [1], [0, 0, 1, 1], [], []>} : vector<1x16xf32>, vector<16x32xf32>, vector<1x32xf32> -> vector<1x32xf32>
    %cst_101 = arith.constant 6.250000e-02 : f32
    %276 = vector.broadcast %cst_101 : f32 to vector<1x32xf32>
    %277 = arith.mulf %275, %276 : vector<1x32xf32>
    %278 = vector.broadcast %277 : vector<1x32xf32> to vector<16x32xf32>
    %279 = arith.subf %274, %278 : vector<16x32xf32>
    %280 = arith.mulf %279, %279 : vector<16x32xf32>
    %cst_102 = arith.constant dense<0.000000e+00> : vector<1x32xf32>
    %281 = tpu.matmul %1, %280, %cst_102 {dimension_numbers = #tpu.dot_dimension_numbers<[1], [0], [0], [1], [0, 0, 1, 1], [], []>} : vector<1x16xf32>, vector<16x32xf32>, vector<1x32xf32> -> vector<1x32xf32>
    %cst_103 = arith.constant 6.250000e-02 : f32
    %282 = vector.broadcast %cst_103 : f32 to vector<1x32xf32>
    %283 = arith.mulf %281, %282 : vector<1x32xf32>
    %cst_104 = arith.constant 9.99999974E-6 : f32
    %284 = vector.broadcast %cst_104 : f32 to vector<1x32xf32>
    %285 = arith.addf %283, %284 : vector<1x32xf32>
    %286 = math.rsqrt %285 : vector<1x32xf32>
    %287 = vector.broadcast %286 : vector<1x32xf32> to vector<16x32xf32>
    %288 = arith.mulf %279, %287 : vector<16x32xf32>
    %c0_105 = arith.constant 0 : index
    %c0_106 = arith.constant 0 : index
    %289 = vector.load %arg15[%c0_105, %c0_106] : memref<1x32xf32, #tpu.memory_space<vmem>>, vector<1x32xf32>
    %290 = vector.broadcast %289 : vector<1x32xf32> to vector<16x32xf32>
    %291 = arith.mulf %288, %290 : vector<16x32xf32>
    %c0_107 = arith.constant 0 : index
    %c0_108 = arith.constant 0 : index
    %292 = vector.load %arg16[%c0_107, %c0_108] : memref<1x32xf32, #tpu.memory_space<vmem>>, vector<1x32xf32>
    %293 = vector.broadcast %292 : vector<1x32xf32> to vector<16x32xf32>
    %294 = arith.addf %291, %293 : vector<16x32xf32>
    %cst_109 = arith.constant 0.000000e+00 : f32
    %295 = vector.broadcast %cst_109 : f32 to vector<16x32xf32>
    %296 = arith.maximumf %294, %295 : vector<16x32xf32>
    %c0_110 = arith.constant 0 : index
    %c0_111 = arith.constant 0 : index
    %297 = vector.load %arg29[%c0_110, %c0_111] : memref<16x32xf32, #tpu.memory_space<vmem>>, vector<16x32xf32>
    %cst_112 = arith.constant dense<0.000000e+00> : vector<16x32xf32>
    %298 = tpu.matmul %0, %297, %cst_112 {dimension_numbers = #tpu.dot_dimension_numbers<[1], [0], [0], [1], [0, 0, 1, 1], [], []>} : vector<16x16xf32>, vector<16x32xf32>, vector<16x32xf32> -> vector<16x32xf32>
    %c0_113 = arith.constant 0 : index
    %c0_114 = arith.constant 0 : index
    %299 = vector.load %arg30[%c0_113, %c0_114] : memref<32x32xf32, #tpu.memory_space<vmem>>, vector<32x32xf32>
    %cst_115 = arith.constant dense<0.000000e+00> : vector<16x32xf32>
    %300 = tpu.matmul %296, %299, %cst_115 {dimension_numbers = #tpu.dot_dimension_numbers<[1], [0], [0], [1], [0, 0, 1, 1], [], []>} : vector<16x32xf32>, vector<32x32xf32>, vector<16x32xf32> -> vector<16x32xf32>
    %301 = arith.addf %298, %300 : vector<16x32xf32>
    %c0_116 = arith.constant 0 : index
    %c0_117 = arith.constant 0 : index
    %302 = vector.load %arg31[%c0_116, %c0_117] : memref<1x32xf32, #tpu.memory_space<vmem>>, vector<1x32xf32>
    %303 = vector.broadcast %302 : vector<1x32xf32> to vector<16x32xf32>
    %304 = arith.addf %301, %303 : vector<16x32xf32>
    %c0_118 = arith.constant 0 : index
    %c0_119 = arith.constant 0 : index
    %305 = vector.load %arg2[%c0_118, %c0_119] : memref<16x16xbf16, #tpu.memory_space<vmem>>, vector<16x16xbf16>
    %306 = arith.extf %305 : vector<16x16xbf16> to vector<16x16xf32>
    %c0_120 = arith.constant 0 : index
    %c0_121 = arith.constant 0 : index
    %307 = vector.load %arg17[%c0_120, %c0_121] : memref<32x36xf32, #tpu.memory_space<vmem>>, vector<32x36xf32>
    %cst_122 = arith.constant dense<0.000000e+00> : vector<16x36xf32>
    %308 = tpu.matmul %304, %307, %cst_122 {dimension_numbers = #tpu.dot_dimension_numbers<[1], [0], [0], [1], [0, 0, 1, 1], [], []>} : vector<16x32xf32>, vector<32x36xf32>, vector<16x36xf32> -> vector<16x36xf32>
    %309 = vector.extract_strided_slice %308 {offsets = [0, 0], sizes = [16, 32], strides = [1, 1]} : vector<16x36xf32> to vector<16x32xf32>
    %310 = vector.extract_strided_slice %308 {offsets = [0, 34], sizes = [16, 2], strides = [1, 1]} : vector<16x36xf32> to vector<16x2xf32>
    %311 = tpu.transpose %310, [1, 0] : vector<16x2xf32> -> vector<2x16xf32>
    %cst_123 = arith.constant 0.000000e+00 : f32
    %312 = vector.broadcast %cst_123 : f32 to vector<16x32xf32>
    %313 = vector.extract_strided_slice %308 {offsets = [0, 32], sizes = [16, 1], strides = [1, 1]} : vector<16x36xf32> to vector<16x1xf32>
    %314 = vector.extract_strided_slice %311 {offsets = [0, 0], sizes = [1, 16], strides = [1, 1]} : vector<2x16xf32> to vector<1x16xf32>
    %315 = vector.broadcast %313 : vector<16x1xf32> to vector<16x16xf32>
    %316 = vector.broadcast %314 : vector<1x16xf32> to vector<16x16xf32>
    %317 = arith.addf %315, %316 : vector<16x16xf32>
    %cst_124 = arith.constant 0.000000e+00 : f32
    %318 = vector.broadcast %cst_124 : f32 to vector<16x16xf32>
    %319 = arith.cmpf ogt, %317, %318 : vector<16x16xf32>
    %cst_125 = arith.constant 2.000000e-01 : f32
    %320 = vector.broadcast %cst_125 : f32 to vector<16x16xf32>
    %321 = arith.mulf %320, %317 : vector<16x16xf32>
    %322 = arith.select %319, %317, %321 : vector<16x16xi1>, vector<16x16xf32>
    %323 = arith.addf %322, %306 : vector<16x16xf32>
    %cst_126 = arith.constant dense<0xFF800000> : vector<16xf32>
    %324 = vector.multi_reduction <maximumf>, %323, %cst_126 [0] : vector<16x16xf32> to vector<16xf32>
    %325 = vector.shape_cast %324 : vector<16xf32> to vector<1x16xf32>
    %326 = vector.broadcast %325 : vector<1x16xf32> to vector<16x16xf32>
    %327 = arith.subf %323, %326 : vector<16x16xf32>
    %328 = math.exp %327 : vector<16x16xf32>
    %cst_127 = arith.constant dense<0.000000e+00> : vector<1x16xf32>
    %329 = tpu.matmul %1, %328, %cst_127 {dimension_numbers = #tpu.dot_dimension_numbers<[1], [0], [0], [1], [0, 0, 1, 1], [], []>} : vector<1x16xf32>, vector<16x16xf32>, vector<1x16xf32> -> vector<1x16xf32>
    %cst_128 = arith.constant 1.000000e-16 : f32
    %330 = vector.broadcast %cst_128 : f32 to vector<1x16xf32>
    %331 = arith.addf %329, %330 : vector<1x16xf32>
    %cst_129 = arith.constant 1.000000e+00 : f32
    %332 = vector.broadcast %cst_129 : f32 to vector<1x16xf32>
    %333 = arith.divf %332, %331 : vector<1x16xf32>
    %334 = tpu.transpose %333, [1, 0] : vector<1x16xf32> -> vector<16x1xf32>
    %335 = vector.broadcast %22 : vector<1x32xf32> to vector<16x32xf32>
    %336 = vector.broadcast %334 : vector<16x1xf32> to vector<16x32xf32>
    %337 = arith.mulf %335, %336 : vector<16x32xf32>
    %338 = arith.mulf %309, %337 : vector<16x32xf32>
    %cst_130 = arith.constant dense<0.000000e+00> : vector<16x32xf32>
    %339 = tpu.matmul %328, %338, %cst_130 {dimension_numbers = #tpu.dot_dimension_numbers<[1], [0], [0], [1], [0, 0, 1, 1], [], []>} : vector<16x16xf32>, vector<16x32xf32>, vector<16x32xf32> -> vector<16x32xf32>
    %340 = arith.addf %312, %339 : vector<16x32xf32>
    %341 = vector.extract_strided_slice %308 {offsets = [0, 33], sizes = [16, 1], strides = [1, 1]} : vector<16x36xf32> to vector<16x1xf32>
    %342 = vector.extract_strided_slice %311 {offsets = [1, 0], sizes = [1, 16], strides = [1, 1]} : vector<2x16xf32> to vector<1x16xf32>
    %343 = vector.broadcast %341 : vector<16x1xf32> to vector<16x16xf32>
    %344 = vector.broadcast %342 : vector<1x16xf32> to vector<16x16xf32>
    %345 = arith.addf %343, %344 : vector<16x16xf32>
    %cst_131 = arith.constant 0.000000e+00 : f32
    %346 = vector.broadcast %cst_131 : f32 to vector<16x16xf32>
    %347 = arith.cmpf ogt, %345, %346 : vector<16x16xf32>
    %cst_132 = arith.constant 2.000000e-01 : f32
    %348 = vector.broadcast %cst_132 : f32 to vector<16x16xf32>
    %349 = arith.mulf %348, %345 : vector<16x16xf32>
    %350 = arith.select %347, %345, %349 : vector<16x16xi1>, vector<16x16xf32>
    %351 = arith.addf %350, %306 : vector<16x16xf32>
    %cst_133 = arith.constant dense<0xFF800000> : vector<16xf32>
    %352 = vector.multi_reduction <maximumf>, %351, %cst_133 [0] : vector<16x16xf32> to vector<16xf32>
    %353 = vector.shape_cast %352 : vector<16xf32> to vector<1x16xf32>
    %354 = vector.broadcast %353 : vector<1x16xf32> to vector<16x16xf32>
    %355 = arith.subf %351, %354 : vector<16x16xf32>
    %356 = math.exp %355 : vector<16x16xf32>
    %cst_134 = arith.constant dense<0.000000e+00> : vector<1x16xf32>
    %357 = tpu.matmul %1, %356, %cst_134 {dimension_numbers = #tpu.dot_dimension_numbers<[1], [0], [0], [1], [0, 0, 1, 1], [], []>} : vector<1x16xf32>, vector<16x16xf32>, vector<1x16xf32> -> vector<1x16xf32>
    %cst_135 = arith.constant 1.000000e-16 : f32
    %358 = vector.broadcast %cst_135 : f32 to vector<1x16xf32>
    %359 = arith.addf %357, %358 : vector<1x16xf32>
    %cst_136 = arith.constant 1.000000e+00 : f32
    %360 = vector.broadcast %cst_136 : f32 to vector<1x16xf32>
    %361 = arith.divf %360, %359 : vector<1x16xf32>
    %362 = tpu.transpose %361, [1, 0] : vector<1x16xf32> -> vector<16x1xf32>
    %363 = vector.broadcast %30 : vector<1x32xf32> to vector<16x32xf32>
    %364 = vector.broadcast %362 : vector<16x1xf32> to vector<16x32xf32>
    %365 = arith.mulf %363, %364 : vector<16x32xf32>
    %366 = arith.mulf %309, %365 : vector<16x32xf32>
    %cst_137 = arith.constant dense<0.000000e+00> : vector<16x32xf32>
    %367 = tpu.matmul %356, %366, %cst_137 {dimension_numbers = #tpu.dot_dimension_numbers<[1], [0], [0], [1], [0, 0, 1, 1], [], []>} : vector<16x16xf32>, vector<16x32xf32>, vector<16x32xf32> -> vector<16x32xf32>
    %368 = arith.addf %340, %367 : vector<16x32xf32>
    %c0_138 = arith.constant 0 : index
    %c0_139 = arith.constant 0 : index
    %369 = vector.load %arg18[%c0_138, %c0_139] : memref<1x32xf32, #tpu.memory_space<vmem>>, vector<1x32xf32>
    %370 = vector.broadcast %369 : vector<1x32xf32> to vector<16x32xf32>
    %371 = arith.addf %368, %370 : vector<16x32xf32>
    %cst_140 = arith.constant 0.000000e+00 : f32
    %372 = vector.broadcast %cst_140 : f32 to vector<16x32xf32>
    %373 = arith.maximumf %371, %372 : vector<16x32xf32>
    %cst_141 = arith.constant dense<0.000000e+00> : vector<1x32xf32>
    %374 = tpu.matmul %1, %373, %cst_141 {dimension_numbers = #tpu.dot_dimension_numbers<[1], [0], [0], [1], [0, 0, 1, 1], [], []>} : vector<1x16xf32>, vector<16x32xf32>, vector<1x32xf32> -> vector<1x32xf32>
    %cst_142 = arith.constant 6.250000e-02 : f32
    %375 = vector.broadcast %cst_142 : f32 to vector<1x32xf32>
    %376 = arith.mulf %374, %375 : vector<1x32xf32>
    %377 = vector.broadcast %376 : vector<1x32xf32> to vector<16x32xf32>
    %378 = arith.subf %373, %377 : vector<16x32xf32>
    %379 = arith.mulf %378, %378 : vector<16x32xf32>
    %cst_143 = arith.constant dense<0.000000e+00> : vector<1x32xf32>
    %380 = tpu.matmul %1, %379, %cst_143 {dimension_numbers = #tpu.dot_dimension_numbers<[1], [0], [0], [1], [0, 0, 1, 1], [], []>} : vector<1x16xf32>, vector<16x32xf32>, vector<1x32xf32> -> vector<1x32xf32>
    %cst_144 = arith.constant 6.250000e-02 : f32
    %381 = vector.broadcast %cst_144 : f32 to vector<1x32xf32>
    %382 = arith.mulf %380, %381 : vector<1x32xf32>
    %cst_145 = arith.constant 9.99999974E-6 : f32
    %383 = vector.broadcast %cst_145 : f32 to vector<1x32xf32>
    %384 = arith.addf %382, %383 : vector<1x32xf32>
    %385 = math.rsqrt %384 : vector<1x32xf32>
    %386 = vector.broadcast %385 : vector<1x32xf32> to vector<16x32xf32>
    %387 = arith.mulf %378, %386 : vector<16x32xf32>
    %c0_146 = arith.constant 0 : index
    %c0_147 = arith.constant 0 : index
    %388 = vector.load %arg19[%c0_146, %c0_147] : memref<1x32xf32, #tpu.memory_space<vmem>>, vector<1x32xf32>
    %389 = vector.broadcast %388 : vector<1x32xf32> to vector<16x32xf32>
    %390 = arith.mulf %387, %389 : vector<16x32xf32>
    %c0_148 = arith.constant 0 : index
    %c0_149 = arith.constant 0 : index
    %391 = vector.load %arg20[%c0_148, %c0_149] : memref<1x32xf32, #tpu.memory_space<vmem>>, vector<1x32xf32>
    %392 = vector.broadcast %391 : vector<1x32xf32> to vector<16x32xf32>
    %393 = arith.addf %390, %392 : vector<16x32xf32>
    %cst_150 = arith.constant 0.000000e+00 : f32
    %394 = vector.broadcast %cst_150 : f32 to vector<16x32xf32>
    %395 = arith.cmpf ogt, %393, %394 : vector<16x32xf32>
    %cst_151 = arith.constant 1.000000e-01 : f32
    %396 = vector.broadcast %cst_151 : f32 to vector<16x32xf32>
    %397 = arith.mulf %396, %393 : vector<16x32xf32>
    %398 = arith.select %395, %393, %397 : vector<16x32xi1>, vector<16x32xf32>
    %c0_152 = arith.constant 0 : index
    %c0_153 = arith.constant 0 : index
    %399 = vector.load %arg2[%c0_152, %c0_153] : memref<16x16xbf16, #tpu.memory_space<vmem>>, vector<16x16xbf16>
    %400 = arith.extf %399 : vector<16x16xbf16> to vector<16x16xf32>
    %c0_154 = arith.constant 0 : index
    %c0_155 = arith.constant 0 : index
    %401 = vector.load %arg21[%c0_154, %c0_155] : memref<32x36xf32, #tpu.memory_space<vmem>>, vector<32x36xf32>
    %cst_156 = arith.constant dense<0.000000e+00> : vector<16x36xf32>
    %402 = tpu.matmul %398, %401, %cst_156 {dimension_numbers = #tpu.dot_dimension_numbers<[1], [0], [0], [1], [0, 0, 1, 1], [], []>} : vector<16x32xf32>, vector<32x36xf32>, vector<16x36xf32> -> vector<16x36xf32>
    %403 = vector.extract_strided_slice %402 {offsets = [0, 0], sizes = [16, 32], strides = [1, 1]} : vector<16x36xf32> to vector<16x32xf32>
    %404 = vector.extract_strided_slice %402 {offsets = [0, 34], sizes = [16, 2], strides = [1, 1]} : vector<16x36xf32> to vector<16x2xf32>
    %405 = tpu.transpose %404, [1, 0] : vector<16x2xf32> -> vector<2x16xf32>
    %cst_157 = arith.constant 0.000000e+00 : f32
    %406 = vector.broadcast %cst_157 : f32 to vector<16x32xf32>
    %407 = vector.extract_strided_slice %402 {offsets = [0, 32], sizes = [16, 1], strides = [1, 1]} : vector<16x36xf32> to vector<16x1xf32>
    %408 = vector.extract_strided_slice %405 {offsets = [0, 0], sizes = [1, 16], strides = [1, 1]} : vector<2x16xf32> to vector<1x16xf32>
    %409 = vector.broadcast %407 : vector<16x1xf32> to vector<16x16xf32>
    %410 = vector.broadcast %408 : vector<1x16xf32> to vector<16x16xf32>
    %411 = arith.addf %409, %410 : vector<16x16xf32>
    %cst_158 = arith.constant 0.000000e+00 : f32
    %412 = vector.broadcast %cst_158 : f32 to vector<16x16xf32>
    %413 = arith.cmpf ogt, %411, %412 : vector<16x16xf32>
    %cst_159 = arith.constant 2.000000e-01 : f32
    %414 = vector.broadcast %cst_159 : f32 to vector<16x16xf32>
    %415 = arith.mulf %414, %411 : vector<16x16xf32>
    %416 = arith.select %413, %411, %415 : vector<16x16xi1>, vector<16x16xf32>
    %417 = arith.addf %416, %400 : vector<16x16xf32>
    %cst_160 = arith.constant dense<0xFF800000> : vector<16xf32>
    %418 = vector.multi_reduction <maximumf>, %417, %cst_160 [0] : vector<16x16xf32> to vector<16xf32>
    %419 = vector.shape_cast %418 : vector<16xf32> to vector<1x16xf32>
    %420 = vector.broadcast %419 : vector<1x16xf32> to vector<16x16xf32>
    %421 = arith.subf %417, %420 : vector<16x16xf32>
    %422 = math.exp %421 : vector<16x16xf32>
    %cst_161 = arith.constant dense<0.000000e+00> : vector<1x16xf32>
    %423 = tpu.matmul %1, %422, %cst_161 {dimension_numbers = #tpu.dot_dimension_numbers<[1], [0], [0], [1], [0, 0, 1, 1], [], []>} : vector<1x16xf32>, vector<16x16xf32>, vector<1x16xf32> -> vector<1x16xf32>
    %cst_162 = arith.constant 1.000000e-16 : f32
    %424 = vector.broadcast %cst_162 : f32 to vector<1x16xf32>
    %425 = arith.addf %423, %424 : vector<1x16xf32>
    %cst_163 = arith.constant 1.000000e+00 : f32
    %426 = vector.broadcast %cst_163 : f32 to vector<1x16xf32>
    %427 = arith.divf %426, %425 : vector<1x16xf32>
    %428 = tpu.transpose %427, [1, 0] : vector<1x16xf32> -> vector<16x1xf32>
    %429 = vector.broadcast %22 : vector<1x32xf32> to vector<16x32xf32>
    %430 = vector.broadcast %428 : vector<16x1xf32> to vector<16x32xf32>
    %431 = arith.mulf %429, %430 : vector<16x32xf32>
    %432 = arith.mulf %403, %431 : vector<16x32xf32>
    %cst_164 = arith.constant dense<0.000000e+00> : vector<16x32xf32>
    %433 = tpu.matmul %422, %432, %cst_164 {dimension_numbers = #tpu.dot_dimension_numbers<[1], [0], [0], [1], [0, 0, 1, 1], [], []>} : vector<16x16xf32>, vector<16x32xf32>, vector<16x32xf32> -> vector<16x32xf32>
    %434 = arith.addf %406, %433 : vector<16x32xf32>
    %435 = vector.extract_strided_slice %402 {offsets = [0, 33], sizes = [16, 1], strides = [1, 1]} : vector<16x36xf32> to vector<16x1xf32>
    %436 = vector.extract_strided_slice %405 {offsets = [1, 0], sizes = [1, 16], strides = [1, 1]} : vector<2x16xf32> to vector<1x16xf32>
    %437 = vector.broadcast %435 : vector<16x1xf32> to vector<16x16xf32>
    %438 = vector.broadcast %436 : vector<1x16xf32> to vector<16x16xf32>
    %439 = arith.addf %437, %438 : vector<16x16xf32>
    %cst_165 = arith.constant 0.000000e+00 : f32
    %440 = vector.broadcast %cst_165 : f32 to vector<16x16xf32>
    %441 = arith.cmpf ogt, %439, %440 : vector<16x16xf32>
    %cst_166 = arith.constant 2.000000e-01 : f32
    %442 = vector.broadcast %cst_166 : f32 to vector<16x16xf32>
    %443 = arith.mulf %442, %439 : vector<16x16xf32>
    %444 = arith.select %441, %439, %443 : vector<16x16xi1>, vector<16x16xf32>
    %445 = arith.addf %444, %400 : vector<16x16xf32>
    %cst_167 = arith.constant dense<0xFF800000> : vector<16xf32>
    %446 = vector.multi_reduction <maximumf>, %445, %cst_167 [0] : vector<16x16xf32> to vector<16xf32>
    %447 = vector.shape_cast %446 : vector<16xf32> to vector<1x16xf32>
    %448 = vector.broadcast %447 : vector<1x16xf32> to vector<16x16xf32>
    %449 = arith.subf %445, %448 : vector<16x16xf32>
    %450 = math.exp %449 : vector<16x16xf32>
    %cst_168 = arith.constant dense<0.000000e+00> : vector<1x16xf32>
    %451 = tpu.matmul %1, %450, %cst_168 {dimension_numbers = #tpu.dot_dimension_numbers<[1], [0], [0], [1], [0, 0, 1, 1], [], []>} : vector<1x16xf32>, vector<16x16xf32>, vector<1x16xf32> -> vector<1x16xf32>
    %cst_169 = arith.constant 1.000000e-16 : f32
    %452 = vector.broadcast %cst_169 : f32 to vector<1x16xf32>
    %453 = arith.addf %451, %452 : vector<1x16xf32>
    %cst_170 = arith.constant 1.000000e+00 : f32
    %454 = vector.broadcast %cst_170 : f32 to vector<1x16xf32>
    %455 = arith.divf %454, %453 : vector<1x16xf32>
    %456 = tpu.transpose %455, [1, 0] : vector<1x16xf32> -> vector<16x1xf32>
    %457 = vector.broadcast %30 : vector<1x32xf32> to vector<16x32xf32>
    %458 = vector.broadcast %456 : vector<16x1xf32> to vector<16x32xf32>
    %459 = arith.mulf %457, %458 : vector<16x32xf32>
    %460 = arith.mulf %403, %459 : vector<16x32xf32>
    %cst_171 = arith.constant dense<0.000000e+00> : vector<16x32xf32>
    %461 = tpu.matmul %450, %460, %cst_171 {dimension_numbers = #tpu.dot_dimension_numbers<[1], [0], [0], [1], [0, 0, 1, 1], [], []>} : vector<16x16xf32>, vector<16x32xf32>, vector<16x32xf32> -> vector<16x32xf32>
    %462 = arith.addf %434, %461 : vector<16x32xf32>
    %c0_172 = arith.constant 0 : index
    %c0_173 = arith.constant 0 : index
    %463 = vector.load %arg22[%c0_172, %c0_173] : memref<1x32xf32, #tpu.memory_space<vmem>>, vector<1x32xf32>
    %464 = vector.broadcast %463 : vector<1x32xf32> to vector<16x32xf32>
    %465 = arith.addf %462, %464 : vector<16x32xf32>
    %cst_174 = arith.constant 0.000000e+00 : f32
    %466 = vector.broadcast %cst_174 : f32 to vector<16x32xf32>
    %467 = arith.maximumf %465, %466 : vector<16x32xf32>
    %cst_175 = arith.constant dense<0.000000e+00> : vector<1x32xf32>
    %468 = tpu.matmul %1, %467, %cst_175 {dimension_numbers = #tpu.dot_dimension_numbers<[1], [0], [0], [1], [0, 0, 1, 1], [], []>} : vector<1x16xf32>, vector<16x32xf32>, vector<1x32xf32> -> vector<1x32xf32>
    %cst_176 = arith.constant 6.250000e-02 : f32
    %469 = vector.broadcast %cst_176 : f32 to vector<1x32xf32>
    %470 = arith.mulf %468, %469 : vector<1x32xf32>
    %471 = vector.broadcast %470 : vector<1x32xf32> to vector<16x32xf32>
    %472 = arith.subf %467, %471 : vector<16x32xf32>
    %473 = arith.mulf %472, %472 : vector<16x32xf32>
    %cst_177 = arith.constant dense<0.000000e+00> : vector<1x32xf32>
    %474 = tpu.matmul %1, %473, %cst_177 {dimension_numbers = #tpu.dot_dimension_numbers<[1], [0], [0], [1], [0, 0, 1, 1], [], []>} : vector<1x16xf32>, vector<16x32xf32>, vector<1x32xf32> -> vector<1x32xf32>
    %cst_178 = arith.constant 6.250000e-02 : f32
    %475 = vector.broadcast %cst_178 : f32 to vector<1x32xf32>
    %476 = arith.mulf %474, %475 : vector<1x32xf32>
    %cst_179 = arith.constant 9.99999974E-6 : f32
    %477 = vector.broadcast %cst_179 : f32 to vector<1x32xf32>
    %478 = arith.addf %476, %477 : vector<1x32xf32>
    %479 = math.rsqrt %478 : vector<1x32xf32>
    %480 = vector.broadcast %479 : vector<1x32xf32> to vector<16x32xf32>
    %481 = arith.mulf %472, %480 : vector<16x32xf32>
    %c0_180 = arith.constant 0 : index
    %c0_181 = arith.constant 0 : index
    %482 = vector.load %arg23[%c0_180, %c0_181] : memref<1x32xf32, #tpu.memory_space<vmem>>, vector<1x32xf32>
    %483 = vector.broadcast %482 : vector<1x32xf32> to vector<16x32xf32>
    %484 = arith.mulf %481, %483 : vector<16x32xf32>
    %c0_182 = arith.constant 0 : index
    %c0_183 = arith.constant 0 : index
    %485 = vector.load %arg24[%c0_182, %c0_183] : memref<1x32xf32, #tpu.memory_space<vmem>>, vector<1x32xf32>
    %486 = vector.broadcast %485 : vector<1x32xf32> to vector<16x32xf32>
    %487 = arith.addf %484, %486 : vector<16x32xf32>
    %cst_184 = arith.constant 0.000000e+00 : f32
    %488 = vector.broadcast %cst_184 : f32 to vector<16x32xf32>
    %489 = arith.cmpf ogt, %487, %488 : vector<16x32xf32>
    %cst_185 = arith.constant 1.000000e-01 : f32
    %490 = vector.broadcast %cst_185 : f32 to vector<16x32xf32>
    %491 = arith.mulf %490, %487 : vector<16x32xf32>
    %492 = arith.select %489, %487, %491 : vector<16x32xi1>, vector<16x32xf32>
    %c0_186 = arith.constant 0 : index
    %c0_187 = arith.constant 0 : index
    %493 = vector.load %arg2[%c0_186, %c0_187] : memref<16x16xbf16, #tpu.memory_space<vmem>>, vector<16x16xbf16>
    %494 = arith.extf %493 : vector<16x16xbf16> to vector<16x16xf32>
    %c0_188 = arith.constant 0 : index
    %c0_189 = arith.constant 0 : index
    %495 = vector.load %arg25[%c0_188, %c0_189] : memref<32x36xf32, #tpu.memory_space<vmem>>, vector<32x36xf32>
    %cst_190 = arith.constant dense<0.000000e+00> : vector<16x36xf32>
    %496 = tpu.matmul %492, %495, %cst_190 {dimension_numbers = #tpu.dot_dimension_numbers<[1], [0], [0], [1], [0, 0, 1, 1], [], []>} : vector<16x32xf32>, vector<32x36xf32>, vector<16x36xf32> -> vector<16x36xf32>
    %497 = vector.extract_strided_slice %496 {offsets = [0, 0], sizes = [16, 32], strides = [1, 1]} : vector<16x36xf32> to vector<16x32xf32>
    %498 = vector.extract_strided_slice %496 {offsets = [0, 34], sizes = [16, 2], strides = [1, 1]} : vector<16x36xf32> to vector<16x2xf32>
    %499 = tpu.transpose %498, [1, 0] : vector<16x2xf32> -> vector<2x16xf32>
    %cst_191 = arith.constant 0.000000e+00 : f32
    %500 = vector.broadcast %cst_191 : f32 to vector<16x32xf32>
    %501 = vector.extract_strided_slice %496 {offsets = [0, 32], sizes = [16, 1], strides = [1, 1]} : vector<16x36xf32> to vector<16x1xf32>
    %502 = vector.extract_strided_slice %499 {offsets = [0, 0], sizes = [1, 16], strides = [1, 1]} : vector<2x16xf32> to vector<1x16xf32>
    %503 = vector.broadcast %501 : vector<16x1xf32> to vector<16x16xf32>
    %504 = vector.broadcast %502 : vector<1x16xf32> to vector<16x16xf32>
    %505 = arith.addf %503, %504 : vector<16x16xf32>
    %cst_192 = arith.constant 0.000000e+00 : f32
    %506 = vector.broadcast %cst_192 : f32 to vector<16x16xf32>
    %507 = arith.cmpf ogt, %505, %506 : vector<16x16xf32>
    %cst_193 = arith.constant 2.000000e-01 : f32
    %508 = vector.broadcast %cst_193 : f32 to vector<16x16xf32>
    %509 = arith.mulf %508, %505 : vector<16x16xf32>
    %510 = arith.select %507, %505, %509 : vector<16x16xi1>, vector<16x16xf32>
    %511 = arith.addf %510, %494 : vector<16x16xf32>
    %cst_194 = arith.constant dense<0xFF800000> : vector<16xf32>
    %512 = vector.multi_reduction <maximumf>, %511, %cst_194 [0] : vector<16x16xf32> to vector<16xf32>
    %513 = vector.shape_cast %512 : vector<16xf32> to vector<1x16xf32>
    %514 = vector.broadcast %513 : vector<1x16xf32> to vector<16x16xf32>
    %515 = arith.subf %511, %514 : vector<16x16xf32>
    %516 = math.exp %515 : vector<16x16xf32>
    %cst_195 = arith.constant dense<0.000000e+00> : vector<1x16xf32>
    %517 = tpu.matmul %1, %516, %cst_195 {dimension_numbers = #tpu.dot_dimension_numbers<[1], [0], [0], [1], [0, 0, 1, 1], [], []>} : vector<1x16xf32>, vector<16x16xf32>, vector<1x16xf32> -> vector<1x16xf32>
    %cst_196 = arith.constant 1.000000e-16 : f32
    %518 = vector.broadcast %cst_196 : f32 to vector<1x16xf32>
    %519 = arith.addf %517, %518 : vector<1x16xf32>
    %cst_197 = arith.constant 1.000000e+00 : f32
    %520 = vector.broadcast %cst_197 : f32 to vector<1x16xf32>
    %521 = arith.divf %520, %519 : vector<1x16xf32>
    %522 = tpu.transpose %521, [1, 0] : vector<1x16xf32> -> vector<16x1xf32>
    %523 = vector.broadcast %22 : vector<1x32xf32> to vector<16x32xf32>
    %524 = vector.broadcast %522 : vector<16x1xf32> to vector<16x32xf32>
    %525 = arith.mulf %523, %524 : vector<16x32xf32>
    %526 = arith.mulf %497, %525 : vector<16x32xf32>
    %cst_198 = arith.constant dense<0.000000e+00> : vector<16x32xf32>
    %527 = tpu.matmul %516, %526, %cst_198 {dimension_numbers = #tpu.dot_dimension_numbers<[1], [0], [0], [1], [0, 0, 1, 1], [], []>} : vector<16x16xf32>, vector<16x32xf32>, vector<16x32xf32> -> vector<16x32xf32>
    %528 = arith.addf %500, %527 : vector<16x32xf32>
    %529 = vector.extract_strided_slice %496 {offsets = [0, 33], sizes = [16, 1], strides = [1, 1]} : vector<16x36xf32> to vector<16x1xf32>
    %530 = vector.extract_strided_slice %499 {offsets = [1, 0], sizes = [1, 16], strides = [1, 1]} : vector<2x16xf32> to vector<1x16xf32>
    %531 = vector.broadcast %529 : vector<16x1xf32> to vector<16x16xf32>
    %532 = vector.broadcast %530 : vector<1x16xf32> to vector<16x16xf32>
    %533 = arith.addf %531, %532 : vector<16x16xf32>
    %cst_199 = arith.constant 0.000000e+00 : f32
    %534 = vector.broadcast %cst_199 : f32 to vector<16x16xf32>
    %535 = arith.cmpf ogt, %533, %534 : vector<16x16xf32>
    %cst_200 = arith.constant 2.000000e-01 : f32
    %536 = vector.broadcast %cst_200 : f32 to vector<16x16xf32>
    %537 = arith.mulf %536, %533 : vector<16x16xf32>
    %538 = arith.select %535, %533, %537 : vector<16x16xi1>, vector<16x16xf32>
    %539 = arith.addf %538, %494 : vector<16x16xf32>
    %cst_201 = arith.constant dense<0xFF800000> : vector<16xf32>
    %540 = vector.multi_reduction <maximumf>, %539, %cst_201 [0] : vector<16x16xf32> to vector<16xf32>
    %541 = vector.shape_cast %540 : vector<16xf32> to vector<1x16xf32>
    %542 = vector.broadcast %541 : vector<1x16xf32> to vector<16x16xf32>
    %543 = arith.subf %539, %542 : vector<16x16xf32>
    %544 = math.exp %543 : vector<16x16xf32>
    %cst_202 = arith.constant dense<0.000000e+00> : vector<1x16xf32>
    %545 = tpu.matmul %1, %544, %cst_202 {dimension_numbers = #tpu.dot_dimension_numbers<[1], [0], [0], [1], [0, 0, 1, 1], [], []>} : vector<1x16xf32>, vector<16x16xf32>, vector<1x16xf32> -> vector<1x16xf32>
    %cst_203 = arith.constant 1.000000e-16 : f32
    %546 = vector.broadcast %cst_203 : f32 to vector<1x16xf32>
    %547 = arith.addf %545, %546 : vector<1x16xf32>
    %cst_204 = arith.constant 1.000000e+00 : f32
    %548 = vector.broadcast %cst_204 : f32 to vector<1x16xf32>
    %549 = arith.divf %548, %547 : vector<1x16xf32>
    %550 = tpu.transpose %549, [1, 0] : vector<1x16xf32> -> vector<16x1xf32>
    %551 = vector.broadcast %30 : vector<1x32xf32> to vector<16x32xf32>
    %552 = vector.broadcast %550 : vector<16x1xf32> to vector<16x32xf32>
    %553 = arith.mulf %551, %552 : vector<16x32xf32>
    %554 = arith.mulf %497, %553 : vector<16x32xf32>
    %cst_205 = arith.constant dense<0.000000e+00> : vector<16x32xf32>
    %555 = tpu.matmul %544, %554, %cst_205 {dimension_numbers = #tpu.dot_dimension_numbers<[1], [0], [0], [1], [0, 0, 1, 1], [], []>} : vector<16x16xf32>, vector<16x32xf32>, vector<16x32xf32> -> vector<16x32xf32>
    %556 = arith.addf %528, %555 : vector<16x32xf32>
    %c0_206 = arith.constant 0 : index
    %c0_207 = arith.constant 0 : index
    %557 = vector.load %arg26[%c0_206, %c0_207] : memref<1x32xf32, #tpu.memory_space<vmem>>, vector<1x32xf32>
    %558 = vector.broadcast %557 : vector<1x32xf32> to vector<16x32xf32>
    %559 = arith.addf %556, %558 : vector<16x32xf32>
    %cst_208 = arith.constant 0.000000e+00 : f32
    %560 = vector.broadcast %cst_208 : f32 to vector<16x32xf32>
    %561 = arith.maximumf %559, %560 : vector<16x32xf32>
    %cst_209 = arith.constant dense<0.000000e+00> : vector<1x32xf32>
    %562 = tpu.matmul %1, %561, %cst_209 {dimension_numbers = #tpu.dot_dimension_numbers<[1], [0], [0], [1], [0, 0, 1, 1], [], []>} : vector<1x16xf32>, vector<16x32xf32>, vector<1x32xf32> -> vector<1x32xf32>
    %cst_210 = arith.constant 6.250000e-02 : f32
    %563 = vector.broadcast %cst_210 : f32 to vector<1x32xf32>
    %564 = arith.mulf %562, %563 : vector<1x32xf32>
    %565 = vector.broadcast %564 : vector<1x32xf32> to vector<16x32xf32>
    %566 = arith.subf %561, %565 : vector<16x32xf32>
    %567 = arith.mulf %566, %566 : vector<16x32xf32>
    %cst_211 = arith.constant dense<0.000000e+00> : vector<1x32xf32>
    %568 = tpu.matmul %1, %567, %cst_211 {dimension_numbers = #tpu.dot_dimension_numbers<[1], [0], [0], [1], [0, 0, 1, 1], [], []>} : vector<1x16xf32>, vector<16x32xf32>, vector<1x32xf32> -> vector<1x32xf32>
    %cst_212 = arith.constant 6.250000e-02 : f32
    %569 = vector.broadcast %cst_212 : f32 to vector<1x32xf32>
    %570 = arith.mulf %568, %569 : vector<1x32xf32>
    %cst_213 = arith.constant 9.99999974E-6 : f32
    %571 = vector.broadcast %cst_213 : f32 to vector<1x32xf32>
    %572 = arith.addf %570, %571 : vector<1x32xf32>
    %573 = math.rsqrt %572 : vector<1x32xf32>
    %574 = vector.broadcast %573 : vector<1x32xf32> to vector<16x32xf32>
    %575 = arith.mulf %566, %574 : vector<16x32xf32>
    %c0_214 = arith.constant 0 : index
    %c0_215 = arith.constant 0 : index
    %576 = vector.load %arg27[%c0_214, %c0_215] : memref<1x32xf32, #tpu.memory_space<vmem>>, vector<1x32xf32>
    %577 = vector.broadcast %576 : vector<1x32xf32> to vector<16x32xf32>
    %578 = arith.mulf %575, %577 : vector<16x32xf32>
    %c0_216 = arith.constant 0 : index
    %c0_217 = arith.constant 0 : index
    %579 = vector.load %arg28[%c0_216, %c0_217] : memref<1x32xf32, #tpu.memory_space<vmem>>, vector<1x32xf32>
    %580 = vector.broadcast %579 : vector<1x32xf32> to vector<16x32xf32>
    %581 = arith.addf %578, %580 : vector<16x32xf32>
    %cst_218 = arith.constant 0.000000e+00 : f32
    %582 = vector.broadcast %cst_218 : f32 to vector<16x32xf32>
    %583 = arith.cmpf ogt, %581, %582 : vector<16x32xf32>
    %cst_219 = arith.constant 1.000000e-01 : f32
    %584 = vector.broadcast %cst_219 : f32 to vector<16x32xf32>
    %585 = arith.mulf %584, %581 : vector<16x32xf32>
    %586 = arith.select %583, %581, %585 : vector<16x32xi1>, vector<16x32xf32>
    %cst_220 = arith.constant 0.000000e+00 : f32
    %cst_221 = arith.constant 1.000000e+02 : f32
    %587 = vector.broadcast %cst_220 : f32 to vector<16x32xf32>
    %588 = arith.maximumf %587, %586 : vector<16x32xf32>
    %589 = vector.broadcast %cst_221 : f32 to vector<16x32xf32>
    %590 = arith.minimumf %589, %588 : vector<16x32xf32>
    %591 = tpu.iota {dimensions = array<i32: 1>} : vector<2x16xi32>
    %592 = tpu.iota {dimensions = array<i32: 0>} : vector<2x16xi32>
    %c8_i32 = arith.constant 8 : i32
    %593 = vector.broadcast %c8_i32 : i32 to vector<2x16xi32>
    %594 = arith.muli %592, %593 : vector<2x16xi32>
    %595 = arith.cmpi sge, %591, %594 : vector<2x16xi32>
    %c8_i32_222 = arith.constant 8 : i32
    %596 = vector.broadcast %c8_i32_222 : i32 to vector<2x16xi32>
    %597 = arith.addi %594, %596 : vector<2x16xi32>
    %598 = arith.cmpi slt, %591, %597 : vector<2x16xi32>
    %599 = arith.andi %595, %598 : vector<2x16xi1>
    %cst_223 = arith.constant 1.250000e-01 : f32
    %cst_224 = arith.constant 0.000000e+00 : f32
    %600 = vector.broadcast %cst_223 : f32 to vector<2x16xf32>
    %601 = vector.broadcast %cst_224 : f32 to vector<2x16xf32>
    %602 = arith.select %599, %600, %601 : vector<2x16xi1>, vector<2x16xf32>
    %cst_225 = arith.constant dense<0.000000e+00> : vector<2x32xf32>
    %603 = tpu.matmul %602, %590, %cst_225 {dimension_numbers = #tpu.dot_dimension_numbers<[1], [0], [0], [1], [0, 0, 1, 1], [], []>} : vector<2x16xf32>, vector<16x32xf32>, vector<2x32xf32> -> vector<2x32xf32>
    %c0_226 = arith.constant 0 : index
    %c0_227 = arith.constant 0 : index
    %604 = vector.load %arg32[%c0_226, %c0_227] : memref<32x4xf32, #tpu.memory_space<vmem>>, vector<32x4xf32>
    %cst_228 = arith.constant dense<0.000000e+00> : vector<2x4xf32>
    %605 = tpu.matmul %603, %604, %cst_228 {dimension_numbers = #tpu.dot_dimension_numbers<[1], [0], [0], [1], [0, 0, 1, 1], [], []>} : vector<2x32xf32>, vector<32x4xf32>, vector<2x4xf32> -> vector<2x4xf32>
    %c0_229 = arith.constant 0 : index
    %c0_230 = arith.constant 0 : index
    %606 = vector.load %arg33[%c0_229, %c0_230] : memref<1x4xf32, #tpu.memory_space<vmem>>, vector<1x4xf32>
    %607 = vector.broadcast %606 : vector<1x4xf32> to vector<2x4xf32>
    %608 = arith.addf %605, %607 : vector<2x4xf32>
    %c0_231 = arith.constant 0 : index
    %c0_232 = arith.constant 0 : index
    %609 = vector.load %arg34[%c0_231, %c0_232] : memref<2x4xf32, #tpu.memory_space<vmem>>, vector<2x4xf32>
    tpu.vector_store %arg34[%c0_231, %c0_232], %608 {strides = array<i32>} : memref<2x4xf32, #tpu.memory_space<vmem>>, vector<2x4xf32>,
    return
  }
}

</mosaic_0001>

<bundles_post_ra>
// kernel: gat_decoder_forward.1
= control target key start
LH: loop header
LB: loop body
LE: loop exit
PB: predicated region body
PF: predicated region fallthrough
CT: control target
= control target key end

     0   :  { %s6368_s3 = smov 3   ;;  %s6369_s10 = smov 5   ;;  %vm153_vm0 = vcmask 130048   ;;  %v6370_v11 = vmov 32   ;;  %vm243_vm1 = vcmask 261120   ;;  %v6372_v17 = vmov 33   ;;  %s6968_s0 = inlined_call_operand.smem [shape: u32[35], index: -1, kind: input, shape index: {}] }
   0x1   :  { %s5333_s6 = sld [smem:[%s6968_s0 + %s6368_s3]]   ;;  %6250 = vset.pattern.permute.xlu1 %v6370_v11  ;;  %s6371_s14 = smov 4   ;;  %6251 = vset.pattern.permute.xlu0 %v6372_v17  ;;  %v6374_v22 = vmov 0.0|0.0   ;;  %vm6375_vm2 = vmmov 0   ;;  %v6376_v23 = vmov 0.0   ;;  %v365_v25 = vlaneseq }
   0x2   :  { %s6421_s9 = sld [smem:[%s6968_s0]]   ;;  %s6373_s18 = smov 94  }
   0x3   :  { %s5335_s13 = sld [smem:[%s6968_s0 + %s6369_s10]]   ;;  %s6377_s19 = smov 1   ;;  %v6457_v27 = vshrl.u32 %v365_v25, 7 }
   0x4   :  { %s5334_s17 = sld [smem:[%s6968_s0 + %s6371_s14]]   ;;  %s6380_s23 = smov 6  }
   0x5   :  { %s5331_s22 = sld [smem:[%s6968_s0 + %s6377_s19]]   ;;  %v6460_v29 = vsub.s32 0, %v6457_v27  ;;  %v6463_v30 = vsub.s32 1, %v6457_v27  ;;  %s6381_s27 = smov 9  }
   0x6   :  { %s5336_s26 = sld [smem:[%s6968_s0 + %s6380_s23]]   ;;  %s6382_s1 = smov 7  }
   0x7   :  { %v144_v0 = vld [vmem:[%s5333_s6] sm:$0xff]  ;;  %v145_v1 = vld [vmem:[%s5333_s6 + $0x8] sm:$0xff]  ;;  %s5339_s30 = sld [smem:[%s6968_s0 + %s6381_s27]]   ;;  %s6383_s5 = smov 8  }
   0x8   :  { %v142_v2 = vld [vmem:[%s6421_s9] sm:$0xff]  ;;  %v6001_v3 = vpack.c.bf16 %v145_v1, %v144_v0  ;;  %v143_v7 = vld [vmem:[%s6421_s9 + $0x8] sm:$0xff]  ;;  %s5337_s4 = sld [smem:[%s6968_s0 + %s6382_s1]]   ;;  %s6384_s10 = smov 10  }
   0x9   :  { %5644 = vmatprep.mubr.msk.f32.mxu0 %vm153_vm0, %v142_v2  ;;  %v239_v4 = vld [vmem:[%s5335_s13] sm:$0xff]  ;;  %v240_v5 = vld [vmem:[%s5335_s13 + $0x8] sm:$0xff]  ;;  %v241_v8 = vld [vmem:[%s5335_s13 + $0x10] sm:$0xff]  ;;  %s5338_s8 = sld [smem:[%s6968_s0 + %s6383_s5]]   ;;  %s6385_s14 = smov 13  }
   0xa   :  { %v6005_v6 = vpack.c.bf16 %v240_v5, %v239_v4  ;;  %6002 = vmatprep.subr.bf16.mxu0 %v6001_v3  ;;  %v242_v9 = vld [vmem:[%s5335_s13 + $0x18] sm:$0xff]  ;;  %v5365_v12 = vld [vmem:[%s5334_s17] ss:$0 sm:$0xff]  ;;  %s5340_s13 = sld [smem:[%s6968_s0 + %s6384_s10]]   ;;  %s6386_s19 = smov 11  }
   0xb   :  { %6004 = vmatpush3.bf16.msra.mxu0 %v6001_v3  ;;  %v6009_v10 = vpack.c.bf16 %v242_v9, %v241_v8  ;;  %v5455_v32 = vld [vmem:[%s5331_s22] sm:$0xff]   ;;  %s5343_s17 = sld [smem:[%s6968_s0 + %s6385_s14]]   ;;  %s6387_s23 = smov 12  }
   0xc   :  { %6006 = vmatprep.subr.bf16.mxu1 %v6005_v6  ;;  %6013 = vmatprep.subr.bf16.mxu0 %v6374_v22  ;;  %v6467_v40 = vunpack.c.l.bf16 %v5455_v32  ;;  %v6469_v41 = vunpack.c.h.bf16 %v5455_v32  ;;  %v6378_v32 = vmov 1.0   ;;  %s5341_s22 = sld [smem:[%s6968_s0 + %s6386_s19]]   ;;  %s6388_s27 = smov 14  }
   0xd   :  { %6008 = vmatpush3.bf16.msra.mxu1 %v6005_v6  ;;  %s6389_s1 = smov 30   ;;  %s6390_s5 = smov 29  }
   0xe   :  { %5645 = vmatmul.mubr.msk.f32.vlgmr.msra.gmra.mrb[0].mxu0 %vm153_vm0, %v143_v7  ;;  %6010 = vmatprep.subr.bf16.mxu1 %v6009_v10  ;;  %s6391_s10 = smov 17   ;;  %s6392_s14 = smov 15  }
   0xf   :  { %5662 = vmatprep.mubr.msk.f32.mxu0 %vm6375_vm2, %v6376_v23  ;;  %s6393_s19 = smov 16   ;;  %s6405_s6 = smov 32  }
  0x10   :  { %s6406_s11 = smov 27   ;;  %s6407_s15 = smov 28  }
  0x11   :  { %6012 = vmatpush3.bf16.msra.mxu1 %v6009_v10  ;;  %s6408_s20 = smov 33   ;;  %s6409_s24 = smov 34  }
  0xe1   :  { %v5646_v13 = vpop.f32.mrb[0].mxu0 }
  0xe2   :  { %v226_v14 = vpop.f32.mrb[1].mxu0  ;;  %v232_v16 = vadd.f32 %v5646_v13, %v5365_v12 }
  0xe3   :  { %v227_v15 = vadd.f32 %v5365_v12, %v226_v14 }
  0xe5   :  { %5655 = vmatprep.mubr.msk.f32.mxu1 %vm243_vm1, %v227_v15 }
  0xe6   :  { %5656 = vmatmul.mubr.msk.f32.vlgmr.msra.gmra.mrb[0].mxu1 %vm243_vm1, %v232_v16 }
 0x1b9   :  { %v6437_v18 = vpop.f32.mrb[0].mxu1 }
 0x1ba   :  { %380 = vperm.xlu1 %6250, %v6437_v18   ;;  %v6440_v19 = vpop.f32.mrb[1].mxu1 }
 0x1bb   :  { %327 = vrot.lane.b32.xlu0 %v6440_v19, %s6373_s18 }
 0x1be   :  { %376 = vperm.xlu1 %6250, %v6440_v19  }
 0x1bf   :  { %329 = vrot.lane.b32.xlu0 %v6437_v18, %s6373_s18 }
 0x1c2   :  { %6252 = vset.pattern.permute.xlu1 %v6372_v17 }
 0x1c3   :  { %538 = vperm.xlu1 %6252, %v6437_v18   ;;  %534 = vperm.xlu0 %6251, %v6440_v19  }
 0x22d   :  { %v328_v20 = vpop.permute.xlu0 %327 }
 0x22e   :  { %333 = vxpose.xlu1.b32.start [1/2] (short) (narrow) %v328_v20, 8 }
 0x231   :  { %v330_v21 = vpop.permute.xlu0 %329 }
 0x232   :  { %334 = vxpose.xlu1.b32.end [2/2] (short) (narrow) %v330_v21, 8 }
 0x239   :  { %v381_v24 = vpop.permute.xlu1 %380 }
 0x23d   :  { %v377_v26 = vpop.permute.xlu1 %376 }
 0x242   :  { %v539_v28 = vpop.permute.xlu1 %538  ;;  %v535_v35 = vpop.permute.xlu0 %534 }
 0x2ae   :  { %v349_v31 = vpop.trf.xlu1 }
 0x2af   :  { %v386_v33 = vrot.slane %v349_v31, %v6460_v29  ;;  %v544_v34 = vrot.slane %v349_v31, %v6463_v30 }
 0x2b1   :  { %v387_v36 = vadd.f32 %v386_v33, %v377_v26  ;;  %v388_v37 = vadd.f32 %v386_v33, %v381_v24  ;;  %v545_v38 = vadd.f32 %v544_v34, %v535_v35  ;;  %v546_v39 = vadd.f32 %v544_v34, %v539_v28 }
 0x2b3   :  { %vm389_vm3 = vcmp.gt.f32.partialorder %v387_v36, 0.0  ;;  %vm390_vm4 = vcmp.gt.f32.partialorder %v388_v37, 0.0  ;;  %v391_v42 = vmul.f32 0.2, %v387_v36  ;;  %v392_v43 = vmul.f32 0.2, %v388_v37 }
 0x2b4   :  { %vm547_vm5 = vcmp.gt.f32.partialorder %v545_v38, 0.0  ;;  %vm548_vm6 = vcmp.gt.f32.partialorder %v546_v39, 0.0  ;;  %v549_v44 = vmul.f32 0.2, %v545_v38  ;;  %v550_v45 = vmul.f32 0.2, %v546_v39 }
 0x2b5   :  { %v393_v46 = vsel %vm389_vm3, %v387_v36, %v391_v42  ;;  %v394_v47 = vsel %vm390_vm4, %v388_v37, %v392_v43  ;;  %v6379_v43 = vmov 0  }
 0x2b6   :  { %v395_v48 = vadd.f32 %v6467_v40, %v393_v46  ;;  %v396_v49 = vadd.f32 %v6469_v41, %v394_v47  ;;  %v551_v50 = vsel %vm547_vm5, %v545_v38, %v549_v44  ;;  %v552_v51 = vsel %vm548_vm6, %v546_v39, %v550_v45  ;;  %6254 = vset.pattern.permute.xlu1 %v6379_v43 }
 0x2b7   :  { %v553_v52 = vadd.f32 %v6467_v40, %v551_v50  ;;  %v554_v53 = vadd.f32 %v6469_v41, %v552_v51 }
 0x2b8   :  { %v397_v54 = vsel %vm153_vm0, %v395_v48, -inf  ;;  %v398_v55 = vsel %vm153_vm0, %v396_v49, -inf }
 0x2b9   :  { %v399_v56 = vmax.f32 %v397_v54, %v398_v55  ;;  %v555_v57 = vsel %vm153_vm0, %v553_v52, -inf  ;;  %v556_v58 = vsel %vm153_vm0, %v554_v53, -inf }
 0x2ba   :  { %v557_v59 = vmax.f32 %v555_v57, %v556_v58 }
 0x2bb   :  { %v400_v60 = vrot.slane %v399_v56, 4 }
 0x2bc   :  { %v558_v61 = vrot.slane %v557_v59, 4 }
 0x2bd   :  { %v401_v62 = vmax.f32 %v399_v56, %v400_v60 }
 0x2be   :  { %v559_v63 = vmax.f32 %v557_v59, %v558_v61 }
 0x2bf   :  { %v402_v0 = vrot.slane %v401_v62, 2 }
 0x2c0   :  { %v560_v1 = vrot.slane %v559_v63, 2 }
 0x2c1   :  { %v403_v2 = vmax.f32 %v401_v62, %v402_v0  ;;  %v5376_v0 = vld [vmem:[%s5336_s26] ss:$0 sm:$0xff]  ;;  %s5342_s26 = sld [smem:[%s6968_s0 + %s6387_s23]]   ;;  %s6394_s23 = smov 31  }
 0x2c2   :  { %v561_v3 = vmax.f32 %v559_v63, %v560_v1 }
 0x2c3   :  { %v404_v4 = vrot.slane %v403_v2, 1 }
 0x2c4   :  { %v562_v5 = vrot.slane %v561_v3, 1 }
 0x2c5   :  { %v405_v6 = vmax.f32 %v403_v2, %v404_v4 }
 0x2c6   :  { %v563_v7 = vmax.f32 %v561_v3, %v562_v5 }
 0x2c7   :  { %v406_v8 = vsub.f32 %v395_v48, %v405_v6  ;;  %v407_v9 = vsub.f32 %v396_v49, %v405_v6  ;;  %v6501_v48 = vand.u32 127, %v365_v25 }
 0x2c8   :  { %v564_v10 = vsub.f32 %v553_v52, %v563_v7  ;;  %v565_v12 = vsub.f32 %v554_v53, %v563_v7 }
 0x2c9   :  { %v408_v13 = vmul.f32 1.442695, %v406_v8  ;;  %v410_v14 = vmul.f32 1.442695, %v407_v9  ;;  %vm371_vm7 = vcmp.ge.s32.totalorder %v6501_v48, 16  ;;  %vm372_vm8 = vcmp.lt.s32.totalorder %v6501_v48, 32 }
 0x2ca   :  { %v566_v15 = vmul.f32 1.442695, %v564_v10  ;;  %v568_v16 = vmul.f32 1.442695, %v565_v12  ;;  %vm373_vm9 = vmand %vm371_vm7, %vm372_vm8  ;;  %vm368_vm10 = vcmp.lt.s32.totalorder %v6501_v48, 16 }
 0x2cb   :  { %6282 = vpow2.f32 %v408_v13  ;;  %v6506_v49 = vsel %vm373_vm9, 1.0, %v6376_v23  ;;  %v6514_v55 = vsel %vm368_vm10, 1.0, %v6376_v23 }
 0x2cc   :  { %6284 = vpow2.f32 %v410_v14 }
 0x2cd   :  { %6286 = vpow2.f32 %v566_v15 }
 0x2ce   :  { %6288 = vpow2.f32 %v568_v16  ;;  %v1039_v16 = vld [vmem:[%s5339_s30] sm:$0xff] }
 0x2d5   :  { %v6479_v20 = vpop.eup %6282 }
 0x2d6   :  { %v6481_v21 = vpop.eup %6284 }
 0x2d7   :  { %v6287_v24 = vpop.eup %6286  ;;  %v6014_v26 = vpack.c.bf16 %v6481_v21, %v6479_v20 }
 0x2d8   :  { %v6289_v28 = vpop.eup %6288  ;;  %5676 = vmatprep.mubr.msk.f32.mxu1 %vm153_vm0, %v6287_v24 }
 0x2d9   :  { %6015 = vmatpush3.bf16.msra.mxu0 %v6014_v26  ;;  %v6017_v31 = vpack.c.bf16 %v6289_v28, %v6287_v24  ;;  %v1042_v26 = vld [vmem:[%s5339_s30 + $0x18] sm:$0xff] }
 0x2da   :  { %6016 = vmatprep.subr.bf16.mxu0 %v6374_v22 }
 0x2dc   :  { %5663 = vmatmul.mubr.msk.f32.vlgmr.msra.gmra.mrb[2].mxu0 %vm153_vm0, %v6378_v32 }
 0x2dd   :  { %6018 = vmatpush3.bf16.msra.mxu0 %v6017_v31  ;;  %5669 = vmatprep.mubr.msk.f32.mxu0 %vm6375_vm2, %v6376_v23 }
 0x2de   :  { %6027 = vmatprep.subr.bf16.mxu0 %v6374_v22 }
 0x2e0   :  { %5670 = vmatmul.mubr.msk.f32.vlgmr.msra.gmra.mrb[4].mxu0 %vm153_vm0, %v6378_v32 }
 0x2e1   :  { %5690 = vmatprep.mubr.msk.f32.mxu0 %vm6375_vm2, %v6376_v23 }
 0x3af   :  { %v481_v33 = vpop.f32.mrb[2].mxu0 }
 0x3b0   :  { %v482_v34 = vadd.f32 1e-16, %v481_v33  ;;  %v5664_v35 = vpop.f32.mrb[3].mxu0 }
 0x3b2   :  { %6290 = vrcp.f32 %v482_v34 }
 0x3b3   :  { %v636_v36 = vpop.f32.mrb[4].mxu0 }
 0x3b4   :  { %v637_v37 = vadd.f32 1e-16, %v636_v36  ;;  %v5671_v38 = vpop.f32.mrb[5].mxu0 }
 0x3b5   :  { %v5379_v38 = vld [vmem:[%s5337_s4] ss:$0 sm:$0xff]  ;;  %s5360_s4 = sld [smem:[%s6968_s0 + %s6389_s1]]  }
 0x3b6   :  { %6292 = vrcp.f32 %v637_v37 }
 0x3bc   :  { %v6291_v39 = vpop.eup %6290 }
 0x3bd   :  { %487 = vxpose.xlu0.b32.start.end [1/1] (short) (narrow) %v6291_v39, 16 }
 0x3c0   :  { %v6293_v42 = vpop.eup %6292 }
 0x3c2   :  { %642 = vxpose.xlu0.b32.start.end [1/1] (short) (narrow) %v6293_v42, 16 }
 0x3eb   :  { %6253 = vset.pattern.permute.xlu0 %v6379_v43 }
 0x43d   :  { %v503_v44 = vpop.trf.xlu0 }
 0x441   :  { %v504_v45 = vpop.trf.xlu0 }
 0x445   :  { %v658_v46 = vpop.trf.xlu0 }
 0x446   :  { %676 = vperm.xlu0 %6253, %v658_v46  }
 0x449   :  { %v659_v47 = vpop.trf.xlu0 }
 0x44a   :  { %681 = vperm.xlu1 %6254, %v659_v47   ;;  %6255 = vset.pattern.permute.xlu0 %v6370_v11 }
 0x44e   :  { %521 = vperm.xlu1 %6254, %v503_v44   ;;  %v5380_v44 = vld [vmem:[%s5338_s8] ss:$0 sm:$0xff]  ;;  %s5359_s8 = sld [smem:[%s6968_s0 + %s6390_s5]]  }
 0x452   :  { %526 = vperm.xlu1 %6254, %v504_v45  }
 0x456   :  { %6256 = vset.pattern.permute.xlu1 %v6370_v11 }
 0x4c5   :  { %v677_v50 = vpop.permute.xlu0 %676 }
 0x4c6   :  { %v684_v51 = vmul.f32 %v677_v50, %v6506_v49 }
 0x4c8   :  { %v686_v54 = vmul.f32 %v684_v51, %v6440_v19 }
 0x4c9   :  { %v682_v52 = vpop.permute.xlu1 %681 }
 0x4ca   :  { %v685_v53 = vmul.f32 %v682_v52, %v6506_v49 }
 0x4cc   :  { %v687_v25 = vmul.f32 %v6437_v18, %v685_v53 }
 0x4cd   :  { %v522_v56 = vpop.permute.xlu1 %521 }
 0x4ce   :  { %v6019_v57 = vpack.c.bf16 %v687_v25, %v686_v54  ;;  %v529_v58 = vmul.f32 %v522_v56, %v6514_v55 }
 0x4d0   :  { %6020 = vmatprep.subr.bf16.mxu1 %v6019_v57  ;;  %v531_v61 = vmul.f32 %v529_v58, %v6440_v19 }
 0x4d1   :  { %v527_v59 = vpop.permute.xlu1 %526  ;;  %6022 = vmatpush3.bf16.msra.mxu1 %v6019_v57 }
 0x4d2   :  { %v530_v60 = vmul.f32 %v527_v59, %v6514_v55 }
 0x4d4   :  { %v532_v62 = vmul.f32 %v6437_v18, %v530_v60  ;;  %5677 = vmatmul.mubr.msk.f32.vlgmr.msra.gmra.mrb[2].mxu1 %vm153_vm0, %v6289_v28 }
 0x4d5   :  { %5683 = vmatprep.mubr.msk.f32.mxu1 %vm153_vm0, %v6479_v20  ;;  %v1040_v20 = vld [vmem:[%s5339_s30 + $0x8] sm:$0xff] }
 0x4d6   :  { %v6023_v63 = vpack.c.bf16 %v532_v62, %v531_v61  ;;  %v6033_v24 = vpack.c.bf16 %v1040_v20, %v1039_v16 }
 0x4d8   :  { %6024 = vmatprep.subr.bf16.mxu1 %v6023_v63 }
 0x4d9   :  { %6026 = vmatpush3.bf16.msra.mxu1 %v6023_v63 }
 0x4da   :  { %6034 = vmatprep.subr.bf16.mxu1 %v6033_v24 }
 0x4dc   :  { %5684 = vmatmul.mubr.msk.f32.vlgmr.msra.gmra.mrb[2].mxu1 %vm153_vm0, %v6481_v21  ;;  %v1041_v21 = vld [vmem:[%s5339_s30 + $0x10] sm:$0xff]  ;;  %s5344_s30 = sld [smem:[%s6968_s0 + %s6388_s27]]  }
 0x4dd   :  { %v6037_v28 = vpack.c.bf16 %v1042_v26, %v1041_v21  ;;  %6036 = vmatpush3.bf16.msra.mxu1 %v6033_v24 }
 0x4df   :  { %6038 = vmatprep.subr.bf16.mxu1 %v6037_v28 }
 0x4e1   :  { %6040 = vmatpush3.bf16.msra.mxu1 %v6037_v28 }
 0x5af   :  { %v5685_v19 = vpop.f32.mrb[2].mxu1 }
 0x5b0   :  { %v858_v1 = vadd.f32 %v5685_v19, %v5376_v0  ;;  %v841_v18 = vpop.f32.mrb[3].mxu1 }
 0x5b1   :  { %v857_v2 = vadd.f32 %v5376_v0, %v841_v18 }
 0x5b2   :  { %v860_v3 = vmax.f32 %v858_v1, 0.0 }
 0x5b3   :  { %v859_v4 = vmax.f32 %v857_v2, 0.0 }
 0x5b5   :  { %v6028_v5 = vpack.c.bf16 %v860_v3, %v859_v4 }
 0x5b7   :  { %6029 = vmatpush3.bf16.msra.mxu0 %v6028_v5 }
 0x5b8   :  { %6030 = vmatprep.subr.bf16.mxu0 %v6374_v22 }
 0x5ba   :  { %5691 = vmatmul.mubr.msk.f32.vlgmr.msra.gmra.mrb[6].mxu0 %vm153_vm0, %v6378_v32 }
 0x5bb   :  { %5697 = vmatprep.mubr.msk.f32.mxu0 %vm6375_vm2, %v6376_v23 }
 0x68d   :  { %v927_v6 = vpop.f32.mrb[6].mxu0 }
 0x68e   :  { %v931_v7 = vmul.f32 0.0625, %v927_v6  ;;  %v5692_v8 = vpop.f32.mrb[7].mxu0 }
 0x690   :  { %v935_v9 = vrot.slane %v931_v7, %v6460_v29 }
 0x692   :  { %v936_v10 = vsub.f32 %v859_v4, %v935_v9  ;;  %v937_v12 = vsub.f32 %v860_v3, %v935_v9 }
 0x694   :  { %v938_v13 = vmul.f32 %v936_v10, %v936_v10  ;;  %v939_v14 = vmul.f32 %v937_v12, %v937_v12 }
 0x696   :  { %v6031_v15 = vpack.c.bf16 %v939_v14, %v938_v13 }
 0x698   :  { %6032 = vmatpush3.bf16.msra.mxu0 %v6031_v15 }
 0x699   :  { %6041 = vmatprep.subr.bf16.mxu0 %v6374_v22 }
 0x69b   :  { %5698 = vmatmul.mubr.msk.f32.vlgmr.msra.gmra.mrb[8].mxu0 %vm153_vm0, %v6378_v32 }
 0x69c   :  { %5715 = vmatprep.mubr.msk.f32.mxu0 %vm6375_vm2, %v6376_v23 }
 0x76e   :  { %v1006_v31 = vpop.f32.mrb[8].mxu0 }
 0x76f   :  { %v1010_v33 = vmul.f32 0.0625, %v1006_v31  ;;  %v5699_v34 = vpop.f32.mrb[9].mxu0 }
 0x771   :  { %v1011_v35 = vadd.f32 1e-05, %v1010_v33 }
 0x773   :  { %6294 = vrsqrt.f32 %v1011_v35 }
 0x77d   :  { %v6295_v36 = vpop.eup %6294 }
 0x77e   :  { %v1016_v37 = vrot.slane %v6295_v36, %v6460_v29 }
 0x780   :  { %v1017_v39 = vmul.f32 %v1016_v37, %v936_v10  ;;  %v1018_v42 = vmul.f32 %v1016_v37, %v937_v12 }
 0x782   :  { %v1026_v45 = vmul.f32 %v5379_v38, %v1017_v39  ;;  %v1027_v46 = vmul.f32 %v5379_v38, %v1018_v42 }
 0x784   :  { %v1035_v47 = vadd.f32 %v5380_v44, %v1026_v45  ;;  %v1036_v50 = vadd.f32 %v5380_v44, %v1027_v46 }
 0x786   :  { %v1037_v51 = vmax.f32 %v1035_v47, 0.0  ;;  %v1038_v52 = vmax.f32 %v1036_v50, 0.0 }
 0x788   :  { %5708 = vmatprep.mubr.msk.f32.mxu1 %vm243_vm1, %v1037_v51 }
 0x789   :  { %5709 = vmatmul.mubr.msk.f32.vlgmr.msra.gmra.mrb[4].mxu1 %vm243_vm1, %v1038_v52 }
 0x85c   :  { %v6551_v53 = vpop.f32.mrb[4].mxu1 }
 0x85d   :  { %1128 = vrot.lane.b32.xlu0 %v6551_v53, %s6373_s18  ;;  %v6555_v54 = vpop.f32.mrb[5].mxu1 }
 0x85e   :  { %1126 = vrot.lane.b32.xlu1 %v6555_v54, %s6373_s18 }
 0x861   :  { %1169 = vperm.xlu0 %6255, %v6551_v53  }
 0x862   :  { %1165 = vperm.xlu1 %6256, %v6555_v54  }
 0x866   :  { %6257 = vset.pattern.permute.xlu1 %v6372_v17 }
 0x867   :  { %1320 = vperm.xlu1 %6257, %v6555_v54  }
 0x86b   :  { %1324 = vperm.xlu1 %6257, %v6551_v53  }
 0x8cf   :  { %v1129_v56 = vpop.permute.xlu0 %1128 }
 0x8d0   :  { %v1127_v25 = vpop.permute.xlu1 %1126 }
 0x8d1   :  { %1132 = vxpose.xlu0.b32.start [1/2] (short) (narrow) %v1127_v25, 8 }
 0x8d5   :  { %1133 = vxpose.xlu0.b32.end [2/2] (short) (narrow) %v1129_v56, 8 }
 0x8e0   :  { %v1170_v58 = vpop.permute.xlu0 %1169 }
 0x8e1   :  { %v1166_v57 = vpop.permute.xlu1 %1165 }
 0x8e6   :  { %v1321_v59 = vpop.permute.xlu1 %1320 }
 0x8ea   :  { %v1325_v63 = vpop.permute.xlu1 %1324 }
 0x951   :  { %v1148_v60 = vpop.trf.xlu0 }
 0x952   :  { %v1175_v61 = vrot.slane %v1148_v60, %v6460_v29  ;;  %v1330_v62 = vrot.slane %v1148_v60, %v6463_v30 }
 0x954   :  { %v1176_v0 = vadd.f32 %v1175_v61, %v1166_v57  ;;  %v1177_v19 = vadd.f32 %v1175_v61, %v1170_v58  ;;  %v1331_v1 = vadd.f32 %v1330_v62, %v1321_v59  ;;  %v1332_v18 = vadd.f32 %v1330_v62, %v1325_v63 }
 0x956   :  { %vm1178_vm11 = vcmp.gt.f32.partialorder %v1176_v0, 0.0  ;;  %vm1179_vm12 = vcmp.gt.f32.partialorder %v1177_v19, 0.0  ;;  %v1180_v2 = vmul.f32 0.2, %v1176_v0  ;;  %v1181_v3 = vmul.f32 0.2, %v1177_v19 }
 0x957   :  { %vm1333_vm13 = vcmp.gt.f32.partialorder %v1331_v1, 0.0  ;;  %vm1334_vm14 = vcmp.gt.f32.partialorder %v1332_v18, 0.0  ;;  %v1335_v4 = vmul.f32 0.2, %v1331_v1  ;;  %v1336_v5 = vmul.f32 0.2, %v1332_v18 }
 0x958   :  { %v1182_v6 = vsel %vm1178_vm11, %v1176_v0, %v1180_v2  ;;  %v1183_v7 = vsel %vm1179_vm12, %v1177_v19, %v1181_v3 }
 0x959   :  { %v1184_v8 = vadd.f32 %v6467_v40, %v1182_v6  ;;  %v1185_v9 = vadd.f32 %v6469_v41, %v1183_v7  ;;  %v1337_v10 = vsel %vm1333_vm13, %v1331_v1, %v1335_v4  ;;  %v1338_v12 = vsel %vm1334_vm14, %v1332_v18, %v1336_v5 }
 0x95a   :  { %v1339_v13 = vadd.f32 %v6467_v40, %v1337_v10  ;;  %v1340_v14 = vadd.f32 %v6469_v41, %v1338_v12 }
 0x95b   :  { %v1186_v15 = vsel %vm153_vm0, %v1184_v8, -inf  ;;  %v1187_v16 = vsel %vm153_vm0, %v1185_v9, -inf }
 0x95c   :  { %v1188_v20 = vmax.f32 %v1186_v15, %v1187_v16  ;;  %v1341_v21 = vsel %vm153_vm0, %v1339_v13, -inf  ;;  %v1342_v24 = vsel %vm153_vm0, %v1340_v14, -inf }
 0x95d   :  { %v1343_v26 = vmax.f32 %v1341_v21, %v1342_v24 }
 0x95e   :  { %v1189_v28 = vrot.slane %v1188_v20, 4 }
 0x95f   :  { %v1344_v31 = vrot.slane %v1343_v26, 4 }
 0x960   :  { %v1190_v33 = vmax.f32 %v1188_v20, %v1189_v28 }
 0x961   :  { %v1345_v34 = vmax.f32 %v1343_v26, %v1344_v31 }
 0x962   :  { %v1191_v35 = vrot.slane %v1190_v33, 2 }
 0x963   :  { %v1346_v36 = vrot.slane %v1345_v34, 2 }
 0x964   :  { %v1192_v37 = vmax.f32 %v1190_v33, %v1191_v35  ;;  %v5389_v35 = vld [vmem:[%s5340_s13] ss:$0 sm:$0xff]  ;;  %s6696_s13 = sld [smem:[%s6968_s0 + %s6391_s10]]  }
 0x965   :  { %v1347_v38 = vmax.f32 %v1345_v34, %v1346_v36  ;;  %s5362_s10 = sld [smem:[%s6968_s0 + %s6405_s6]]  }
 0x966   :  { %v1193_v39 = vrot.slane %v1192_v37, 1 }
 0x967   :  { %v1348_v42 = vrot.slane %v1347_v38, 1 }
 0x968   :  { %v1194_v44 = vmax.f32 %v1192_v37, %v1193_v39 }
 0x969   :  { %v1349_v45 = vmax.f32 %v1347_v38, %v1348_v42 }
 0x96a   :  { %v1195_v46 = vsub.f32 %v1184_v8, %v1194_v44  ;;  %v1196_v47 = vsub.f32 %v1185_v9, %v1194_v44 }
 0x96b   :  { %v1350_v50 = vsub.f32 %v1339_v13, %v1349_v45  ;;  %v1351_v51 = vsub.f32 %v1340_v14, %v1349_v45 }
 0x96c   :  { %v1197_v52 = vmul.f32 1.442695, %v1195_v46  ;;  %v1199_v25 = vmul.f32 1.442695, %v1196_v47 }
 0x96d   :  { %v1352_v56 = vmul.f32 1.442695, %v1350_v50  ;;  %v1354_v57 = vmul.f32 1.442695, %v1351_v51 }
 0x96e   :  { %6296 = vpow2.f32 %v1197_v52 }
 0x96f   :  { %6298 = vpow2.f32 %v1199_v25 }
 0x970   :  { %6300 = vpow2.f32 %v1352_v56 }
 0x971   :  { %6302 = vpow2.f32 %v1354_v57  ;;  %v1825_v57 = vld [vmem:[%s5343_s17] sm:$0xff] }
 0x978   :  { %v6297_v58 = vpop.eup %6296 }
 0x979   :  { %v6299_v59 = vpop.eup %6298 }
 0x97a   :  { %v6301_v60 = vpop.eup %6300  ;;  %v6042_v61 = vpack.c.bf16 %v6299_v59, %v6297_v58 }
 0x97b   :  { %v6303_v62 = vpop.eup %6302  ;;  %5729 = vmatprep.mubr.msk.f32.mxu1 %vm153_vm0, %v6301_v60 }
 0x97c   :  { %6043 = vmatpush3.bf16.msra.mxu0 %v6042_v61  ;;  %v6045_v63 = vpack.c.bf16 %v6303_v62, %v6301_v60  ;;  %v1828_v61 = vld [vmem:[%s5343_s17 + $0x18] sm:$0xff] }
 0x97d   :  { %6044 = vmatprep.subr.bf16.mxu0 %v6374_v22 }
 0x97f   :  { %5716 = vmatmul.mubr.msk.f32.vlgmr.msra.gmra.mrb[10].mxu0 %vm153_vm0, %v6378_v32 }
 0x980   :  { %6046 = vmatpush3.bf16.msra.mxu0 %v6045_v63  ;;  %5722 = vmatprep.mubr.msk.f32.mxu0 %vm6375_vm2, %v6376_v23 }
 0x981   :  { %6055 = vmatprep.subr.bf16.mxu0 %v6374_v22 }
 0x983   :  { %5723 = vmatmul.mubr.msk.f32.vlgmr.msra.gmra.mrb[12].mxu0 %vm153_vm0, %v6378_v32 }
 0x984   :  { %5743 = vmatprep.mubr.msk.f32.mxu0 %vm6375_vm2, %v6376_v23 }
 0xa52   :  { %v1267_v0 = vpop.f32.mrb[10].mxu0 }
 0xa53   :  { %v1268_v19 = vadd.f32 1e-16, %v1267_v0  ;;  %v5717_v1 = vpop.f32.mrb[11].mxu0 }
 0xa55   :  { %6304 = vrcp.f32 %v1268_v19 }
 0xa56   :  { %v1422_v18 = vpop.f32.mrb[12].mxu0 }
 0xa57   :  { %v1423_v2 = vadd.f32 1e-16, %v1422_v18  ;;  %v5724_v3 = vpop.f32.mrb[13].mxu0 }
 0xa58   :  { %v5392_v3 = vld [vmem:[%s5341_s22] ss:$0 sm:$0xff]  ;;  %s5346_s22 = sld [smem:[%s6968_s0 + %s6393_s19]]  }
 0xa59   :  { %6306 = vrcp.f32 %v1423_v2  ;;  %s5358_s19 = sld [smem:[%s6968_s0 + %s6407_s15]]  }
 0xa5f   :  { %v6305_v4 = vpop.eup %6304 }
 0xa60   :  { %1273 = vxpose.xlu0.b32.start.end [1/1] (short) (narrow) %v6305_v4, 16 }
 0xa63   :  { %v6307_v5 = vpop.eup %6306 }
 0xa64   :  { %1428 = vxpose.xlu1.b32.start.end [1/1] (short) (narrow) %v6307_v5, 16 }
 0xa82   :  { %6259 = vset.pattern.permute.xlu1 %v6379_v43 }
 0xa89   :  { %6258 = vset.pattern.permute.xlu0 %v6379_v43 }
 0xae0   :  { %v1289_v8 = vpop.trf.xlu0 }
 0xae4   :  { %v1444_v6 = vpop.trf.xlu1  ;;  %v1290_v9 = vpop.trf.xlu0 }
 0xae5   :  { %1462 = vperm.xlu0 %6258, %v1444_v6   ;;  %v5393_v6 = vld [vmem:[%s5342_s26] ss:$0 sm:$0xff]  ;;  %s5361_s26 = sld [smem:[%s6968_s0 + %s6394_s23]]  }
 0xae6   :  { %s5363_s23 = sld [smem:[%s6968_s0 + %s6408_s20]]  }
 0xae8   :  { %v1445_v7 = vpop.trf.xlu1 }
 0xae9   :  { %1467 = vperm.xlu1 %6259, %v1445_v7   ;;  %6261 = vset.pattern.permute.xlu0 %v6370_v11 }
 0xaed   :  { %1307 = vperm.xlu1 %6259, %v1289_v8  }
 0xaf1   :  { %1312 = vperm.xlu1 %6259, %v1290_v9  }
 0xaf5   :  { %6260 = vset.pattern.permute.xlu1 %v6370_v11 }
 0xb64   :  { %v1463_v10 = vpop.permute.xlu0 %1462 }
 0xb65   :  { %v1470_v12 = vmul.f32 %v1463_v10, %v6506_v49 }
 0xb67   :  { %v1472_v15 = vmul.f32 %v1470_v12, %v6555_v54 }
 0xb68   :  { %v1468_v13 = vpop.permute.xlu1 %1467 }
 0xb69   :  { %v1471_v14 = vmul.f32 %v1468_v13, %v6506_v49 }
 0xb6b   :  { %v1473_v16 = vmul.f32 %v6551_v53, %v1471_v14 }
 0xb6c   :  { %v1308_v20 = vpop.permute.xlu1 %1307 }
 0xb6d   :  { %v6047_v21 = vpack.c.bf16 %v1473_v16, %v1472_v15  ;;  %v1315_v24 = vmul.f32 %v1308_v20, %v6514_v55 }
 0xb6f   :  { %6048 = vmatprep.subr.bf16.mxu1 %v6047_v21  ;;  %v1317_v31 = vmul.f32 %v1315_v24, %v6555_v54 }
 0xb70   :  { %6050 = vmatpush3.bf16.msra.mxu1 %v6047_v21  ;;  %v1313_v26 = vpop.permute.xlu1 %1312 }
 0xb71   :  { %v1316_v28 = vmul.f32 %v1313_v26, %v6514_v55 }
 0xb73   :  { %v1318_v33 = vmul.f32 %v6551_v53, %v1316_v28  ;;  %5730 = vmatmul.mubr.msk.f32.vlgmr.msra.gmra.mrb[6].mxu1 %vm153_vm0, %v6303_v62 }
 0xb74   :  { %5736 = vmatprep.mubr.msk.f32.mxu1 %vm153_vm0, %v6297_v58  ;;  %v1826_v58 = vld [vmem:[%s5343_s17 + $0x8] sm:$0xff] }
 0xb75   :  { %v6051_v34 = vpack.c.bf16 %v1318_v33, %v1317_v31  ;;  %v6061_v60 = vpack.c.bf16 %v1826_v58, %v1825_v57 }
 0xb77   :  { %6052 = vmatprep.subr.bf16.mxu1 %v6051_v34 }
 0xb78   :  { %6054 = vmatpush3.bf16.msra.mxu1 %v6051_v34 }
 0xb79   :  { %6062 = vmatprep.subr.bf16.mxu1 %v6061_v60 }
 0xb7b   :  { %5737 = vmatmul.mubr.msk.f32.vlgmr.msra.gmra.mrb[6].mxu1 %vm153_vm0, %v6299_v59  ;;  %v1827_v59 = vld [vmem:[%s5343_s17 + $0x10] sm:$0xff]  ;;  %s5345_s17 = sld [smem:[%s6968_s0 + %s6392_s14]]  }
 0xb7c   :  { %v6065_v62 = vpack.c.bf16 %v1828_v61, %v1827_v59  ;;  %6064 = vmatpush3.bf16.msra.mxu1 %v6061_v60  ;;  %s5357_s14 = sld [smem:[%s6968_s0 + %s6406_s11]]  }
 0xb7e   :  { %6066 = vmatprep.subr.bf16.mxu1 %v6065_v62 }
 0xb80   :  { %6068 = vmatpush3.bf16.msra.mxu1 %v6065_v62 }
 0xc4e   :  { %v5738_v36 = vpop.f32.mrb[6].mxu1 }
 0xc4f   :  { %v1644_v37 = vadd.f32 %v5738_v36, %v5389_v35  ;;  %v1627_v54 = vpop.f32.mrb[7].mxu1 }
 0xc50   :  { %v1643_v38 = vadd.f32 %v5389_v35, %v1627_v54 }
 0xc51   :  { %v1646_v53 = vmax.f32 %v1644_v37, 0.0 }
 0xc52   :  { %v1645_v39 = vmax.f32 %v1643_v38, 0.0 }
 0xc54   :  { %v6056_v42 = vpack.c.bf16 %v1646_v53, %v1645_v39 }
 0xc56   :  { %6057 = vmatpush3.bf16.msra.mxu0 %v6056_v42 }
 0xc57   :  { %6058 = vmatprep.subr.bf16.mxu0 %v6374_v22 }
 0xc59   :  { %5744 = vmatmul.mubr.msk.f32.vlgmr.msra.gmra.mrb[14].mxu0 %vm153_vm0, %v6378_v32 }
 0xc5a   :  { %5750 = vmatprep.mubr.msk.f32.mxu0 %vm6375_vm2, %v6376_v23 }
 0xd2c   :  { %v1713_v44 = vpop.f32.mrb[14].mxu0 }
 0xd2d   :  { %v1717_v45 = vmul.f32 0.0625, %v1713_v44  ;;  %v5745_v46 = vpop.f32.mrb[15].mxu0 }
 0xd2f   :  { %v1721_v47 = vrot.slane %v1717_v45, %v6460_v29 }
 0xd31   :  { %v1722_v50 = vsub.f32 %v1645_v39, %v1721_v47  ;;  %v1723_v51 = vsub.f32 %v1646_v53, %v1721_v47 }
 0xd33   :  { %v1724_v52 = vmul.f32 %v1722_v50, %v1722_v50  ;;  %v1725_v25 = vmul.f32 %v1723_v51, %v1723_v51 }
 0xd35   :  { %v6059_v56 = vpack.c.bf16 %v1725_v25, %v1724_v52 }
 0xd37   :  { %6060 = vmatpush3.bf16.msra.mxu0 %v6059_v56 }
 0xd38   :  { %6069 = vmatprep.subr.bf16.mxu0 %v6374_v22 }
 0xd3a   :  { %5751 = vmatmul.mubr.msk.f32.vlgmr.msra.gmra.mrb[16].mxu0 %vm153_vm0, %v6378_v32 }
 0xd3b   :  { %5768 = vmatprep.mubr.msk.f32.mxu0 %vm6375_vm2, %v6376_v23 }
 0xe0d   :  { %v1792_v63 = vpop.f32.mrb[16].mxu0 }
 0xe0e   :  { %v1796_v0 = vmul.f32 0.0625, %v1792_v63  ;;  %v5752_v19 = vpop.f32.mrb[17].mxu0 }
 0xe10   :  { %v1797_v1 = vadd.f32 1e-05, %v1796_v0 }
 0xe12   :  { %6308 = vrsqrt.f32 %v1797_v1 }
 0xe1c   :  { %v6309_v18 = vpop.eup %6308 }
 0xe1d   :  { %v1802_v2 = vrot.slane %v6309_v18, %v6460_v29 }
 0xe1f   :  { %v1803_v4 = vmul.f32 %v1802_v2, %v1722_v50  ;;  %v1804_v5 = vmul.f32 %v1802_v2, %v1723_v51 }
 0xe21   :  { %v1812_v7 = vmul.f32 %v5392_v3, %v1803_v4  ;;  %v1813_v8 = vmul.f32 %v5392_v3, %v1804_v5 }
 0xe23   :  { %v1821_v9 = vadd.f32 %v5393_v6, %v1812_v7  ;;  %v1822_v10 = vadd.f32 %v5393_v6, %v1813_v8 }
 0xe25   :  { %v1823_v12 = vmax.f32 %v1821_v9, 0.0  ;;  %v1824_v13 = vmax.f32 %v1822_v10, 0.0 }
 0xe27   :  { %5761 = vmatprep.mubr.msk.f32.mxu1 %vm243_vm1, %v1823_v12 }
 0xe28   :  { %5762 = vmatmul.mubr.msk.f32.vlgmr.msra.gmra.mrb[8].mxu1 %vm243_vm1, %v1824_v13 }
 0xefb   :  { %v6626_v14 = vpop.f32.mrb[8].mxu1 }
 0xefc   :  { %1914 = vrot.lane.b32.xlu1 %v6626_v14, %s6373_s18  ;;  %v6630_v15 = vpop.f32.mrb[9].mxu1 }
 0xefd   :  { %1912 = vrot.lane.b32.xlu0 %v6630_v15, %s6373_s18 }
 0xf00   :  { %1955 = vperm.xlu1 %6260, %v6626_v14  }
 0xf01   :  { %1951 = vperm.xlu0 %6261, %v6630_v15  }
 0xf04   :  { %6263 = vset.pattern.permute.xlu1 %v6372_v17 }
 0xf05   :  { %2106 = vperm.xlu1 %6263, %v6630_v15   ;;  %6262 = vset.pattern.permute.xlu0 %v6372_v17 }
 0xf06   :  { %2110 = vperm.xlu0 %6262, %v6626_v14  }
 0xf6e   :  { %v1915_v20 = vpop.permute.xlu1 %1914 }
 0xf6f   :  { %v1913_v16 = vpop.permute.xlu0 %1912 }
 0xf70   :  { %1918 = vxpose.xlu1.b32.start [1/2] (short) (narrow) %v1913_v16, 8 }
 0xf74   :  { %1919 = vxpose.xlu1.b32.end [2/2] (short) (narrow) %v1915_v20, 8 }
 0xf7f   :  { %v1956_v21 = vpop.permute.xlu1 %1955 }
 0xf80   :  { %v1952_v24 = vpop.permute.xlu0 %1951 }
 0xf84   :  { %v2107_v26 = vpop.permute.xlu1 %2106 }
 0xf85   :  { %v2111_v34 = vpop.permute.xlu0 %2110 }
 0xf92   :  { %6265 = vset.pattern.permute.xlu1 %v6379_v43 }
 0xff0   :  { %v1934_v28 = vpop.trf.xlu1 }
 0xff1   :  { %v1961_v31 = vrot.slane %v1934_v28, %v6460_v29  ;;  %v2116_v33 = vrot.slane %v1934_v28, %v6463_v30 }
 0xff3   :  { %v1962_v35 = vadd.f32 %v1961_v31, %v1952_v24  ;;  %v1963_v36 = vadd.f32 %v1961_v31, %v1956_v21  ;;  %v2117_v37 = vadd.f32 %v2116_v33, %v2107_v26  ;;  %v2118_v54 = vadd.f32 %v2116_v33, %v2111_v34 }
 0xff5   :  { %vm1964_vm15 = vcmp.gt.f32.partialorder %v1962_v35, 0.0  ;;  %vm1965_vm3 = vcmp.gt.f32.partialorder %v1963_v36, 0.0  ;;  %v1966_v38 = vmul.f32 0.2, %v1962_v35  ;;  %v1967_v53 = vmul.f32 0.2, %v1963_v36 }
 0xff6   :  { %vm2119_vm4 = vcmp.gt.f32.partialorder %v2117_v37, 0.0  ;;  %vm2120_vm5 = vcmp.gt.f32.partialorder %v2118_v54, 0.0  ;;  %v2121_v39 = vmul.f32 0.2, %v2117_v37  ;;  %v2122_v42 = vmul.f32 0.2, %v2118_v54 }
 0xff7   :  { %v1968_v44 = vsel %vm1964_vm15, %v1962_v35, %v1966_v38  ;;  %v1969_v45 = vsel %vm1965_vm3, %v1963_v36, %v1967_v53 }
 0xff8   :  { %v1970_v46 = vadd.f32 %v6467_v40, %v1968_v44  ;;  %v1971_v47 = vadd.f32 %v6469_v41, %v1969_v45  ;;  %v2123_v50 = vsel %vm2119_vm4, %v2117_v37, %v2121_v39  ;;  %v2124_v51 = vsel %vm2120_vm5, %v2118_v54, %v2122_v42 }
 0xff9   :  { %v2125_v52 = vadd.f32 %v6467_v40, %v2123_v50  ;;  %v2126_v25 = vadd.f32 %v6469_v41, %v2124_v51 }
 0xffa   :  { %v1972_v56 = vsel %vm153_vm0, %v1970_v46, -inf  ;;  %v1973_v57 = vsel %vm153_vm0, %v1971_v47, -inf }
 0xffb   :  { %v1974_v58 = vmax.f32 %v1972_v56, %v1973_v57  ;;  %v2127_v59 = vsel %vm153_vm0, %v2125_v52, -inf  ;;  %v2128_v60 = vsel %vm153_vm0, %v2126_v25, -inf }
 0xffc   :  { %v2129_v61 = vmax.f32 %v2127_v59, %v2128_v60 }
 0xffd   :  { %v1975_v62 = vrot.slane %v1974_v58, 4 }
 0xffe   :  { %v2130_v63 = vrot.slane %v2129_v61, 4 }
 0xfff   :  { %v1976_v0 = vmax.f32 %v1974_v58, %v1975_v62 }
0x1000   :  { %v2131_v19 = vmax.f32 %v2129_v61, %v2130_v63 }
0x1001   :  { %v1977_v1 = vrot.slane %v1976_v0, 2 }
0x1002   :  { %v2132_v18 = vrot.slane %v2131_v19, 2 }
0x1003   :  { %v1978_v2 = vmax.f32 %v1976_v0, %v1977_v1  ;;  %v5402_v0 = vld [vmem:[%s5344_s30] ss:$0 sm:$0xff]  ;;  %s6396_s30 = smov 18  }
0x1004   :  { %v2133_v40 = vmax.f32 %v2131_v19, %v2132_v18  ;;  %s5348_s3 = sld [smem:[%s6968_s0 + %s6396_s30]]  }
0x1005   :  { %v1979_v3 = vrot.slane %v1978_v2, 1 }
0x1006   :  { %v2134_v41 = vrot.slane %v2133_v40, 1 }
0x1007   :  { %v1980_v4 = vmax.f32 %v1978_v2, %v1979_v3 }
0x1008   :  { %v2135_v5 = vmax.f32 %v2133_v40, %v2134_v41 }
0x1009   :  { %v1981_v6 = vsub.f32 %v1970_v46, %v1980_v4  ;;  %v1982_v7 = vsub.f32 %v1971_v47, %v1980_v4 }
0x100a   :  { %v2136_v8 = vsub.f32 %v2125_v52, %v2135_v5  ;;  %v2137_v9 = vsub.f32 %v2126_v25, %v2135_v5 }
0x100b   :  { %v1983_v10 = vmul.f32 1.442695, %v1981_v6  ;;  %v1985_v12 = vmul.f32 1.442695, %v1982_v7 }
0x100c   :  { %v2138_v13 = vmul.f32 1.442695, %v2136_v8  ;;  %v2140_v16 = vmul.f32 1.442695, %v2137_v9 }
0x100d   :  { %6310 = vpow2.f32 %v1983_v10 }
0x100e   :  { %6312 = vpow2.f32 %v1985_v12  ;;  %v2613_v12 = vld [vmem:[%s5360_s4] sm:$0xff] }
0x100f   :  { %6314 = vpow2.f32 %v2138_v13  ;;  %v2614_v13 = vld [vmem:[%s5360_s4 + $0x8] sm:$0xff] }
0x1010   :  { %6316 = vpow2.f32 %v2140_v16  ;;  %v2615_v16 = vld [vmem:[%s5360_s4 + $0x10] sm:$0xff] }
0x1017   :  { %v6311_v20 = vpop.eup %6310 }
0x1018   :  { %v6313_v21 = vpop.eup %6312 }
0x1019   :  { %v6315_v24 = vpop.eup %6314  ;;  %v6070_v26 = vpack.c.bf16 %v6313_v21, %v6311_v20 }
0x101a   :  { %v6317_v28 = vpop.eup %6316  ;;  %5782 = vmatprep.mubr.msk.f32.mxu1 %vm153_vm0, %v6315_v24 }
0x101b   :  { %6071 = vmatpush3.bf16.msra.mxu0 %v6070_v26  ;;  %v6073_v31 = vpack.c.bf16 %v6317_v28, %v6315_v24  ;;  %v2611_v26 = vld [vmem:[%s5359_s8] sm:$0xff] }
0x101c   :  { %6072 = vmatprep.subr.bf16.mxu0 %v6374_v22 }
0x101e   :  { %5769 = vmatmul.mubr.msk.f32.vlgmr.msra.gmra.mrb[18].mxu0 %vm153_vm0, %v6378_v32 }
0x101f   :  { %6074 = vmatpush3.bf16.msra.mxu0 %v6073_v31  ;;  %5775 = vmatprep.mubr.msk.f32.mxu0 %vm6375_vm2, %v6376_v23 }
0x1020   :  { %6083 = vmatprep.subr.bf16.mxu0 %v6374_v22 }
0x1022   :  { %5776 = vmatmul.mubr.msk.f32.vlgmr.msra.gmra.mrb[20].mxu0 %vm153_vm0, %v6378_v32 }
0x1023   :  { %5796 = vmatprep.mubr.msk.f32.mxu0 %vm6375_vm2, %v6376_v23 }
0x10f1   :  { %v2053_v33 = vpop.f32.mrb[18].mxu0 }
0x10f2   :  { %v2054_v34 = vadd.f32 1e-16, %v2053_v33  ;;  %v5770_v35 = vpop.f32.mrb[19].mxu0  ;;  %v2786_v33 = vld [vmem:[%s6696_s13] sm:$0xff] }
0x10f4   :  { %6318 = vrcp.f32 %v2054_v34  ;;  %v2787_v34 = vld [vmem:[%s6696_s13 + $0x8] sm:$0xff] }
0x10f5   :  { %v2208_v36 = vpop.f32.mrb[20].mxu0  ;;  %v6101_v35 = vpack.c.bf16 %v2787_v34, %v2786_v33 }
0x10f6   :  { %v2209_v37 = vadd.f32 1e-16, %v2208_v36  ;;  %v5777_v54 = vpop.f32.mrb[21].mxu0 }
0x10f8   :  { %6320 = vrcp.f32 %v2209_v37 }
0x10fe   :  { %v6319_v38 = vpop.eup %6318 }
0x10ff   :  { %2059 = vxpose.xlu0.b32.start.end [1/1] (short) (narrow) %v6319_v38, 16 }
0x1102   :  { %v6321_v53 = vpop.eup %6320 }
0x1104   :  { %2214 = vxpose.xlu0.b32.start.end [1/1] (short) (narrow) %v6321_v53, 16 }
0x112d   :  { %6264 = vset.pattern.permute.xlu0 %v6379_v43 }
0x117f   :  { %v2075_v39 = vpop.trf.xlu0 }
0x1183   :  { %v2076_v42 = vpop.trf.xlu0 }
0x1187   :  { %v2230_v44 = vpop.trf.xlu0 }
0x1188   :  { %2248 = vperm.xlu0 %6264, %v2230_v44  }
0x118b   :  { %v2231_v45 = vpop.trf.xlu0 }
0x118c   :  { %2253 = vperm.xlu1 %6265, %v2231_v45   ;;  %6266 = vset.pattern.permute.xlu0 %v6372_v17 }
0x1190   :  { %2093 = vperm.xlu1 %6265, %v2075_v39  }
0x1194   :  { %2098 = vperm.xlu1 %6265, %v2076_v42   ;;  %v5405_v42 = vld [vmem:[%s5345_s17] ss:$0 sm:$0xff]  ;;  %s6400_s17 = smov 22  }
0x1195   :  { %s5352_s21 = sld [smem:[%s6968_s0 + %s6400_s17]]  }
0x1198   :  { %6267 = vset.pattern.permute.xlu1 %v6372_v17 }
0x1207   :  { %v2249_v46 = vpop.permute.xlu0 %2248 }
0x1208   :  { %v2256_v47 = vmul.f32 %v2249_v46, %v6506_v49  ;;  %v5406_v46 = vld [vmem:[%s5346_s22] ss:$0 sm:$0xff]  ;;  %s6401_s22 = smov 25  }
0x1209   :  { %s5355_s25 = sld [smem:[%s6968_s0 + %s6401_s22]]  }
0x120a   :  { %v2258_v52 = vmul.f32 %v2256_v47, %v6630_v15 }
0x120b   :  { %v2254_v50 = vpop.permute.xlu1 %2253 }
0x120c   :  { %v2257_v51 = vmul.f32 %v2254_v50, %v6506_v49 }
0x120e   :  { %v2259_v25 = vmul.f32 %v6626_v14, %v2257_v51 }
0x120f   :  { %v2094_v56 = vpop.permute.xlu1 %2093 }
0x1210   :  { %v6075_v57 = vpack.c.bf16 %v2259_v25, %v2258_v52  ;;  %v2101_v58 = vmul.f32 %v2094_v56, %v6514_v55 }
0x1212   :  { %6076 = vmatprep.subr.bf16.mxu1 %v6075_v57  ;;  %v2103_v61 = vmul.f32 %v2101_v58, %v6630_v15  ;;  %v6367_v58 = vld [vmem:[%s6421_s9 + $0x8] sm:$0xff] }
0x1213   :  { %v2099_v59 = vpop.permute.xlu1 %2098  ;;  %6078 = vmatpush3.bf16.msra.mxu1 %v6075_v57  ;;  %v6366_v57 = vld [vmem:[%s6421_s9] sm:$0xff]  ;;  %s6395_s9 = smov 2  }
0x1214   :  { %v2102_v60 = vmul.f32 %v2099_v59, %v6514_v55  ;;  %v2788_v59 = vld [vmem:[%s6696_s13 + $0x10] sm:$0xff]  ;;  %s5332_s29 = sld [smem:[%s6968_s0 + %s6395_s9]]  }
0x1215   :  { %s5364_s9 = sld [smem:[%s6968_s0 + %s6409_s24]]  }
0x1216   :  { %v2104_v62 = vmul.f32 %v6626_v14, %v2102_v60  ;;  %5783 = vmatmul.mubr.msk.f32.vlgmr.msra.gmra.mrb[10].mxu1 %vm153_vm0, %v6317_v28  ;;  %v2612_v28 = vld [vmem:[%s5359_s8 + $0x8] sm:$0xff]  ;;  %v2789_v60 = vld [vmem:[%s6696_s13 + $0x18] sm:$0xff]  ;;  %s6398_s8 = smov 19   ;;  %s6399_s13 = smov 20  }
0x1217   :  { %5789 = vmatprep.mubr.msk.f32.mxu1 %vm153_vm0, %v6311_v20  ;;  %v6089_v20 = vpack.c.bf16 %v2614_v13, %v2613_v12  ;;  %v6097_v31 = vpack.c.bf16 %v2612_v28, %v2611_v26  ;;  %s5349_s12 = sld [smem:[%s6968_s0 + %s6398_s8]]  }
0x1218   :  { %v6079_v63 = vpack.c.bf16 %v2104_v62, %v2103_v61  ;;  %v6105_v61 = vpack.c.bf16 %v2789_v60, %v2788_v59  ;;  %v5411_v62 = vld [vmem:[%s5361_s26] ss:$0 sm:$0xff]  ;;  %s5350_s16 = sld [smem:[%s6968_s0 + %s6399_s13]]   ;;  %s6402_s26 = smov 23  }
0x1219   :  { %s5353_s28 = sld [smem:[%s6968_s0 + %s6402_s26]]  }
0x121a   :  { %6080 = vmatprep.subr.bf16.mxu1 %v6079_v63 }
0x121b   :  { %6082 = vmatpush3.bf16.msra.mxu1 %v6079_v63 }
0x121c   :  { %6090 = vmatprep.subr.bf16.mxu1 %v6089_v20 }
0x121e   :  { %5790 = vmatmul.mubr.msk.f32.vlgmr.msra.gmra.mrb[10].mxu1 %vm153_vm0, %v6313_v21  ;;  %v2616_v21 = vld [vmem:[%s5360_s4 + $0x18] sm:$0xff]  ;;  %s6397_s4 = smov 21  }
0x121f   :  { %v6093_v24 = vpack.c.bf16 %v2616_v21, %v2615_v16  ;;  %6092 = vmatpush3.bf16.msra.mxu1 %v6089_v20  ;;  %s5351_s7 = sld [smem:[%s6968_s0 + %s6397_s4]]  }
0x1221   :  { %6094 = vmatprep.subr.bf16.mxu1 %v6093_v24 }
0x1223   :  { %6096 = vmatpush3.bf16.msra.mxu1 %v6093_v24 }
0x1224   :  { %6098 = vmatprep.subr.bf16.mxu1 %v6097_v31 }
0x12f1   :  { %v5791_v19 = vpop.f32.mrb[10].mxu1 }
0x12f2   :  { %v2430_v1 = vadd.f32 %v5791_v19, %v5402_v0  ;;  %v2413_v15 = vpop.f32.mrb[11].mxu1 }
0x12f3   :  { %v2429_v18 = vadd.f32 %v5402_v0, %v2413_v15 }
0x12f4   :  { %v2432_v14 = vmax.f32 %v2430_v1, 0.0 }
0x12f5   :  { %v2431_v2 = vmax.f32 %v2429_v18, 0.0 }
0x12f7   :  { %v6084_v40 = vpack.c.bf16 %v2432_v14, %v2431_v2 }
0x12f9   :  { %6085 = vmatpush3.bf16.msra.mxu0 %v6084_v40 }
0x12fa   :  { %6086 = vmatprep.subr.bf16.mxu0 %v6374_v22 }
0x12fc   :  { %5797 = vmatmul.mubr.msk.f32.vlgmr.msra.gmra.mrb[22].mxu0 %vm153_vm0, %v6378_v32 }
0x12fd   :  { %5803 = vmatprep.mubr.msk.f32.mxu0 %vm6375_vm2, %v6376_v23 }
0x13cf   :  { %v2499_v3 = vpop.f32.mrb[22].mxu0 }
0x13d0   :  { %v2503_v41 = vmul.f32 0.0625, %v2499_v3  ;;  %v5798_v4 = vpop.f32.mrb[23].mxu0 }
0x13d2   :  { %v2507_v5 = vrot.slane %v2503_v41, %v6460_v29 }
0x13d4   :  { %v2508_v6 = vsub.f32 %v2431_v2, %v2507_v5  ;;  %v2509_v7 = vsub.f32 %v2432_v14, %v2507_v5  ;;  %v5459_v5 = vld [vmem:[%s5332_s29] sm:$0xff]   ;;  %s6403_s29 = smov 24  }
0x13d5   :  { %v6744_v16 = vunpack.c.l.bf16 %v5459_v5  ;;  %v6746_v20 = vunpack.c.h.bf16 %v5459_v5  ;;  %s5354_s2 = sld [smem:[%s6968_s0 + %s6403_s29]]  }
0x13d6   :  { %v2510_v8 = vmul.f32 %v2508_v6, %v2508_v6  ;;  %v2511_v9 = vmul.f32 %v2509_v7, %v2509_v7 }
0x13d8   :  { %v6087_v10 = vpack.c.bf16 %v2511_v9, %v2510_v8 }
0x13da   :  { %6088 = vmatpush3.bf16.msra.mxu0 %v6087_v10 }
0x13db   :  { %6102 = vmatprep.subr.bf16.mxu0 %v6101_v35 }
0x13dd   :  { %5804 = vmatmul.mubr.msk.f32.vlgmr.msra.gmra.mrb[24].mxu0 %vm153_vm0, %v6378_v32 }
0x13de   :  { %6104 = vmatpush3.bf16.msra.mxu0 %v6101_v35 }
0x13df   :  { %6106 = vmatprep.subr.bf16.mxu0 %v6105_v61 }
0x13e2   :  { %6108 = vmatpush3.bf16.msra.mxu0 %v6105_v61 }
0x13e3   :  { %6109 = vmatprep.subr.bf16.mxu0 %v6374_v22 }
0x14b0   :  { %v2578_v36 = vpop.f32.mrb[24].mxu0 }
0x14b1   :  { %v2582_v37 = vmul.f32 0.0625, %v2578_v36  ;;  %v5805_v54 = vpop.f32.mrb[25].mxu0 }
0x14b3   :  { %v2583_v38 = vadd.f32 1e-05, %v2582_v37 }
0x14b5   :  { %6322 = vrsqrt.f32 %v2583_v38 }
0x14bf   :  { %v6323_v53 = vpop.eup %6322 }
0x14c0   :  { %v2588_v39 = vrot.slane %v6323_v53, %v6460_v29 }
0x14c2   :  { %v2589_v44 = vmul.f32 %v2588_v39, %v2508_v6  ;;  %v2590_v45 = vmul.f32 %v2588_v39, %v2509_v7 }
0x14c4   :  { %v2598_v47 = vmul.f32 %v5405_v42, %v2589_v44  ;;  %v2599_v50 = vmul.f32 %v5405_v42, %v2590_v45 }
0x14c6   :  { %v2607_v51 = vadd.f32 %v5406_v46, %v2598_v47  ;;  %v2608_v52 = vadd.f32 %v5406_v46, %v2599_v50 }
0x14c8   :  { %v2609_v25 = vmax.f32 %v2607_v51, 0.0  ;;  %v2610_v56 = vmax.f32 %v2608_v52, 0.0 }
0x14ca   :  { %5814 = vmatprep.mubr.msk.f32.mxu1 %vm243_vm1, %v2609_v25 }
0x14cb   :  { %5815 = vmatmul.mubr.msk.f32.vlgmr.msra.gmra.mrb[12].mxu1 %vm243_vm1, %v2610_v56 }
0x14cc   :  { %6100 = vmatpush3.bf16.msra.mxu1 %v6097_v31  ;;  %5821 = vmatprep.mubr.msk.f32.mxu1 %vm153_vm0, %v6366_v57 }
0x14cd   :  { %6112 = vmatprep.subr.bf16.mxu1 %v6374_v22 }
0x14d3   :  { %5822 = vmatmul.mubr.msk.f32.vlgmr.msra.gmra.mrb[12].mxu1 %vm153_vm0, %v6367_v58 }
0x14d4   :  { %5846 = vmatprep.mubr.msk.f32.mxu1 %vm6375_vm2, %v6376_v23 }
0x15a6   :  { %v5823_v63 = vpop.f32.mrb[12].mxu1 }
0x15a7   :  { %v2764_v0 = vpop.f32.mrb[13].mxu1  ;;  %v2781_v1 = vadd.f32 %v5823_v63, %v5411_v62 }
0x15a8   :  { %v2780_v19 = vadd.f32 %v5411_v62, %v2764_v0 }
0x15aa   :  { %5832 = vmatprep.mubr.msk.f32.mxu0 %vm243_vm1, %v2780_v19 }
0x15ab   :  { %5833 = vmatmul.mubr.msk.f32.vlgmr.msra.gmra.mrb[26].mxu0 %vm243_vm1, %v2781_v1 }
0x15ac   :  { %5839 = vmatprep.mubr.msk.f32.mxu0 %vm6375_vm2, %v6376_v23 }
0x167e   :  { %v6726_v15 = vpop.f32.mrb[26].mxu0 }
0x167f   :  { %2875 = vrot.lane.b32.xlu0 %v6726_v15, %s6373_s18  ;;  %v6730_v18 = vpop.f32.mrb[27].mxu0 }
0x1680   :  { %2873 = vrot.lane.b32.xlu1 %v6730_v18, %s6373_s18 }
0x1683   :  { %3071 = vperm.xlu0 %6266, %v6726_v15  }
0x1684   :  { %3067 = vperm.xlu1 %6267, %v6730_v18  }
0x1688   :  { %6268 = vset.pattern.permute.xlu1 %v6370_v11 }
0x1689   :  { %2912 = vperm.xlu1 %6268, %v6730_v18  }
0x168d   :  { %2916 = vperm.xlu1 %6268, %v6726_v15  }
0x16f1   :  { %v2876_v2 = vpop.permute.xlu0 %2875 }
0x16f2   :  { %v2874_v14 = vpop.permute.xlu1 %2873 }
0x16f3   :  { %2879 = vxpose.xlu0.b32.start [1/2] (short) (narrow) %v2874_v14, 8 }
0x16f7   :  { %2880 = vxpose.xlu0.b32.end [2/2] (short) (narrow) %v2876_v2, 8 }
0x1702   :  { %v3072_v3 = vpop.permute.xlu0 %3071 }
0x1703   :  { %v3068_v40 = vpop.permute.xlu1 %3067 }
0x1708   :  { %v2913_v41 = vpop.permute.xlu1 %2912 }
0x170c   :  { %v2917_v8 = vpop.permute.xlu1 %2916 }
0x1773   :  { %v2895_v4 = vpop.trf.xlu0 }
0x1774   :  { %v2922_v6 = vrot.slane %v2895_v4, %v6460_v29  ;;  %v3077_v7 = vrot.slane %v2895_v4, %v6463_v30 }
0x1776   :  { %v2923_v9 = vadd.f32 %v2922_v6, %v2913_v41  ;;  %v2924_v10 = vadd.f32 %v2922_v6, %v2917_v8  ;;  %v3078_v12 = vadd.f32 %v3077_v7, %v3068_v40  ;;  %v3079_v13 = vadd.f32 %v3077_v7, %v3072_v3 }
0x1778   :  { %vm2925_vm6 = vcmp.gt.f32.partialorder %v2923_v9, 0.0  ;;  %vm2926_vm7 = vcmp.gt.f32.partialorder %v2924_v10, 0.0  ;;  %v2927_v21 = vmul.f32 0.2, %v2923_v9  ;;  %v2928_v24 = vmul.f32 0.2, %v2924_v10 }
0x1779   :  { %vm3080_vm8 = vcmp.gt.f32.partialorder %v3078_v12, 0.0  ;;  %vm3081_vm9 = vcmp.gt.f32.partialorder %v3079_v13, 0.0  ;;  %v3082_v26 = vmul.f32 0.2, %v3078_v12  ;;  %v3083_v28 = vmul.f32 0.2, %v3079_v13 }
0x177a   :  { %v2929_v31 = vsel %vm2925_vm6, %v2923_v9, %v2927_v21  ;;  %v2930_v33 = vsel %vm2926_vm7, %v2924_v10, %v2928_v24 }
0x177b   :  { %v2931_v34 = vadd.f32 %v6744_v16, %v2929_v31  ;;  %v2932_v35 = vadd.f32 %v6746_v20, %v2930_v33  ;;  %v3084_v36 = vsel %vm3080_vm8, %v3078_v12, %v3082_v26  ;;  %v3085_v37 = vsel %vm3081_vm9, %v3079_v13, %v3083_v28 }
0x177c   :  { %v3086_v54 = vadd.f32 %v6744_v16, %v3084_v36  ;;  %v3087_v38 = vadd.f32 %v6746_v20, %v3085_v37 }
0x177d   :  { %v2933_v53 = vsel %vm153_vm0, %v2931_v34, -inf  ;;  %v2934_v39 = vsel %vm153_vm0, %v2932_v35, -inf }
0x177e   :  { %v2935_v42 = vmax.f32 %v2933_v53, %v2934_v39  ;;  %v3088_v44 = vsel %vm153_vm0, %v3086_v54, -inf  ;;  %v3089_v45 = vsel %vm153_vm0, %v3087_v38, -inf }
0x177f   :  { %v3090_v46 = vmax.f32 %v3088_v44, %v3089_v45 }
0x1780   :  { %v2936_v47 = vrot.slane %v2935_v42, 4 }
0x1781   :  { %v3091_v50 = vrot.slane %v3090_v46, 4 }
0x1782   :  { %v2937_v51 = vmax.f32 %v2935_v42, %v2936_v47 }
0x1783   :  { %v3092_v52 = vmax.f32 %v3090_v46, %v3091_v50 }
0x1784   :  { %v2938_v25 = vrot.slane %v2937_v51, 2 }
0x1785   :  { %v3093_v56 = vrot.slane %v3092_v52, 2 }
0x1786   :  { %v2939_v57 = vmax.f32 %v2937_v51, %v2938_v25  ;;  %v5420_v25 = vld [vmem:[%s5348_s3] ss:$0 sm:$0xff] }
0x1787   :  { %v3094_v58 = vmax.f32 %v3092_v52, %v3093_v56 }
0x1788   :  { %v2940_v59 = vrot.slane %v2939_v57, 1 }
0x1789   :  { %v3095_v60 = vrot.slane %v3094_v58, 1 }
0x178a   :  { %v2941_v61 = vmax.f32 %v2939_v57, %v2940_v59 }
0x178b   :  { %v3096_v62 = vmax.f32 %v3094_v58, %v3095_v60 }
0x178c   :  { %v2942_v63 = vsub.f32 %v2931_v34, %v2941_v61  ;;  %v2943_v0 = vsub.f32 %v2932_v35, %v2941_v61 }
0x178d   :  { %v3097_v19 = vsub.f32 %v3086_v54, %v3096_v62  ;;  %v3098_v1 = vsub.f32 %v3087_v38, %v3096_v62 }
0x178e   :  { %v2944_v14 = vmul.f32 1.442695, %v2942_v63  ;;  %v2946_v2 = vmul.f32 1.442695, %v2943_v0 }
0x178f   :  { %v3099_v40 = vmul.f32 1.442695, %v3097_v19  ;;  %v3101_v3 = vmul.f32 1.442695, %v3098_v1 }
0x1790   :  { %6324 = vpow2.f32 %v2944_v14 }
0x1791   :  { %6326 = vpow2.f32 %v2946_v2 }
0x1792   :  { %6328 = vpow2.f32 %v3099_v40 }
0x1793   :  { %6330 = vpow2.f32 %v3101_v3  ;;  %v3576_v3 = vld [vmem:[%s5351_s7] sm:$0xff] }
0x179a   :  { %v6325_v41 = vpop.eup %6324 }
0x179b   :  { %v6327_v4 = vpop.eup %6326 }
0x179c   :  { %v6329_v5 = vpop.eup %6328  ;;  %v6110_v6 = vpack.c.bf16 %v6327_v4, %v6325_v41 }
0x179d   :  { %v6331_v7 = vpop.eup %6330 }
0x179e   :  { %6111 = vmatpush3.bf16.msra.mxu0 %v6110_v6  ;;  %v6113_v8 = vpack.c.bf16 %v6331_v7, %v6329_v5  ;;  %v3579_v6 = vld [vmem:[%s5351_s7 + $0x18] sm:$0xff] }
0x17a0   :  { %6114 = vmatpush3.bf16.msra.mxu1 %v6113_v8 }
0x17a1   :  { %5840 = vmatmul.mubr.msk.f32.vlgmr.msra.gmra.mrb[28].mxu0 %vm153_vm0, %v6378_v32  ;;  %6123 = vmatprep.subr.bf16.mxu1 %v6374_v22 }
0x17a2   :  { %5853 = vmatprep.mubr.msk.f32.mxu0 %vm153_vm0, %v6329_v5 }
0x17a3   :  { %5847 = vmatmul.mubr.msk.f32.vlgmr.msra.gmra.mrb[14].mxu1 %vm153_vm0, %v6378_v32 }
0x17a4   :  { %5867 = vmatprep.mubr.msk.f32.mxu1 %vm6375_vm2, %v6376_v23 }
0x1874   :  { %v3014_v9 = vpop.f32.mrb[28].mxu0 }
0x1875   :  { %v3015_v10 = vadd.f32 1e-16, %v3014_v9  ;;  %v5841_v12 = vpop.f32.mrb[29].mxu0 }
0x1876   :  { %v3169_v13 = vpop.f32.mrb[14].mxu1 }
0x1877   :  { %v3170_v21 = vadd.f32 1e-16, %v3169_v13  ;;  %v5848_v24 = vpop.f32.mrb[15].mxu1  ;;  %6332 = vrcp.f32 %v3015_v10 }
0x1878   :  { %v5423_v24 = vld [vmem:[%s5349_s12] ss:$0 sm:$0xff] }
0x1879   :  { %6334 = vrcp.f32 %v3170_v21 }
0x1881   :  { %v6333_v26 = vpop.eup %6332 }
0x1882   :  { %3020 = vxpose.xlu0.b32.start.end [1/1] (short) (narrow) %v6333_v26, 16 }
0x1883   :  { %v6335_v28 = vpop.eup %6334 }
0x1884   :  { %3175 = vxpose.xlu1.b32.start.end [1/1] (short) (narrow) %v6335_v28, 16 }
0x18a2   :  { %6270 = vset.pattern.permute.xlu1 %v6379_v43 }
0x18ab   :  { %6269 = vset.pattern.permute.xlu0 %v6379_v43 }
0x1902   :  { %v3036_v34 = vpop.trf.xlu0 }
0x1904   :  { %v3191_v31 = vpop.trf.xlu1 }
0x1905   :  { %3209 = vperm.xlu0 %6269, %v3191_v31   ;;  %v5424_v31 = vld [vmem:[%s5350_s16] ss:$0 sm:$0xff] }
0x1906   :  { %v3037_v35 = vpop.trf.xlu0 }
0x1908   :  { %v3192_v33 = vpop.trf.xlu1 }
0x1909   :  { %3214 = vperm.xlu1 %6270, %v3192_v33   ;;  %6272 = vset.pattern.permute.xlu0 %v6370_v11 }
0x190d   :  { %3054 = vperm.xlu1 %6270, %v3036_v34  }
0x1911   :  { %3059 = vperm.xlu1 %6270, %v3037_v35  }
0x1915   :  { %6271 = vset.pattern.permute.xlu1 %v6370_v11 }
0x1984   :  { %v3210_v36 = vpop.permute.xlu0 %3209 }
0x1985   :  { %v3217_v37 = vmul.f32 %v3210_v36, %v6506_v49 }
0x1987   :  { %v3219_v53 = vmul.f32 %v3217_v37, %v6730_v18 }
0x1988   :  { %v3215_v54 = vpop.permute.xlu1 %3214 }
0x1989   :  { %v3218_v38 = vmul.f32 %v3215_v54, %v6506_v49 }
0x198b   :  { %v3220_v39 = vmul.f32 %v6726_v15, %v3218_v38 }
0x198c   :  { %v3055_v42 = vpop.permute.xlu1 %3054 }
0x198d   :  { %v6115_v44 = vpack.c.bf16 %v3220_v39, %v3219_v53  ;;  %v3062_v45 = vmul.f32 %v3055_v42, %v6514_v55 }
0x198f   :  { %6116 = vmatprep.subr.bf16.mxu0 %v6115_v44  ;;  %v3064_v50 = vmul.f32 %v3062_v45, %v6730_v18 }
0x1990   :  { %6118 = vmatpush3.bf16.msra.mxu0 %v6115_v44  ;;  %v3060_v46 = vpop.permute.xlu1 %3059 }
0x1991   :  { %v3063_v47 = vmul.f32 %v3060_v46, %v6514_v55 }
0x1993   :  { %v3065_v51 = vmul.f32 %v6726_v15, %v3063_v47  ;;  %5854 = vmatmul.mubr.msk.f32.vlgmr.msra.gmra.mrb[30].mxu0 %vm153_vm0, %v6331_v7 }
0x1994   :  { %5860 = vmatprep.mubr.msk.f32.mxu0 %vm153_vm0, %v6325_v41  ;;  %v3577_v41 = vld [vmem:[%s5351_s7 + $0x8] sm:$0xff] }
0x1995   :  { %v6119_v52 = vpack.c.bf16 %v3065_v51, %v3064_v50  ;;  %v6129_v5 = vpack.c.bf16 %v3577_v41, %v3576_v3 }
0x1997   :  { %6120 = vmatprep.subr.bf16.mxu0 %v6119_v52 }
0x1998   :  { %6122 = vmatpush3.bf16.msra.mxu0 %v6119_v52 }
0x1999   :  { %6130 = vmatprep.subr.bf16.mxu0 %v6129_v5 }
0x199b   :  { %5861 = vmatmul.mubr.msk.f32.vlgmr.msra.gmra.mrb[30].mxu0 %vm153_vm0, %v6327_v4  ;;  %v3578_v4 = vld [vmem:[%s5351_s7 + $0x10] sm:$0xff] }
0x199c   :  { %v6133_v7 = vpack.c.bf16 %v3579_v6, %v3578_v4  ;;  %6132 = vmatpush3.bf16.msra.mxu0 %v6129_v5 }
0x199e   :  { %6134 = vmatprep.subr.bf16.mxu0 %v6133_v7 }
0x19a0   :  { %6136 = vmatpush3.bf16.msra.mxu0 %v6133_v7 }
0x1a6e   :  { %v5862_v56 = vpop.f32.mrb[30].mxu0 }
0x1a6f   :  { %v3391_v57 = vadd.f32 %v5862_v56, %v5420_v25  ;;  %v3374_v18 = vpop.f32.mrb[31].mxu0 }
0x1a70   :  { %v3390_v58 = vadd.f32 %v5420_v25, %v3374_v18 }
0x1a71   :  { %v3393_v15 = vmax.f32 %v3391_v57, 0.0 }
0x1a72   :  { %v3392_v59 = vmax.f32 %v3390_v58, 0.0 }
0x1a74   :  { %v6124_v60 = vpack.c.bf16 %v3393_v15, %v3392_v59 }
0x1a76   :  { %6125 = vmatpush3.bf16.msra.mxu1 %v6124_v60 }
0x1a77   :  { %6126 = vmatprep.subr.bf16.mxu1 %v6374_v22 }
0x1a79   :  { %5868 = vmatmul.mubr.msk.f32.vlgmr.msra.gmra.mrb[16].mxu1 %vm153_vm0, %v6378_v32 }
0x1a7a   :  { %5874 = vmatprep.mubr.msk.f32.mxu1 %vm6375_vm2, %v6376_v23 }
0x1b4c   :  { %v3460_v61 = vpop.f32.mrb[16].mxu1 }
0x1b4d   :  { %v3464_v62 = vmul.f32 0.0625, %v3460_v61  ;;  %v5869_v63 = vpop.f32.mrb[17].mxu1 }
0x1b4f   :  { %v3468_v0 = vrot.slane %v3464_v62, %v6460_v29 }
0x1b51   :  { %v3469_v19 = vsub.f32 %v3392_v59, %v3468_v0  ;;  %v3470_v1 = vsub.f32 %v3393_v15, %v3468_v0 }
0x1b53   :  { %v3471_v14 = vmul.f32 %v3469_v19, %v3469_v19  ;;  %v3472_v2 = vmul.f32 %v3470_v1, %v3470_v1 }
0x1b55   :  { %v6127_v40 = vpack.c.bf16 %v3472_v2, %v3471_v14 }
0x1b57   :  { %6128 = vmatpush3.bf16.msra.mxu1 %v6127_v40 }
0x1b58   :  { %6137 = vmatprep.subr.bf16.mxu1 %v6374_v22 }
0x1b5a   :  { %5875 = vmatmul.mubr.msk.f32.vlgmr.msra.gmra.mrb[18].mxu1 %vm153_vm0, %v6378_v32 }
0x1b5b   :  { %5892 = vmatprep.mubr.msk.f32.mxu1 %vm6375_vm2, %v6376_v23 }
0x1c2d   :  { %v3539_v8 = vpop.f32.mrb[18].mxu1 }
0x1c2e   :  { %v3543_v9 = vmul.f32 0.0625, %v3539_v8  ;;  %v5876_v10 = vpop.f32.mrb[19].mxu1 }
0x1c30   :  { %v3544_v12 = vadd.f32 1e-05, %v3543_v9 }
0x1c32   :  { %6336 = vrsqrt.f32 %v3544_v12 }
0x1c3c   :  { %v6337_v13 = vpop.eup %6336 }
0x1c3d   :  { %v3549_v21 = vrot.slane %v6337_v13, %v6460_v29 }
0x1c3f   :  { %v3550_v26 = vmul.f32 %v3549_v21, %v3469_v19  ;;  %v3551_v28 = vmul.f32 %v3549_v21, %v3470_v1 }
0x1c41   :  { %v3559_v33 = vmul.f32 %v5423_v24, %v3550_v26  ;;  %v3560_v34 = vmul.f32 %v5423_v24, %v3551_v28 }
0x1c43   :  { %v3568_v35 = vadd.f32 %v5424_v31, %v3559_v33  ;;  %v3569_v36 = vadd.f32 %v5424_v31, %v3560_v34 }
0x1c45   :  { %vm3570_vm10 = vcmp.gt.f32.partialorder %v3568_v35, 0.0  ;;  %v3572_v37 = vmul.f32 0.1, %v3568_v35  ;;  %vm3571_vm11 = vcmp.gt.f32.partialorder %v3569_v36, 0.0  ;;  %v3573_v54 = vmul.f32 0.1, %v3569_v36 }
0x1c47   :  { %v3574_v38 = vsel %vm3570_vm10, %v3568_v35, %v3572_v37  ;;  %v3575_v53 = vsel %vm3571_vm11, %v3569_v36, %v3573_v54 }
0x1c48   :  { %5885 = vmatprep.mubr.msk.f32.mxu0 %vm243_vm1, %v3574_v38 }
0x1c49   :  { %5886 = vmatmul.mubr.msk.f32.vlgmr.msra.gmra.mrb[32].mxu0 %vm243_vm1, %v3575_v53 }
0x1d1c   :  { %v6805_v39 = vpop.f32.mrb[32].mxu0 }
0x1d1d   :  { %3665 = vrot.lane.b32.xlu1 %v6805_v39, %s6373_s18  ;;  %v6809_v42 = vpop.f32.mrb[33].mxu0 }
0x1d1e   :  { %3663 = vrot.lane.b32.xlu0 %v6809_v42, %s6373_s18 }
0x1d21   :  { %3706 = vperm.xlu1 %6271, %v6805_v39  }
0x1d22   :  { %3702 = vperm.xlu0 %6272, %v6809_v42  }
0x1d25   :  { %6274 = vset.pattern.permute.xlu1 %v6372_v17 }
0x1d26   :  { %3857 = vperm.xlu1 %6274, %v6809_v42   ;;  %6273 = vset.pattern.permute.xlu0 %v6372_v17 }
0x1d27   :  { %3861 = vperm.xlu0 %6273, %v6805_v39  }
0x1d8f   :  { %v3666_v45 = vpop.permute.xlu1 %3665 }
0x1d90   :  { %v3664_v44 = vpop.permute.xlu0 %3663 }
0x1d91   :  { %3669 = vxpose.xlu1.b32.start [1/2] (short) (narrow) %v3664_v44, 8 }
0x1d95   :  { %3670 = vxpose.xlu1.b32.end [2/2] (short) (narrow) %v3666_v45, 8 }
0x1da0   :  { %v3707_v46 = vpop.permute.xlu1 %3706 }
0x1da1   :  { %v3703_v47 = vpop.permute.xlu0 %3702 }
0x1da5   :  { %v3858_v50 = vpop.permute.xlu1 %3857 }
0x1da6   :  { %v3862_v56 = vpop.permute.xlu0 %3861 }
0x1db3   :  { %6276 = vset.pattern.permute.xlu1 %v6379_v43 }
0x1e11   :  { %v3685_v51 = vpop.trf.xlu1 }
0x1e12   :  { %v3712_v52 = vrot.slane %v3685_v51, %v6460_v29  ;;  %v3867_v25 = vrot.slane %v3685_v51, %v6463_v30 }
0x1e14   :  { %v3713_v57 = vadd.f32 %v3712_v52, %v3703_v47  ;;  %v3714_v18 = vadd.f32 %v3712_v52, %v3707_v46  ;;  %v3868_v58 = vadd.f32 %v3867_v25, %v3858_v50  ;;  %v3869_v15 = vadd.f32 %v3867_v25, %v3862_v56 }
0x1e16   :  { %vm3715_vm12 = vcmp.gt.f32.partialorder %v3713_v57, 0.0  ;;  %vm3716_vm13 = vcmp.gt.f32.partialorder %v3714_v18, 0.0  ;;  %v3717_v59 = vmul.f32 0.2, %v3713_v57  ;;  %v3718_v60 = vmul.f32 0.2, %v3714_v18 }
0x1e17   :  { %vm3870_vm14 = vcmp.gt.f32.partialorder %v3868_v58, 0.0  ;;  %vm3871_vm15 = vcmp.gt.f32.partialorder %v3869_v15, 0.0  ;;  %v3872_v61 = vmul.f32 0.2, %v3868_v58  ;;  %v3873_v62 = vmul.f32 0.2, %v3869_v15 }
0x1e18   :  { %v3719_v63 = vsel %vm3715_vm12, %v3713_v57, %v3717_v59  ;;  %v3720_v0 = vsel %vm3716_vm13, %v3714_v18, %v3718_v60  ;;  %vm5325_vm13 = vcmask 25600  }
0x1e19   :  { %v3721_v19 = vadd.f32 %v6744_v16, %v3719_v63  ;;  %v3722_v1 = vadd.f32 %v6746_v20, %v3720_v0  ;;  %v3874_v14 = vsel %vm3870_vm14, %v3868_v58, %v3872_v61  ;;  %v3875_v2 = vsel %vm3871_vm15, %v3869_v15, %v3873_v62 }
0x1e1a   :  { %v3876_v40 = vadd.f32 %v6744_v16, %v3874_v14  ;;  %v3877_v3 = vadd.f32 %v6746_v20, %v3875_v2 }
0x1e1b   :  { %v3723_v41 = vsel %vm153_vm0, %v3721_v19, -inf  ;;  %v3724_v4 = vsel %vm153_vm0, %v3722_v1, -inf }
0x1e1c   :  { %v3725_v5 = vmax.f32 %v3723_v41, %v3724_v4  ;;  %v3878_v6 = vsel %vm153_vm0, %v3876_v40, -inf  ;;  %v3879_v7 = vsel %vm153_vm0, %v3877_v3, -inf }
0x1e1d   :  { %v3880_v8 = vmax.f32 %v3878_v6, %v3879_v7 }
0x1e1e   :  { %v3726_v9 = vrot.slane %v3725_v5, 4 }
0x1e1f   :  { %v3881_v10 = vrot.slane %v3880_v8, 4 }
0x1e20   :  { %v3727_v12 = vmax.f32 %v3725_v5, %v3726_v9 }
0x1e21   :  { %v3882_v13 = vmax.f32 %v3880_v8, %v3881_v10 }
0x1e22   :  { %v3728_v21 = vrot.slane %v3727_v12, 2 }
0x1e23   :  { %v3883_v24 = vrot.slane %v3882_v13, 2 }
0x1e24   :  { %v3729_v26 = vmax.f32 %v3727_v12, %v3728_v21 }
0x1e25   :  { %v3884_v28 = vmax.f32 %v3882_v13, %v3883_v24  ;;  %v5433_v13 = vld [vmem:[%s5352_s21] ss:$0 sm:$0xff] }
0x1e26   :  { %v3730_v31 = vrot.slane %v3729_v26, 1 }
0x1e27   :  { %v3885_v33 = vrot.slane %v3884_v28, 1 }
0x1e28   :  { %v3731_v34 = vmax.f32 %v3729_v26, %v3730_v31 }
0x1e29   :  { %v3886_v35 = vmax.f32 %v3884_v28, %v3885_v33 }
0x1e2a   :  { %v3732_v36 = vsub.f32 %v3721_v19, %v3731_v34  ;;  %v3733_v37 = vsub.f32 %v3722_v1, %v3731_v34 }
0x1e2b   :  { %v3887_v54 = vsub.f32 %v3876_v40, %v3886_v35  ;;  %v3888_v38 = vsub.f32 %v3877_v3, %v3886_v35 }
0x1e2c   :  { %v3734_v53 = vmul.f32 1.442695, %v3732_v36  ;;  %v3736_v44 = vmul.f32 1.442695, %v3733_v37 }
0x1e2d   :  { %v3889_v45 = vmul.f32 1.442695, %v3887_v54  ;;  %v3891_v46 = vmul.f32 1.442695, %v3888_v38 }
0x1e2e   :  { %6338 = vpow2.f32 %v3734_v53 }
0x1e2f   :  { %6340 = vpow2.f32 %v3736_v44 }
0x1e30   :  { %6342 = vpow2.f32 %v3889_v45  ;;  %v4366_v45 = vld [vmem:[%s5355_s25] sm:$0xff] }
0x1e31   :  { %6344 = vpow2.f32 %v3891_v46  ;;  %v4367_v46 = vld [vmem:[%s5355_s25 + $0x8] sm:$0xff] }
0x1e38   :  { %v6339_v47 = vpop.eup %6338 }
0x1e39   :  { %v6341_v50 = vpop.eup %6340 }
0x1e3a   :  { %v6343_v51 = vpop.eup %6342  ;;  %v6138_v52 = vpack.c.bf16 %v6341_v50, %v6339_v47 }
0x1e3b   :  { %v6345_v25 = vpop.eup %6344  ;;  %5906 = vmatprep.mubr.msk.f32.mxu0 %vm153_vm0, %v6343_v51 }
0x1e3c   :  { %6139 = vmatpush3.bf16.msra.mxu1 %v6138_v52  ;;  %v6141_v56 = vpack.c.bf16 %v6345_v25, %v6343_v51  ;;  %v4369_v51 = vld [vmem:[%s5355_s25 + $0x18] sm:$0xff] }
0x1e3d   :  { %6140 = vmatprep.subr.bf16.mxu1 %v6374_v22 }
0x1e3f   :  { %5893 = vmatmul.mubr.msk.f32.vlgmr.msra.gmra.mrb[20].mxu1 %vm153_vm0, %v6378_v32 }
0x1e40   :  { %6142 = vmatpush3.bf16.msra.mxu1 %v6141_v56  ;;  %5899 = vmatprep.mubr.msk.f32.mxu1 %vm6375_vm2, %v6376_v23 }
0x1e41   :  { %6151 = vmatprep.subr.bf16.mxu1 %v6374_v22 }
0x1e43   :  { %5900 = vmatmul.mubr.msk.f32.vlgmr.msra.gmra.mrb[22].mxu1 %vm153_vm0, %v6378_v32 }
0x1e44   :  { %5920 = vmatprep.mubr.msk.f32.mxu1 %vm6375_vm2, %v6376_v23 }
0x1f12   :  { %v3804_v57 = vpop.f32.mrb[20].mxu1 }
0x1f13   :  { %v3805_v18 = vadd.f32 1e-16, %v3804_v57  ;;  %v5894_v58 = vpop.f32.mrb[21].mxu1 }
0x1f15   :  { %6346 = vrcp.f32 %v3805_v18 }
0x1f16   :  { %v3959_v15 = vpop.f32.mrb[22].mxu1 }
0x1f17   :  { %v3960_v59 = vadd.f32 1e-16, %v3959_v15  ;;  %v5901_v60 = vpop.f32.mrb[23].mxu1 }
0x1f19   :  { %6348 = vrcp.f32 %v3960_v59  ;;  %v5436_v59 = vld [vmem:[%s5353_s28] ss:$0 sm:$0xff] }
0x1f1f   :  { %v6347_v61 = vpop.eup %6346 }
0x1f20   :  { %3810 = vxpose.xlu0.b32.start.end [1/1] (short) (narrow) %v6347_v61, 16 }
0x1f23   :  { %v6349_v62 = vpop.eup %6348 }
0x1f25   :  { %3965 = vxpose.xlu0.b32.start.end [1/1] (short) (narrow) %v6349_v62, 16  ;;  %v5437_v62 = vld [vmem:[%s5354_s2] ss:$0 sm:$0xff] }
0x1f4e   :  { %6275 = vset.pattern.permute.xlu0 %v6379_v43 }
0x1fa0   :  { %v3826_v63 = vpop.trf.xlu0 }
0x1fa4   :  { %v3827_v0 = vpop.trf.xlu0 }
0x1fa8   :  { %v3981_v19 = vpop.trf.xlu0 }
0x1fa9   :  { %3999 = vperm.xlu0 %6275, %v3981_v19  }
0x1fac   :  { %v3982_v1 = vpop.trf.xlu0 }
0x1fad   :  { %4004 = vperm.xlu1 %6276, %v3982_v1   ;;  %6277 = vset.pattern.permute.xlu0 %v6370_v11 }
0x1fb1   :  { %3844 = vperm.xlu1 %6276, %v3826_v63  }
0x1fb5   :  { %3849 = vperm.xlu1 %6276, %v3827_v0  }
0x1fb9   :  { %6278 = vset.pattern.permute.xlu1 %v6370_v11 }
0x2028   :  { %v4000_v14 = vpop.permute.xlu0 %3999 }
0x2029   :  { %v4007_v2 = vmul.f32 %v4000_v14, %v6506_v49 }
0x202b   :  { %v4009_v41 = vmul.f32 %v4007_v2, %v6809_v42 }
0x202c   :  { %v4005_v40 = vpop.permute.xlu1 %4004 }
0x202d   :  { %v4008_v3 = vmul.f32 %v4005_v40, %v6506_v49 }
0x202f   :  { %v4010_v4 = vmul.f32 %v6805_v39, %v4008_v3 }
0x2030   :  { %v3845_v5 = vpop.permute.xlu1 %3844 }
0x2031   :  { %v6143_v6 = vpack.c.bf16 %v4010_v4, %v4009_v41  ;;  %v3852_v7 = vmul.f32 %v3845_v5, %v6514_v55 }
0x2033   :  { %6144 = vmatprep.subr.bf16.mxu0 %v6143_v6  ;;  %v3854_v11 = vmul.f32 %v3852_v7, %v6809_v42 }
0x2034   :  { %v3850_v8 = vpop.permute.xlu1 %3849  ;;  %6146 = vmatpush3.bf16.msra.mxu0 %v6143_v6 }
0x2035   :  { %v3853_v9 = vmul.f32 %v3850_v8, %v6514_v55 }
0x2037   :  { %v3855_v10 = vmul.f32 %v6805_v39, %v3853_v9  ;;  %5907 = vmatmul.mubr.msk.f32.vlgmr.msra.gmra.mrb[34].mxu0 %vm153_vm0, %v6345_v25 }
0x2038   :  { %5913 = vmatprep.mubr.msk.f32.mxu0 %vm153_vm0, %v6339_v47  ;;  %v4368_v47 = vld [vmem:[%s5355_s25 + $0x10] sm:$0xff] }
0x2039   :  { %v6147_v12 = vpack.c.bf16 %v3855_v10, %v3854_v11  ;;  %v6161_v52 = vpack.c.bf16 %v4369_v51, %v4368_v47 }
0x203b   :  { %6148 = vmatprep.subr.bf16.mxu0 %v6147_v12 }
0x203c   :  { %6150 = vmatpush3.bf16.msra.mxu0 %v6147_v12 }
0x203f   :  { %5914 = vmatmul.mubr.msk.f32.vlgmr.msra.gmra.mrb[34].mxu0 %vm153_vm0, %v6341_v50  ;;  %v6157_v50 = vpack.c.bf16 %v4367_v46, %v4366_v45 }
0x2041   :  { %6158 = vmatprep.subr.bf16.mxu0 %v6157_v50 }
0x2042   :  { %6160 = vmatpush3.bf16.msra.mxu0 %v6157_v50 }
0x2043   :  { %6162 = vmatprep.subr.bf16.mxu0 %v6161_v52 }
0x2046   :  { %6164 = vmatpush3.bf16.msra.mxu0 %v6161_v52 }
0x2112   :  { %v5915_v21 = vpop.f32.mrb[34].mxu0 }
0x2113   :  { %v4181_v24 = vadd.f32 %v5915_v21, %v5433_v13  ;;  %v4164_v42 = vpop.f32.mrb[35].mxu0 }
0x2114   :  { %v4180_v26 = vadd.f32 %v5433_v13, %v4164_v42 }
0x2115   :  { %v4183_v39 = vmax.f32 %v4181_v24, 0.0 }
0x2116   :  { %v4182_v28 = vmax.f32 %v4180_v26, 0.0 }
0x2118   :  { %v6152_v31 = vpack.c.bf16 %v4183_v39, %v4182_v28 }
0x211a   :  { %6153 = vmatpush3.bf16.msra.mxu1 %v6152_v31 }
0x211b   :  { %6154 = vmatprep.subr.bf16.mxu1 %v6374_v22 }
0x211d   :  { %5921 = vmatmul.mubr.msk.f32.vlgmr.msra.gmra.mrb[24].mxu1 %vm153_vm0, %v6378_v32 }
0x211e   :  { %5927 = vmatprep.mubr.msk.f32.mxu1 %vm6375_vm2, %v6376_v23 }
0x21f0   :  { %v4250_v33 = vpop.f32.mrb[24].mxu1 }
0x21f1   :  { %v4254_v34 = vmul.f32 0.0625, %v4250_v33  ;;  %v5922_v35 = vpop.f32.mrb[25].mxu1 }
0x21f3   :  { %v4258_v36 = vrot.slane %v4254_v34, %v6460_v29 }
0x21f5   :  { %v4259_v37 = vsub.f32 %v4182_v28, %v4258_v36  ;;  %v4260_v54 = vsub.f32 %v4183_v39, %v4258_v36 }
0x21f7   :  { %v4261_v38 = vmul.f32 %v4259_v37, %v4259_v37  ;;  %v4262_v53 = vmul.f32 %v4260_v54, %v4260_v54 }
0x21f9   :  { %v6155_v44 = vpack.c.bf16 %v4262_v53, %v4261_v38 }
0x21fb   :  { %6156 = vmatpush3.bf16.msra.mxu1 %v6155_v44 }
0x21fc   :  { %6165 = vmatprep.subr.bf16.mxu1 %v6374_v22 }
0x21fe   :  { %5928 = vmatmul.mubr.msk.f32.vlgmr.msra.gmra.mrb[26].mxu1 %vm153_vm0, %v6378_v32 }
0x21ff   :  { %5945 = vmatprep.mubr.msk.f32.mxu1 %vm6375_vm2, %v6376_v23 }
0x22d1   :  { %v4329_v25 = vpop.f32.mrb[26].mxu1 }
0x22d2   :  { %v4333_v56 = vmul.f32 0.0625, %v4329_v25  ;;  %v5929_v57 = vpop.f32.mrb[27].mxu1 }
0x22d4   :  { %v4334_v18 = vadd.f32 1e-05, %v4333_v56 }
0x22d6   :  { %6350 = vrsqrt.f32 %v4334_v18 }
0x22e0   :  { %v6351_v58 = vpop.eup %6350 }
0x22e1   :  { %v4339_v15 = vrot.slane %v6351_v58, %v6460_v29 }
0x22e3   :  { %v4340_v60 = vmul.f32 %v4339_v15, %v4259_v37  ;;  %v4341_v61 = vmul.f32 %v4339_v15, %v4260_v54 }
0x22e5   :  { %v4349_v63 = vmul.f32 %v5436_v59, %v4340_v60  ;;  %v4350_v0 = vmul.f32 %v5436_v59, %v4341_v61 }
0x22e7   :  { %v4358_v19 = vadd.f32 %v5437_v62, %v4349_v63  ;;  %v4359_v1 = vadd.f32 %v5437_v62, %v4350_v0 }
0x22e9   :  { %vm4360_vm3 = vcmp.gt.f32.partialorder %v4358_v19, 0.0  ;;  %v4362_v14 = vmul.f32 0.1, %v4358_v19  ;;  %vm4361_vm4 = vcmp.gt.f32.partialorder %v4359_v1, 0.0  ;;  %v4363_v2 = vmul.f32 0.1, %v4359_v1 }
0x22eb   :  { %v4364_v40 = vsel %vm4360_vm3, %v4358_v19, %v4362_v14  ;;  %v4365_v3 = vsel %vm4361_vm4, %v4359_v1, %v4363_v2 }
0x22ec   :  { %5938 = vmatprep.mubr.msk.f32.mxu0 %vm243_vm1, %v4364_v40 }
0x22ed   :  { %5939 = vmatmul.mubr.msk.f32.vlgmr.msra.gmra.mrb[36].mxu0 %vm243_vm1, %v4365_v3 }
0x23c0   :  { %v6881_v41 = vpop.f32.mrb[36].mxu0 }
0x23c1   :  { %4455 = vrot.lane.b32.xlu0 %v6881_v41, %s6373_s18  ;;  %v6885_v4 = vpop.f32.mrb[37].mxu0 }
0x23c2   :  { %4453 = vrot.lane.b32.xlu1 %v6885_v4, %s6373_s18  ;;  %s6404_s18 = smov 26  }
0x23c3   :  { %s5356_s5 = sld [smem:[%s6968_s0 + %s6404_s18]]  }
0x23c5   :  { %4496 = vperm.xlu0 %6277, %v6881_v41  }
0x23c6   :  { %4492 = vperm.xlu1 %6278, %v6885_v4  }
0x23ca   :  { %6279 = vset.pattern.permute.xlu1 %v6372_v17 }
0x23cb   :  { %4647 = vperm.xlu1 %6279, %v6885_v4  }
0x23cf   :  { %4651 = vperm.xlu1 %6279, %v6881_v41  }
0x2433   :  { %v4456_v6 = vpop.permute.xlu0 %4455 }
0x2434   :  { %v4454_v5 = vpop.permute.xlu1 %4453 }
0x2435   :  { %4459 = vxpose.xlu0.b32.start [1/2] (short) (narrow) %v4454_v5, 8 }
0x2439   :  { %4460 = vxpose.xlu0.b32.end [2/2] (short) (narrow) %v4456_v6, 8 }
0x2444   :  { %v4497_v8 = vpop.permute.xlu0 %4496 }
0x2445   :  { %v4493_v7 = vpop.permute.xlu1 %4492 }
0x244a   :  { %v4648_v9 = vpop.permute.xlu1 %4647 }
0x244e   :  { %v4652_v13 = vpop.permute.xlu1 %4651 }
0x24b5   :  { %v4475_v11 = vpop.trf.xlu0 }
0x24b6   :  { %v4502_v10 = vrot.slane %v4475_v11, %v6460_v29  ;;  %v4657_v12 = vrot.slane %v4475_v11, %v6463_v30 }
0x24b8   :  { %v4503_v21 = vadd.f32 %v4502_v10, %v4493_v7  ;;  %v4504_v24 = vadd.f32 %v4502_v10, %v4497_v8  ;;  %v4658_v17 = vadd.f32 %v4657_v12, %v4648_v9  ;;  %v4659_v42 = vadd.f32 %v4657_v12, %v4652_v13 }
0x24ba   :  { %vm4505_vm5 = vcmp.gt.f32.partialorder %v4503_v21, 0.0  ;;  %vm4506_vm6 = vcmp.gt.f32.partialorder %v4504_v24, 0.0  ;;  %v4507_v26 = vmul.f32 0.2, %v4503_v21  ;;  %v4508_v39 = vmul.f32 0.2, %v4504_v24 }
0x24bb   :  { %vm4660_vm7 = vcmp.gt.f32.partialorder %v4658_v17, 0.0  ;;  %vm4661_vm8 = vcmp.gt.f32.partialorder %v4659_v42, 0.0  ;;  %v4662_v28 = vmul.f32 0.2, %v4658_v17  ;;  %v4663_v31 = vmul.f32 0.2, %v4659_v42 }
0x24bc   :  { %v4509_v33 = vsel %vm4505_vm5, %v4503_v21, %v4507_v26  ;;  %v4510_v34 = vsel %vm4506_vm6, %v4504_v24, %v4508_v39 }
0x24bd   :  { %v4511_v35 = vadd.f32 %v6744_v16, %v4509_v33  ;;  %v4512_v36 = vadd.f32 %v6746_v20, %v4510_v34  ;;  %v4664_v30 = vsel %vm4660_vm7, %v4658_v17, %v4662_v28  ;;  %v4665_v37 = vsel %vm4661_vm8, %v4659_v42, %v4663_v31 }
0x24be   :  { %v4666_v54 = vadd.f32 %v6744_v16, %v4664_v30  ;;  %v4667_v38 = vadd.f32 %v6746_v20, %v4665_v37 }
0x24bf   :  { %v4513_v53 = vsel %vm153_vm0, %v4511_v35, -inf  ;;  %v4514_v44 = vsel %vm153_vm0, %v4512_v36, -inf }
0x24c0   :  { %v4515_v45 = vmax.f32 %v4513_v53, %v4514_v44  ;;  %v4668_v46 = vsel %vm153_vm0, %v4666_v54, -inf  ;;  %v4669_v47 = vsel %vm153_vm0, %v4667_v38, -inf }
0x24c1   :  { %v4670_v50 = vmax.f32 %v4668_v46, %v4669_v47 }
0x24c2   :  { %v4516_v51 = vrot.slane %v4515_v45, 4 }
0x24c3   :  { %v4671_v52 = vrot.slane %v4670_v50, 4 }
0x24c4   :  { %v4517_v25 = vmax.f32 %v4515_v45, %v4516_v51 }
0x24c5   :  { %v4672_v56 = vmax.f32 %v4670_v50, %v4671_v52 }
0x24c6   :  { %v4518_v57 = vrot.slane %v4517_v25, 2 }
0x24c7   :  { %v4673_v18 = vrot.slane %v4672_v56, 2 }
0x24c8   :  { %v4519_v58 = vmax.f32 %v4517_v25, %v4518_v57 }
0x24c9   :  { %v4674_v16 = vmax.f32 %v4672_v56, %v4673_v18 }
0x24ca   :  { %v4520_v15 = vrot.slane %v4519_v58, 1 }
0x24cb   :  { %v4675_v20 = vrot.slane %v4674_v16, 1 }
0x24cc   :  { %v4521_v59 = vmax.f32 %v4519_v58, %v4520_v15 }
0x24cd   :  { %v4676_v60 = vmax.f32 %v4674_v16, %v4675_v20 }
0x24ce   :  { %v4522_v61 = vsub.f32 %v4511_v35, %v4521_v59  ;;  %v4523_v62 = vsub.f32 %v4512_v36, %v4521_v59 }
0x24cf   :  { %v4677_v63 = vsub.f32 %v4666_v54, %v4676_v60  ;;  %v4678_v0 = vsub.f32 %v4667_v38, %v4676_v60  ;;  %v5241_v60 = vld [vmem:[%s5362_s10] sm:$0xff] }
0x24d0   :  { %v4524_v19 = vmul.f32 1.442695, %v4522_v61  ;;  %v4526_v1 = vmul.f32 1.442695, %v4523_v62  ;;  %v5242_v61 = vld [vmem:[%s5362_s10 + $0x8] sm:$0xff]  ;;  %v5243_v62 = vld [vmem:[%s5362_s10 + $0x10] sm:$0xff] }
0x24d1   :  { %v4679_v14 = vmul.f32 1.442695, %v4677_v63  ;;  %v4681_v2 = vmul.f32 1.442695, %v4678_v0  ;;  %v6189_v63 = vpack.c.bf16 %v5242_v61, %v5241_v60  ;;  %v5244_v0 = vld [vmem:[%s5362_s10 + $0x18] sm:$0xff] }
0x24d2   :  { %6352 = vpow2.f32 %v4524_v19  ;;  %v6192_v19 = vpack.c.bf16 %v5244_v0, %v5243_v62 }
0x24d3   :  { %6354 = vpow2.f32 %v4526_v1 }
0x24d4   :  { %6356 = vpow2.f32 %v4679_v14 }
0x24d5   :  { %6358 = vpow2.f32 %v4681_v2 }
0x24dc   :  { %v6353_v40 = vpop.eup %6352 }
0x24dd   :  { %v6355_v3 = vpop.eup %6354 }
0x24de   :  { %v6357_v5 = vpop.eup %6356  ;;  %v6166_v6 = vpack.c.bf16 %v6355_v3, %v6353_v40 }
0x24df   :  { %v6359_v7 = vpop.eup %6358  ;;  %5959 = vmatprep.mubr.msk.f32.mxu0 %vm153_vm0, %v6357_v5 }
0x24e0   :  { %6167 = vmatpush3.bf16.msra.mxu1 %v6166_v6  ;;  %v6169_v8 = vpack.c.bf16 %v6359_v7, %v6357_v5 }
0x24e1   :  { %6168 = vmatprep.subr.bf16.mxu1 %v6374_v22 }
0x24e3   :  { %5946 = vmatmul.mubr.msk.f32.vlgmr.msra.gmra.mrb[28].mxu1 %vm153_vm0, %v6378_v32 }
0x24e4   :  { %6170 = vmatpush3.bf16.msra.mxu1 %v6169_v8  ;;  %5952 = vmatprep.mubr.msk.f32.mxu1 %vm6375_vm2, %v6376_v23  ;;  %v5162_v8 = vmul.u32 8, %v6457_v27 }
0x24e5   :  { %6179 = vmatprep.subr.bf16.mxu1 %v6374_v22 }
0x24e6   :  { %vm5163_vm10 = vcmp.ge.s32.totalorder %v6501_v48, %v5162_v8 }
0x24e7   :  { %5953 = vmatmul.mubr.msk.f32.vlgmr.msra.gmra.mrb[30].mxu1 %vm153_vm0, %v6378_v32 }
0x24e8   :  { %5973 = vmatprep.mubr.msk.f32.mxu1 %vm6375_vm2, %v6376_v23 }
0x25b6   :  { %v4594_v9 = vpop.f32.mrb[28].mxu1 }
0x25b7   :  { %v4595_v11 = vadd.f32 1e-16, %v4594_v9  ;;  %v5947_v10 = vpop.f32.mrb[29].mxu1 }
0x25b9   :  { %6360 = vrcp.f32 %v4595_v11 }
0x25ba   :  { %v4749_v12 = vpop.f32.mrb[30].mxu1 }
0x25bb   :  { %v4750_v13 = vadd.f32 1e-16, %v4749_v12  ;;  %v5954_v21 = vpop.f32.mrb[31].mxu1 }
0x25bd   :  { %6362 = vrcp.f32 %v4750_v13  ;;  %v5164_v13 = vadd.s32 8, %v5162_v8 }
0x25bf   :  { %vm5165_vm11 = vcmp.lt.s32.totalorder %v6501_v48, %v5164_v13  ;;  %v5452_v48 = vld [vmem:[%s5363_s23] ss:$0 sm:$0xff] }
0x25c0   :  { %vm5166_vm12 = vmand %vm5163_vm10, %vm5165_vm11 }
0x25c3   :  { %v6361_v24 = vpop.eup %6360 }
0x25c4   :  { %4600 = vxpose.xlu0.b32.start.end [1/1] (short) (narrow) %v6361_v24, 16 }
0x25c7   :  { %v6363_v17 = vpop.eup %6362 }
0x25c8   :  { %4755 = vxpose.xlu1.b32.start.end [1/1] (short) (narrow) %v6363_v17, 16 }
0x25e6   :  { %6281 = vset.pattern.permute.xlu1 %v6379_v43 }
0x25ed   :  { %6280 = vset.pattern.permute.xlu0 %v6379_v43 }
0x2644   :  { %v4616_v39 = vpop.trf.xlu0 }
0x2648   :  { %v4771_v42 = vpop.trf.xlu1  ;;  %v4617_v28 = vpop.trf.xlu0 }
0x2649   :  { %4789 = vperm.xlu0 %6280, %v4771_v42  }
0x264c   :  { %v4772_v26 = vpop.trf.xlu1 }
0x264d   :  { %4794 = vperm.xlu1 %6281, %v4772_v26  }
0x2651   :  { %4634 = vperm.xlu1 %6281, %v4616_v39  }
0x2655   :  { %4639 = vperm.xlu1 %6281, %v4617_v28  }
0x26c8   :  { %v4790_v31 = vpop.permute.xlu0 %4789 }
0x26c9   :  { %v4797_v33 = vmul.f32 %v4790_v31, %v6506_v49  ;;  %v5167_v31 = vsel %vm5166_vm12, 0.125, %v6376_v23 }
0x26cb   :  { %v4799_v36 = vmul.f32 %v4797_v33, %v6885_v4 }
0x26cc   :  { %v4795_v34 = vpop.permute.xlu1 %4794 }
0x26cd   :  { %v4798_v35 = vmul.f32 %v4795_v34, %v6506_v49 }
0x26cf   :  { %v4800_v30 = vmul.f32 %v6881_v41, %v4798_v35 }
0x26d0   :  { %v4635_v37 = vpop.permute.xlu1 %4634 }
0x26d1   :  { %v6171_v43 = vpack.c.bf16 %v4800_v30, %v4799_v36  ;;  %v4642_v54 = vmul.f32 %v4635_v37, %v6514_v55 }
0x26d3   :  { %6172 = vmatprep.subr.bf16.mxu0 %v6171_v43  ;;  %v4644_v44 = vmul.f32 %v4642_v54, %v6885_v4 }
0x26d4   :  { %6174 = vmatpush3.bf16.msra.mxu0 %v6171_v43  ;;  %v4640_v38 = vpop.permute.xlu1 %4639 }
0x26d5   :  { %v4643_v53 = vmul.f32 %v4640_v38, %v6514_v55  ;;  %v5446_v55 = vld [vmem:[%s5356_s5] ss:$0 sm:$0xff] }
0x26d7   :  { %v4645_v45 = vmul.f32 %v6881_v41, %v4643_v53  ;;  %5960 = vmatmul.mubr.msk.f32.vlgmr.msra.gmra.mrb[38].mxu0 %vm153_vm0, %v6359_v7  ;;  %v5450_v7 = vld [vmem:[%s5358_s19] ss:$0 sm:$0xff] }
0x26d8   :  { %5966 = vmatprep.mubr.msk.f32.mxu0 %vm153_vm0, %v6353_v40 }
0x26d9   :  { %v6175_v49 = vpack.c.bf16 %v4645_v45, %v4644_v44 }
0x26db   :  { %6176 = vmatprep.subr.bf16.mxu0 %v6175_v49 }
0x26dc   :  { %6178 = vmatpush3.bf16.msra.mxu0 %v6175_v49 }
0x26dd   :  { %6185 = vmatprep.subr.bf16.mxu0 %v6374_v22 }
0x26df   :  { %5967 = vmatmul.mubr.msk.f32.vlgmr.msra.gmra.mrb[38].mxu0 %vm153_vm0, %v6355_v3 }
0x26e0   :  { %5987 = vmatprep.mubr.msk.f32.mxu0 %vm6375_vm2, %v6376_v23 }
0x27b2   :  { %v5968_v41 = vpop.f32.mrb[38].mxu0 }
0x27b3   :  { %v4971_v4 = vadd.f32 %v5968_v41, %v5446_v55  ;;  %v4954_v46 = vpop.f32.mrb[39].mxu0 }
0x27b4   :  { %v4970_v47 = vadd.f32 %v5446_v55, %v4954_v46 }
0x27b5   :  { %v4973_v50 = vmax.f32 %v4971_v4, 0.0 }
0x27b6   :  { %v4972_v51 = vmax.f32 %v4970_v47, 0.0 }
0x27b8   :  { %v6180_v52 = vpack.c.bf16 %v4973_v50, %v4972_v51 }
0x27ba   :  { %6181 = vmatpush3.bf16.msra.mxu1 %v6180_v52 }
0x27bb   :  { %6182 = vmatprep.subr.bf16.mxu1 %v6374_v22 }
0x27bd   :  { %5974 = vmatmul.mubr.msk.f32.vlgmr.msra.gmra.mrb[32].mxu1 %vm153_vm0, %v6378_v32 }
0x27be   :  { %5980 = vmatprep.mubr.msk.f32.mxu1 %vm6375_vm2, %v6376_v23 }
0x2890   :  { %v5040_v25 = vpop.f32.mrb[32].mxu1 }
0x2891   :  { %v5044_v56 = vmul.f32 0.0625, %v5040_v25  ;;  %v5975_v57 = vpop.f32.mrb[33].mxu1 }
0x2893   :  { %v5048_v18 = vrot.slane %v5044_v56, %v6460_v29 }
0x2895   :  { %v5049_v58 = vsub.f32 %v4972_v51, %v5048_v18  ;;  %v5050_v16 = vsub.f32 %v4973_v50, %v5048_v18 }
0x2897   :  { %v5051_v15 = vmul.f32 %v5049_v58, %v5049_v58  ;;  %v5052_v20 = vmul.f32 %v5050_v16, %v5050_v16 }
0x2899   :  { %v6183_v59 = vpack.c.bf16 %v5052_v20, %v5051_v15 }
0x289b   :  { %6184 = vmatpush3.bf16.msra.mxu1 %v6183_v59 }
0x289c   :  { %6188 = vmatprep.subr.bf16.mxu1 %v6374_v22 }
0x289e   :  { %5981 = vmatmul.mubr.msk.f32.vlgmr.msra.gmra.mrb[34].mxu1 %vm153_vm0, %v6378_v32 }
0x289f   :  { %5998 = vmatprep.mubr.msk.f32.mxu1 %vm6375_vm2, %v6376_v23  ;;  %6190 = vmatpush3.bf16.msra.mxu1 %v6189_v63 }
0x28a0   :  { %6191 = vmatprep.subr.bf16.mxu1 %v6374_v22  ;;  %v5449_v22 = vld [vmem:[%s5357_s14] ss:$0 sm:$0xff] }
0x28a3   :  { %6193 = vmatpush3.bf16.msra.mxu1 %v6192_v19 }
0x2971   :  { %v5119_v1 = vpop.f32.mrb[34].mxu1 }
0x2972   :  { %v5123_v32 = vmul.f32 0.0625, %v5119_v1  ;;  %v5982_v14 = vpop.f32.mrb[35].mxu1 }
0x2974   :  { %v5124_v2 = vadd.f32 1e-05, %v5123_v32 }
0x2976   :  { %6364 = vrsqrt.f32 %v5124_v2 }
0x2980   :  { %v6365_v40 = vpop.eup %6364 }
0x2981   :  { %v5129_v3 = vrot.slane %v6365_v40, %v6460_v29 }
0x2983   :  { %v5130_v5 = vmul.f32 %v5129_v3, %v5049_v58  ;;  %v5131_v6 = vmul.f32 %v5129_v3, %v5050_v16 }
0x2985   :  { %v5139_v9 = vmul.f32 %v5449_v22, %v5130_v5  ;;  %v5140_v11 = vmul.f32 %v5449_v22, %v5131_v6 }
0x2987   :  { %v5148_v10 = vadd.f32 %v5450_v7, %v5139_v9  ;;  %v5149_v12 = vadd.f32 %v5450_v7, %v5140_v11 }
0x2989   :  { %vm5150_vm2 = vcmp.gt.f32.partialorder %v5148_v10, 0.0  ;;  %vm5151_vm9 = vcmp.gt.f32.partialorder %v5149_v12, 0.0  ;;  %v5152_v21 = vmul.f32 0.1, %v5148_v10  ;;  %v5153_v24 = vmul.f32 0.1, %v5149_v12 }
0x298b   :  { %v5154_v17 = vsel %vm5150_vm2, %v5148_v10, %v5152_v21  ;;  %v5155_v42 = vsel %vm5151_vm9, %v5149_v12, %v5153_v24 }
0x298c   :  { %v5156_v26 = vmax.f32 %v5154_v17, 0.0  ;;  %v5157_v39 = vmax.f32 %v5155_v42, 0.0 }
0x298e   :  { %v5158_v29 = vmin.f32 %v5156_v26, 100.0  ;;  %v5159_v28 = vmin.f32 %v5157_v39, 100.0 }
0x2990   :  { %v6186_v27 = vpack.c.bf16 %v5159_v28, %v5158_v29 }
0x2992   :  { %6187 = vmatpush3.bf16.msra.mxu0 %v6186_v27 }
0x2995   :  { %5988 = vmatmul.mubr.msk.f32.vlgmr.msra.gmra.mrb[40].mxu0 %vm153_vm0, %v5167_v31 }
0x2a68   :  { %v5237_v33 = vpop.f32.mrb[40].mxu0 }
0x2a69   :  { %v5989_v34 = vpop.f32.mrb[41].mxu0  ;;  %5999 = vmatmul.mubr.msk.f32.vlgmr.msra.gmra.mrb[36].mxu1 %vm243_vm1, %v5237_v33 }
0x2b3c   :  { %v5321_v35 = vpop.f32.mrb[36].mxu1 }
0x2b3d   :  { %v5322_v23 = vadd.f32 %v5452_v48, %v5321_v35  ;;  %v6000_v36 = vpop.f32.mrb[37].mxu1 }
0x2b3f   :  { %5326 = vst.msk [vmem:[%s5364_s9] sm:$0x3] %vm5325_vm13, %v5322_v23 }

</bundles_post_ra>
